<compile_context>
chip_gen: v7x
topology: tpu7x:2x2x1
jax: 0.10.0
libtpu: 0.0.40
codegen_flags: <defaults>
</compile_context>

<pallas_src>
import math

import jax
import jax.numpy as jnp
from jax.experimental import pallas as pl
from jax.experimental.pallas import tpu as pltpu

_LANE = 128
_BN_EPS = 1e-5


def _round_up(n, m):
    return ((n + m - 1) // m) * m


def _fold_bn(w, gamma, beta, mean, var, eps=_BN_EPS):
    """Fold eval-mode BatchNorm2d into a (bias-free) conv: y = conv(x, w*s) + b."""
    s = gamma / jnp.sqrt(var + eps)
    return w * s[:, None, None, None], beta - mean * s


def _pack_weight(w_f, b_f, cin_p, cout_p):
    """OIHW conv weight -> (9, cin_p, cout_p) per-tap matrices + (1, cout_p) bias."""
    cout, cin = w_f.shape[0], w_f.shape[1]
    w9 = jnp.transpose(w_f, (2, 3, 1, 0)).reshape(9, cin, cout)   # tap = kh*3+kw
    w9 = jnp.pad(w9, ((0, 0), (0, cin_p - cin), (0, cout_p - cout)))
    bp = jnp.pad(b_f, (0, cout_p - cout)).reshape(1, cout_p)
    return w9, bp


def _fused_merge_convs(x_flat, w1, b1, w2, b2, H, W, out_dtype):
    """Fused conv3x3+BN+ReLU -> conv3x3+BN+ReLU, single pallas_call.

    x_flat : (B, Lin, Cp)  flattened, spatially padded NHWC slab
             (pad: 1 top, 2 bottom, 1 left, 1 right), Lin = (H+3)*(W+2),
             channels padded to a multiple of 128.
    w1     : (9, Cp, Mp)   per-tap conv1 weights (BN folded in).
    b1     : (1, Mp)       conv1 folded bias (f32).
    w2     : (9, Mp, Np)   per-tap conv2 weights (BN folded in).
    b2     : (1, Np)       conv2 folded bias (f32).
    returns (B, H*(W+2), Np): row h*(W+2)+w is output pixel (h, w) for w < W;
             columns w in {W, W+1} are wrap-around garbage stripped by caller.
    """
    B, Lin, Cp = x_flat.shape
    Wp2 = W + 2
    HWp = H * Wp2
    Lmid = (H + 3) * Wp2
    assert Lin == Lmid
    Mp = w1.shape[2]
    Np = w2.shape[2]
    cdt = x_flat.dtype                       # dtype fed to the MXU (f32 / bf16)
    taps = [(kh, kw) for kh in range(3) for kw in range(3)]

    def kernel(x_ref, w1_ref, b1_ref, w2_ref, b2_ref, o_ref,
               acc1_ref, y1_ref, acc2_ref):
        # ---------- conv1 + folded BN + ReLU -> VMEM intermediate ----------
        for t, (kh, kw) in enumerate(taps):
            off = kh * Wp2 + kw                       # static row offset
            tap = x_ref[0, pl.ds(off, HWp), :]        # contiguous window, no relayout
            d = jnp.dot(tap, w1_ref[t], preferred_element_type=jnp.float32)
            if t == 0:
                acc1_ref[...] = d + b1_ref[...]
            else:
                acc1_ref[...] += d

        # ReLU + zero the wrap-around columns (a mod Wp2 >= W): these land
        # exactly on conv2's left/right zero border, so no extra border pass.
        col = jax.lax.broadcasted_iota(jnp.int32, (HWp, 1), 0) % Wp2
        y1 = jnp.where(col < W, jnp.maximum(acc1_ref[...], 0.0), 0.0).astype(cdt)

        # Zero only the top/bottom border rows, then one aligned-size store of
        # the interior (no full-tile zero + rewrite).
        y1_ref[pl.ds(0, Wp2 + 1), :] = jnp.zeros((Wp2 + 1, Mp), cdt)
        y1_ref[pl.ds(Wp2 + 1, HWp), :] = y1
        tail0 = (H + 1) * Wp2 + 1
        y1_ref[pl.ds(tail0, Lmid - tail0), :] = jnp.zeros((Lmid - tail0, Mp), cdt)

        # ---------- conv2 + folded BN + ReLU -> output ----------
        for t, (kh, kw) in enumerate(taps):
            off = kh * Wp2 + kw
            tap = y1_ref[pl.ds(off, HWp), :]
            d = jnp.dot(tap, w2_ref[t], preferred_element_type=jnp.float32)
            if t == 0:
                acc2_ref[...] = d + b2_ref[...]
            else:
                acc2_ref[...] += d
        # Offset-0, lane-dense store; garbage columns stripped by the wrapper.
        o_ref[0, :, :] = jnp.maximum(acc2_ref[...], 0.0).astype(o_ref.dtype)

    # VMEM budget: double-buffered in/out blocks + resident weights + scratch.
    esz = jnp.dtype(cdt).itemsize
    in_block = Lin * Cp * esz
    out_block = HWp * Np * jnp.dtype(out_dtype).itemsize
    w_bytes = (9 * Cp * Mp + 9 * Mp * Np) * esz + (Mp + Np) * 4
    scratch = HWp * Mp * 4 + Lmid * Mp * esz + HWp * Np * 4
    est = 2 * (in_block + out_block) + 2 * w_bytes + scratch + (2 << 20)
    # 100 MiB clamp uses v5e/v6e headroom; v7x (64 MiB) at production sizes
    # needs the H-tiled variant (see TODO above).  Test sizes are tiny.
    vmem_limit = int(min(max(est, 8 << 20), 100 << 20))

    return pl.pallas_call(
        kernel,
        out_shape=jax.ShapeDtypeStruct((B, HWp, Np), out_dtype),
        grid_spec=pltpu.PrefetchScalarGridSpec(
            num_scalar_prefetch=0,
            grid=(B,),
            in_specs=[
                pl.BlockSpec((1, Lin, Cp), lambda b: (b, 0, 0)),
                # Constant index_maps -> weights/biases stay VMEM resident.
                # (On v7x, single-buffering them would save ~1-2 MiB VMEM.)
                pl.BlockSpec((9, Cp, Mp), lambda b: (0, 0, 0)),
                pl.BlockSpec((1, Mp), lambda b: (0, 0)),
                pl.BlockSpec((9, Mp, Np), lambda b: (0, 0, 0)),
                pl.BlockSpec((1, Np), lambda b: (0, 0)),
            ],
            out_specs=pl.BlockSpec((1, HWp, Np), lambda b: (b, 0, 0)),
            scratch_shapes=[
                pltpu.VMEM((HWp, Mp), jnp.float32),    # conv1 accumulator
                pltpu.VMEM((Lmid, Mp), cdt),           # zero-bordered intermediate
                pltpu.VMEM((HWp, Np), jnp.float32),    # conv2 accumulator
            ],
        ),
        compiler_params=pltpu.CompilerParams(
            dimension_semantics=("parallel",),
            vmem_limit_bytes=vmem_limit),
    )(x_flat, w1, b1, w2, b2)


def merge_forward(x_low, x_high, params, *, scale_factor=2, use_bf16=False):
    """Forward pass of Merge (inference semantics)."""
    B, c_low, H, W = x_low.shape
    _, c_high, Hh, Wh = x_high.shape
    cin = c_low + c_high
    c_mid = params["w1"].shape[0]
    cout = params["w2"].shape[0]
    out_dtype = x_low.dtype

    # Bilinear upsample (half-pixel centers == align_corners=False for 2x),
    # channel concat, eval-mode dropout (identity).
    # TODO(synk): fold the fixed-weight 2x bilinear taps + concat into the conv1
    # kernel to drop these wrapper HBM passes; training-mode dropout would use
    # pltpu.prng_seed / pltpu.prng_random_bits inside the kernel.
    x_high_up = jax.image.resize(
        x_high, (B, c_high, Hh * scale_factor, Wh * scale_factor),
        method="bilinear")
    x = jnp.concatenate([x_low, x_high_up], axis=1)            # (B, cin, H, W)

    cin_p = _round_up(cin, _LANE)
    cmid_p = _round_up(c_mid, _LANE)
    cout_p = _round_up(cout, _LANE)

    # NCHW -> NHWC, lane-pad channels, spatial halo pad (1 top, 2 bottom, 1/1
    # left-right; the extra bottom row is read-slack for the flattened-window
    # tap scheme), then flatten (free reshape) to (B, (H+3)*(W+2), cin_p).
    x = jnp.transpose(x, (0, 2, 3, 1))
    x = jnp.pad(x, ((0, 0), (1, 2), (1, 1), (0, cin_p - cin)))
    x = x.reshape(B, (H + 3) * (W + 2), cin_p)

    # Fold eval-mode BN into the conv weights; pack lane-padded per-tap matrices.
    w1f, b1f = _fold_bn(params["w1"], *params["bn1"])
    w2f, b2f = _fold_bn(params["w2"], *params["bn2"])
    w1p, b1p = _pack_weight(w1f, b1f, cin_p, cmid_p)
    w2p, b2p = _pack_weight(w2f, b2f, cmid_p, cout_p)

    if use_bf16:   # bf16 activations/weights/intermediate; f32 accumulation.
        x = x.astype(jnp.bfloat16)
        w1p = w1p.astype(jnp.bfloat16)
        w2p = w2p.astype(jnp.bfloat16)

    y = _fused_merge_convs(x, w1p, b1p, w2p, b2p, H, W, out_dtype)
    # (B, H*(W+2), cout_p): strip wrap-around columns + channel pad inside the
    # NHWC->NCHW transpose (single fused XLA pass).
    y = y.reshape(B, H, W + 2, cout_p)[:, :, :W, :cout]
    return jnp.transpose(y, (0, 3, 1, 2)).astype(out_dtype)


def _reference(x_low, x_high, params, scale_factor):
    """Pure-JAX reference (lax conv + eval BN + ReLU)."""
    B, c_high, Hh, Wh = x_high.shape
    x_high_up = jax.image.resize(
        x_high, (B, c_high, Hh * scale_factor, Wh * scale_factor),
        method="bilinear")
    x = jnp.concatenate([x_low, x_high_up], axis=1)

    def conv_bn_relu(x, w, bn):
        gamma, beta, mean, var = bn
        y = jax.lax.conv_general_dilated(
            x, w, window_strides=(1, 1), padding=((1, 1), (1, 1)),
            dimension_numbers=("NCHW", "OIHW", "NCHW"))
        s = gamma / jnp.sqrt(var + _BN_EPS)
        y = y * s[None, :, None, None] + (beta - mean * s)[None, :, None, None]
        return jnp.maximum(y, 0.0)

    y = conv_bn_relu(x, params["w1"], params["bn1"])
    return conv_bn_relu(y, params["w2"], params["bn2"])


if __name__ == "__main__":
    key = jax.random.PRNGKey(0)
    ks = jax.random.split(key, 12)

    B = 2
    c_low, c_high, cout = 4, 4, 4
    scale_factor = 2
    H, W = 16, 16
    Hh, Wh = H // scale_factor, W // scale_factor
    cin = c_low + c_high
    c_mid = cin // 2

    x_low = jax.random.normal(ks[0], (B, c_low, H, W), dtype=jnp.float32)
    x_high = jax.random.normal(ks[1], (B, c_high, Hh, Wh), dtype=jnp.float32)

    def conv_init(k, co, ci):
        bound = 1.0 / math.sqrt(ci * 9)
        return jax.random.uniform(k, (co, ci, 3, 3), minval=-bound,
                                  maxval=bound, dtype=jnp.float32)

    def bn_init(kg, kb, km, kv, c):
        gamma = jax.random.uniform(kg, (c,), minval=0.5, maxval=1.5,
                                   dtype=jnp.float32)
        beta = 0.1 * jax.random.normal(kb, (c,), dtype=jnp.float32)
        mean = 0.1 * jax.random.normal(km, (c,), dtype=jnp.float32)
        var = jax.random.uniform(kv, (c,), minval=0.5, maxval=1.5,
                                 dtype=jnp.float32)
        return (gamma, beta, mean, var)

    params = {
        "w1": conv_init(ks[2], c_mid, cin),
        "bn1": bn_init(ks[3], ks[4], ks[5], ks[6], c_mid),
        "w2": conv_init(ks[7], cout, c_mid),
        "bn2": bn_init(ks[8], ks[9], ks[10], ks[11], cout),
    }

    merge_jit = jax.jit(
        lambda xl, xh, p: merge_forward(xl, xh, p, scale_factor=scale_factor))
    out = jax.block_until_ready(merge_jit(x_low, x_high, params))
    assert out.shape == (B, cout, H, W), out.shape

    ref = _reference(x_low, x_high, params, scale_factor)
    err = float(jnp.max(jnp.abs(out - ref)))
    assert jnp.allclose(out, ref, atol=1e-3, rtol=1e-3), err

    print("KERNEL_OK")
</pallas_src>

<mosaic_0001>
module attributes {stable_mosaic.version = 11 : i64} {
  func.func @kernel(%arg0: i32, %arg1: memref<1x342x128xf32, #tpu.memory_space<vmem>>, %arg2: memref<9x128x128xf32, #tpu.memory_space<vmem>>, %arg3: memref<1x128xf32, #tpu.memory_space<vmem>>, %arg4: memref<9x128x128xf32, #tpu.memory_space<vmem>>, %arg5: memref<1x128xf32, #tpu.memory_space<vmem>>, %arg6: memref<1x288x128xf32, #tpu.memory_space<vmem>>, %arg7: memref<288x128xf32, #tpu.memory_space<vmem>>, %arg8: memref<342x128xf32, #tpu.memory_space<vmem>>, %arg9: memref<288x128xf32, #tpu.memory_space<vmem>>) attributes {dimension_semantics = [#tpu.dimension_semantics<parallel>], iteration_bounds = array<i64: 2>, scalar_prefetch = 0 : i64, scratch_operands = 3 : i64, tpu.core_type = #tpu.core_type<tc>, window_params = [{transform_indices = @transform_0, window_bounds = array<i64: 1, 342, 128>}, {pipeline_mode = #tpu.pipeline_mode<synchronous>, transform_indices = @transform_1, window_bounds = array<i64: 9, 128, 128>}, {pipeline_mode = #tpu.pipeline_mode<synchronous>, transform_indices = @transform_2, window_bounds = array<i64: 1, 128>}, {pipeline_mode = #tpu.pipeline_mode<synchronous>, transform_indices = @transform_3, window_bounds = array<i64: 9, 128, 128>}, {pipeline_mode = #tpu.pipeline_mode<synchronous>, transform_indices = @transform_4, window_bounds = array<i64: 1, 128>}, {transform_indices = @transform_5, window_bounds = array<i64: 1, 288, 128>}]} {
    %c0 = arith.constant 0 : index
    %c0_0 = arith.constant 0 : index
    %c0_1 = arith.constant 0 : index
    %0 = vector.load %arg1[%c0, %c0_0, %c0_1] : memref<1x342x128xf32, #tpu.memory_space<vmem>>, vector<1x288x128xf32>
    %1 = vector.shape_cast %0 : vector<1x288x128xf32> to vector<288x128xf32>
    %c0_2 = arith.constant 0 : index
    %c0_3 = arith.constant 0 : index
    %c0_4 = arith.constant 0 : index
    %2 = vector.load %arg2[%c0_2, %c0_3, %c0_4] : memref<9x128x128xf32, #tpu.memory_space<vmem>>, vector<1x128x128xf32>
    %3 = vector.shape_cast %2 : vector<1x128x128xf32> to vector<128x128xf32>
    %cst = arith.constant dense<0.000000e+00> : vector<288x128xf32>
    %4 = tpu.matmul %1, %3, %cst {dimension_numbers = #tpu.dot_dimension_numbers<[1], [0], [0], [1], [0, 0, 1, 1], [], []>} : vector<288x128xf32>, vector<128x128xf32>, vector<288x128xf32> -> vector<288x128xf32>
    %c0_5 = arith.constant 0 : index
    %c0_6 = arith.constant 0 : index
    %5 = vector.load %arg3[%c0_5, %c0_6] : memref<1x128xf32, #tpu.memory_space<vmem>>, vector<1x128xf32>
    %6 = vector.broadcast %5 : vector<1x128xf32> to vector<288x128xf32>
    %7 = arith.addf %4, %6 : vector<288x128xf32>
    %c0_7 = arith.constant 0 : index
    %c0_8 = arith.constant 0 : index
    %8 = vector.load %arg7[%c0_7, %c0_8] : memref<288x128xf32, #tpu.memory_space<vmem>>, vector<288x128xf32>
    tpu.vector_store %arg7[%c0_7, %c0_8], %7 {strides = array<i32>} : memref<288x128xf32, #tpu.memory_space<vmem>>, vector<288x128xf32>,
    %c0_9 = arith.constant 0 : index
    %c1 = arith.constant 1 : index
    %c0_10 = arith.constant 0 : index
    %9 = vector.load %arg1[%c0_9, %c1, %c0_10] : memref<1x342x128xf32, #tpu.memory_space<vmem>>, vector<1x288x128xf32>
    %10 = vector.shape_cast %9 : vector<1x288x128xf32> to vector<288x128xf32>
    %c1_11 = arith.constant 1 : index
    %c0_12 = arith.constant 0 : index
    %c0_13 = arith.constant 0 : index
    %11 = vector.load %arg2[%c1_11, %c0_12, %c0_13] : memref<9x128x128xf32, #tpu.memory_space<vmem>>, vector<1x128x128xf32>
    %12 = vector.shape_cast %11 : vector<1x128x128xf32> to vector<128x128xf32>
    %cst_14 = arith.constant dense<0.000000e+00> : vector<288x128xf32>
    %13 = tpu.matmul %10, %12, %cst_14 {dimension_numbers = #tpu.dot_dimension_numbers<[1], [0], [0], [1], [0, 0, 1, 1], [], []>} : vector<288x128xf32>, vector<128x128xf32>, vector<288x128xf32> -> vector<288x128xf32>
    %c0_15 = arith.constant 0 : index
    %c0_16 = arith.constant 0 : index
    %14 = vector.load %arg7[%c0_15, %c0_16] : memref<288x128xf32, #tpu.memory_space<vmem>>, vector<288x128xf32>
    %15 = arith.addf %14, %13 : vector<288x128xf32>
    %c0_17 = arith.constant 0 : index
    %c0_18 = arith.constant 0 : index
    %16 = vector.load %arg7[%c0_17, %c0_18] : memref<288x128xf32, #tpu.memory_space<vmem>>, vector<288x128xf32>
    tpu.vector_store %arg7[%c0_17, %c0_18], %15 {strides = array<i32>} : memref<288x128xf32, #tpu.memory_space<vmem>>, vector<288x128xf32>,
    %c0_19 = arith.constant 0 : index
    %c2 = arith.constant 2 : index
    %c0_20 = arith.constant 0 : index
    %17 = vector.load %arg1[%c0_19, %c2, %c0_20] : memref<1x342x128xf32, #tpu.memory_space<vmem>>, vector<1x288x128xf32>
    %18 = vector.shape_cast %17 : vector<1x288x128xf32> to vector<288x128xf32>
    %c2_21 = arith.constant 2 : index
    %c0_22 = arith.constant 0 : index
    %c0_23 = arith.constant 0 : index
    %19 = vector.load %arg2[%c2_21, %c0_22, %c0_23] : memref<9x128x128xf32, #tpu.memory_space<vmem>>, vector<1x128x128xf32>
    %20 = vector.shape_cast %19 : vector<1x128x128xf32> to vector<128x128xf32>
    %cst_24 = arith.constant dense<0.000000e+00> : vector<288x128xf32>
    %21 = tpu.matmul %18, %20, %cst_24 {dimension_numbers = #tpu.dot_dimension_numbers<[1], [0], [0], [1], [0, 0, 1, 1], [], []>} : vector<288x128xf32>, vector<128x128xf32>, vector<288x128xf32> -> vector<288x128xf32>
    %c0_25 = arith.constant 0 : index
    %c0_26 = arith.constant 0 : index
    %22 = vector.load %arg7[%c0_25, %c0_26] : memref<288x128xf32, #tpu.memory_space<vmem>>, vector<288x128xf32>
    %23 = arith.addf %22, %21 : vector<288x128xf32>
    %c0_27 = arith.constant 0 : index
    %c0_28 = arith.constant 0 : index
    %24 = vector.load %arg7[%c0_27, %c0_28] : memref<288x128xf32, #tpu.memory_space<vmem>>, vector<288x128xf32>
    tpu.vector_store %arg7[%c0_27, %c0_28], %23 {strides = array<i32>} : memref<288x128xf32, #tpu.memory_space<vmem>>, vector<288x128xf32>,
    %c0_29 = arith.constant 0 : index
    %c18 = arith.constant 18 : index
    %c0_30 = arith.constant 0 : index
    %25 = vector.load %arg1[%c0_29, %c18, %c0_30] : memref<1x342x128xf32, #tpu.memory_space<vmem>>, vector<1x288x128xf32>
    %26 = vector.shape_cast %25 : vector<1x288x128xf32> to vector<288x128xf32>
    %c3 = arith.constant 3 : index
    %c0_31 = arith.constant 0 : index
    %c0_32 = arith.constant 0 : index
    %27 = vector.load %arg2[%c3, %c0_31, %c0_32] : memref<9x128x128xf32, #tpu.memory_space<vmem>>, vector<1x128x128xf32>
    %28 = vector.shape_cast %27 : vector<1x128x128xf32> to vector<128x128xf32>
    %cst_33 = arith.constant dense<0.000000e+00> : vector<288x128xf32>
    %29 = tpu.matmul %26, %28, %cst_33 {dimension_numbers = #tpu.dot_dimension_numbers<[1], [0], [0], [1], [0, 0, 1, 1], [], []>} : vector<288x128xf32>, vector<128x128xf32>, vector<288x128xf32> -> vector<288x128xf32>
    %c0_34 = arith.constant 0 : index
    %c0_35 = arith.constant 0 : index
    %30 = vector.load %arg7[%c0_34, %c0_35] : memref<288x128xf32, #tpu.memory_space<vmem>>, vector<288x128xf32>
    %31 = arith.addf %30, %29 : vector<288x128xf32>
    %c0_36 = arith.constant 0 : index
    %c0_37 = arith.constant 0 : index
    %32 = vector.load %arg7[%c0_36, %c0_37] : memref<288x128xf32, #tpu.memory_space<vmem>>, vector<288x128xf32>
    tpu.vector_store %arg7[%c0_36, %c0_37], %31 {strides = array<i32>} : memref<288x128xf32, #tpu.memory_space<vmem>>, vector<288x128xf32>,
    %c0_38 = arith.constant 0 : index
    %c19 = arith.constant 19 : index
    %c0_39 = arith.constant 0 : index
    %33 = vector.load %arg1[%c0_38, %c19, %c0_39] : memref<1x342x128xf32, #tpu.memory_space<vmem>>, vector<1x288x128xf32>
    %34 = vector.shape_cast %33 : vector<1x288x128xf32> to vector<288x128xf32>
    %c4 = arith.constant 4 : index
    %c0_40 = arith.constant 0 : index
    %c0_41 = arith.constant 0 : index
    %35 = vector.load %arg2[%c4, %c0_40, %c0_41] : memref<9x128x128xf32, #tpu.memory_space<vmem>>, vector<1x128x128xf32>
    %36 = vector.shape_cast %35 : vector<1x128x128xf32> to vector<128x128xf32>
    %cst_42 = arith.constant dense<0.000000e+00> : vector<288x128xf32>
    %37 = tpu.matmul %34, %36, %cst_42 {dimension_numbers = #tpu.dot_dimension_numbers<[1], [0], [0], [1], [0, 0, 1, 1], [], []>} : vector<288x128xf32>, vector<128x128xf32>, vector<288x128xf32> -> vector<288x128xf32>
    %c0_43 = arith.constant 0 : index
    %c0_44 = arith.constant 0 : index
    %38 = vector.load %arg7[%c0_43, %c0_44] : memref<288x128xf32, #tpu.memory_space<vmem>>, vector<288x128xf32>
    %39 = arith.addf %38, %37 : vector<288x128xf32>
    %c0_45 = arith.constant 0 : index
    %c0_46 = arith.constant 0 : index
    %40 = vector.load %arg7[%c0_45, %c0_46] : memref<288x128xf32, #tpu.memory_space<vmem>>, vector<288x128xf32>
    tpu.vector_store %arg7[%c0_45, %c0_46], %39 {strides = array<i32>} : memref<288x128xf32, #tpu.memory_space<vmem>>, vector<288x128xf32>,
    %c0_47 = arith.constant 0 : index
    %c20 = arith.constant 20 : index
    %c0_48 = arith.constant 0 : index
    %41 = vector.load %arg1[%c0_47, %c20, %c0_48] : memref<1x342x128xf32, #tpu.memory_space<vmem>>, vector<1x288x128xf32>
    %42 = vector.shape_cast %41 : vector<1x288x128xf32> to vector<288x128xf32>
    %c5 = arith.constant 5 : index
    %c0_49 = arith.constant 0 : index
    %c0_50 = arith.constant 0 : index
    %43 = vector.load %arg2[%c5, %c0_49, %c0_50] : memref<9x128x128xf32, #tpu.memory_space<vmem>>, vector<1x128x128xf32>
    %44 = vector.shape_cast %43 : vector<1x128x128xf32> to vector<128x128xf32>
    %cst_51 = arith.constant dense<0.000000e+00> : vector<288x128xf32>
    %45 = tpu.matmul %42, %44, %cst_51 {dimension_numbers = #tpu.dot_dimension_numbers<[1], [0], [0], [1], [0, 0, 1, 1], [], []>} : vector<288x128xf32>, vector<128x128xf32>, vector<288x128xf32> -> vector<288x128xf32>
    %c0_52 = arith.constant 0 : index
    %c0_53 = arith.constant 0 : index
    %46 = vector.load %arg7[%c0_52, %c0_53] : memref<288x128xf32, #tpu.memory_space<vmem>>, vector<288x128xf32>
    %47 = arith.addf %46, %45 : vector<288x128xf32>
    %c0_54 = arith.constant 0 : index
    %c0_55 = arith.constant 0 : index
    %48 = vector.load %arg7[%c0_54, %c0_55] : memref<288x128xf32, #tpu.memory_space<vmem>>, vector<288x128xf32>
    tpu.vector_store %arg7[%c0_54, %c0_55], %47 {strides = array<i32>} : memref<288x128xf32, #tpu.memory_space<vmem>>, vector<288x128xf32>,
    %c0_56 = arith.constant 0 : index
    %c36 = arith.constant 36 : index
    %c0_57 = arith.constant 0 : index
    %49 = vector.load %arg1[%c0_56, %c36, %c0_57] : memref<1x342x128xf32, #tpu.memory_space<vmem>>, vector<1x288x128xf32>
    %50 = vector.shape_cast %49 : vector<1x288x128xf32> to vector<288x128xf32>
    %c6 = arith.constant 6 : index
    %c0_58 = arith.constant 0 : index
    %c0_59 = arith.constant 0 : index
    %51 = vector.load %arg2[%c6, %c0_58, %c0_59] : memref<9x128x128xf32, #tpu.memory_space<vmem>>, vector<1x128x128xf32>
    %52 = vector.shape_cast %51 : vector<1x128x128xf32> to vector<128x128xf32>
    %cst_60 = arith.constant dense<0.000000e+00> : vector<288x128xf32>
    %53 = tpu.matmul %50, %52, %cst_60 {dimension_numbers = #tpu.dot_dimension_numbers<[1], [0], [0], [1], [0, 0, 1, 1], [], []>} : vector<288x128xf32>, vector<128x128xf32>, vector<288x128xf32> -> vector<288x128xf32>
    %c0_61 = arith.constant 0 : index
    %c0_62 = arith.constant 0 : index
    %54 = vector.load %arg7[%c0_61, %c0_62] : memref<288x128xf32, #tpu.memory_space<vmem>>, vector<288x128xf32>
    %55 = arith.addf %54, %53 : vector<288x128xf32>
    %c0_63 = arith.constant 0 : index
    %c0_64 = arith.constant 0 : index
    %56 = vector.load %arg7[%c0_63, %c0_64] : memref<288x128xf32, #tpu.memory_space<vmem>>, vector<288x128xf32>
    tpu.vector_store %arg7[%c0_63, %c0_64], %55 {strides = array<i32>} : memref<288x128xf32, #tpu.memory_space<vmem>>, vector<288x128xf32>,
    %c0_65 = arith.constant 0 : index
    %c37 = arith.constant 37 : index
    %c0_66 = arith.constant 0 : index
    %57 = vector.load %arg1[%c0_65, %c37, %c0_66] : memref<1x342x128xf32, #tpu.memory_space<vmem>>, vector<1x288x128xf32>
    %58 = vector.shape_cast %57 : vector<1x288x128xf32> to vector<288x128xf32>
    %c7 = arith.constant 7 : index
    %c0_67 = arith.constant 0 : index
    %c0_68 = arith.constant 0 : index
    %59 = vector.load %arg2[%c7, %c0_67, %c0_68] : memref<9x128x128xf32, #tpu.memory_space<vmem>>, vector<1x128x128xf32>
    %60 = vector.shape_cast %59 : vector<1x128x128xf32> to vector<128x128xf32>
    %cst_69 = arith.constant dense<0.000000e+00> : vector<288x128xf32>
    %61 = tpu.matmul %58, %60, %cst_69 {dimension_numbers = #tpu.dot_dimension_numbers<[1], [0], [0], [1], [0, 0, 1, 1], [], []>} : vector<288x128xf32>, vector<128x128xf32>, vector<288x128xf32> -> vector<288x128xf32>
    %c0_70 = arith.constant 0 : index
    %c0_71 = arith.constant 0 : index
    %62 = vector.load %arg7[%c0_70, %c0_71] : memref<288x128xf32, #tpu.memory_space<vmem>>, vector<288x128xf32>
    %63 = arith.addf %62, %61 : vector<288x128xf32>
    %c0_72 = arith.constant 0 : index
    %c0_73 = arith.constant 0 : index
    %64 = vector.load %arg7[%c0_72, %c0_73] : memref<288x128xf32, #tpu.memory_space<vmem>>, vector<288x128xf32>
    tpu.vector_store %arg7[%c0_72, %c0_73], %63 {strides = array<i32>} : memref<288x128xf32, #tpu.memory_space<vmem>>, vector<288x128xf32>,
    %c0_74 = arith.constant 0 : index
    %c38 = arith.constant 38 : index
    %c0_75 = arith.constant 0 : index
    %65 = vector.load %arg1[%c0_74, %c38, %c0_75] : memref<1x342x128xf32, #tpu.memory_space<vmem>>, vector<1x288x128xf32>
    %66 = vector.shape_cast %65 : vector<1x288x128xf32> to vector<288x128xf32>
    %c8 = arith.constant 8 : index
    %c0_76 = arith.constant 0 : index
    %c0_77 = arith.constant 0 : index
    %67 = vector.load %arg2[%c8, %c0_76, %c0_77] : memref<9x128x128xf32, #tpu.memory_space<vmem>>, vector<1x128x128xf32>
    %68 = vector.shape_cast %67 : vector<1x128x128xf32> to vector<128x128xf32>
    %cst_78 = arith.constant dense<0.000000e+00> : vector<288x128xf32>
    %69 = tpu.matmul %66, %68, %cst_78 {dimension_numbers = #tpu.dot_dimension_numbers<[1], [0], [0], [1], [0, 0, 1, 1], [], []>} : vector<288x128xf32>, vector<128x128xf32>, vector<288x128xf32> -> vector<288x128xf32>
    %c0_79 = arith.constant 0 : index
    %c0_80 = arith.constant 0 : index
    %70 = vector.load %arg7[%c0_79, %c0_80] : memref<288x128xf32, #tpu.memory_space<vmem>>, vector<288x128xf32>
    %71 = arith.addf %70, %69 : vector<288x128xf32>
    %c0_81 = arith.constant 0 : index
    %c0_82 = arith.constant 0 : index
    %72 = vector.load %arg7[%c0_81, %c0_82] : memref<288x128xf32, #tpu.memory_space<vmem>>, vector<288x128xf32>
    tpu.vector_store %arg7[%c0_81, %c0_82], %71 {strides = array<i32>} : memref<288x128xf32, #tpu.memory_space<vmem>>, vector<288x128xf32>,
    %73 = tpu.iota {dimensions = array<i32: 0>} : vector<288x1xi32>
    %c18_i32 = arith.constant 18 : i32
    %c0_i32 = arith.constant 0 : i32
    %74 = arith.cmpi eq, %c18_i32, %c0_i32 : i32
    %c1_i32 = arith.constant 1 : i32
    %75 = arith.select %74, %c1_i32, %c18_i32 : i32
    %76 = vector.broadcast %75 : i32 to vector<288x1xi32>
    %77 = arith.remsi %73, %76 : vector<288x1xi32>
    %c0_i32_83 = arith.constant 0 : i32
    %78 = vector.broadcast %c0_i32_83 : i32 to vector<288x1xi32>
    %79 = arith.cmpi ne, %77, %78 : vector<288x1xi32>
    %c0_i32_84 = arith.constant 0 : i32
    %80 = vector.broadcast %c0_i32_84 : i32 to vector<288x1xi32>
    %81 = arith.cmpi slt, %77, %80 : vector<288x1xi32>
    %c0_i32_85 = arith.constant 0 : i32
    %82 = arith.cmpi slt, %75, %c0_i32_85 : i32
    %83 = vector.broadcast %82 : i1 to vector<288x1xi1>
    %84 = vector.broadcast %83 : vector<288x1xi1> to vector<288x1xi1>
    %85 = arith.xori %81, %84 : vector<288x1xi1>
    %86 = arith.andi %85, %79 : vector<288x1xi1>
    %87 = vector.broadcast %75 : i32 to vector<288x1xi32>
    %88 = arith.addi %77, %87 : vector<288x1xi32>
    %89 = arith.select %86, %88, %77 : vector<288x1xi1>, vector<288x1xi32>
    %c16_i32 = arith.constant 16 : i32
    %90 = vector.broadcast %c16_i32 : i32 to vector<288x1xi32>
    %91 = arith.cmpi slt, %89, %90 : vector<288x1xi32>
    %c0_86 = arith.constant 0 : index
    %c0_87 = arith.constant 0 : index
    %92 = vector.load %arg7[%c0_86, %c0_87] : memref<288x128xf32, #tpu.memory_space<vmem>>, vector<288x128xf32>
    %cst_88 = arith.constant 0.000000e+00 : f32
    %93 = vector.broadcast %cst_88 : f32 to vector<288x128xf32>
    %94 = arith.maximumf %92, %93 : vector<288x128xf32>
    %cst_89 = arith.constant 0.000000e+00 : f32
    %95 = vector.shape_cast %91 : vector<288x1xi1> to vector<288x1xi1>
    %96 = vector.broadcast %95 : vector<288x1xi1> to vector<288x128xi1>
    %97 = vector.broadcast %cst_89 : f32 to vector<288x128xf32>
    %98 = arith.select %96, %94, %97 : vector<288x128xi1>, vector<288x128xf32>
    %cst_90 = arith.constant 0.000000e+00 : f32
    %99 = vector.broadcast %cst_90 : f32 to vector<19x128xf32>
    %c0_91 = arith.constant 0 : index
    %c0_92 = arith.constant 0 : index
    %100 = vector.load %arg8[%c0_91, %c0_92] : memref<342x128xf32, #tpu.memory_space<vmem>>, vector<19x128xf32>
    tpu.vector_store %arg8[%c0_91, %c0_92], %99 {strides = array<i32>} : memref<342x128xf32, #tpu.memory_space<vmem>>, vector<19x128xf32>,
    %c19_93 = arith.constant 19 : index
    %c0_94 = arith.constant 0 : index
    %101 = vector.load %arg8[%c19_93, %c0_94] : memref<342x128xf32, #tpu.memory_space<vmem>>, vector<288x128xf32>
    tpu.vector_store %arg8[%c19_93, %c0_94], %98 {strides = array<i32>} : memref<342x128xf32, #tpu.memory_space<vmem>>, vector<288x128xf32>,
    %cst_95 = arith.constant 0.000000e+00 : f32
    %102 = vector.broadcast %cst_95 : f32 to vector<35x128xf32>
    %c307 = arith.constant 307 : index
    %c0_96 = arith.constant 0 : index
    %103 = vector.load %arg8[%c307, %c0_96] : memref<342x128xf32, #tpu.memory_space<vmem>>, vector<35x128xf32>
    tpu.vector_store %arg8[%c307, %c0_96], %102 {strides = array<i32>} : memref<342x128xf32, #tpu.memory_space<vmem>>, vector<35x128xf32>,
    %c0_97 = arith.constant 0 : index
    %c0_98 = arith.constant 0 : index
    %104 = vector.load %arg8[%c0_97, %c0_98] : memref<342x128xf32, #tpu.memory_space<vmem>>, vector<288x128xf32>
    %c0_99 = arith.constant 0 : index
    %c0_100 = arith.constant 0 : index
    %c0_101 = arith.constant 0 : index
    %105 = vector.load %arg4[%c0_99, %c0_100, %c0_101] : memref<9x128x128xf32, #tpu.memory_space<vmem>>, vector<1x128x128xf32>
    %106 = vector.shape_cast %105 : vector<1x128x128xf32> to vector<128x128xf32>
    %cst_102 = arith.constant dense<0.000000e+00> : vector<288x128xf32>
    %107 = tpu.matmul %104, %106, %cst_102 {dimension_numbers = #tpu.dot_dimension_numbers<[1], [0], [0], [1], [0, 0, 1, 1], [], []>} : vector<288x128xf32>, vector<128x128xf32>, vector<288x128xf32> -> vector<288x128xf32>
    %c0_103 = arith.constant 0 : index
    %c0_104 = arith.constant 0 : index
    %108 = vector.load %arg5[%c0_103, %c0_104] : memref<1x128xf32, #tpu.memory_space<vmem>>, vector<1x128xf32>
    %109 = vector.broadcast %108 : vector<1x128xf32> to vector<288x128xf32>
    %110 = arith.addf %107, %109 : vector<288x128xf32>
    %c0_105 = arith.constant 0 : index
    %c0_106 = arith.constant 0 : index
    %111 = vector.load %arg9[%c0_105, %c0_106] : memref<288x128xf32, #tpu.memory_space<vmem>>, vector<288x128xf32>
    tpu.vector_store %arg9[%c0_105, %c0_106], %110 {strides = array<i32>} : memref<288x128xf32, #tpu.memory_space<vmem>>, vector<288x128xf32>,
    %c1_107 = arith.constant 1 : index
    %c0_108 = arith.constant 0 : index
    %112 = vector.load %arg8[%c1_107, %c0_108] : memref<342x128xf32, #tpu.memory_space<vmem>>, vector<288x128xf32>
    %c1_109 = arith.constant 1 : index
    %c0_110 = arith.constant 0 : index
    %c0_111 = arith.constant 0 : index
    %113 = vector.load %arg4[%c1_109, %c0_110, %c0_111] : memref<9x128x128xf32, #tpu.memory_space<vmem>>, vector<1x128x128xf32>
    %114 = vector.shape_cast %113 : vector<1x128x128xf32> to vector<128x128xf32>
    %cst_112 = arith.constant dense<0.000000e+00> : vector<288x128xf32>
    %115 = tpu.matmul %112, %114, %cst_112 {dimension_numbers = #tpu.dot_dimension_numbers<[1], [0], [0], [1], [0, 0, 1, 1], [], []>} : vector<288x128xf32>, vector<128x128xf32>, vector<288x128xf32> -> vector<288x128xf32>
    %c0_113 = arith.constant 0 : index
    %c0_114 = arith.constant 0 : index
    %116 = vector.load %arg9[%c0_113, %c0_114] : memref<288x128xf32, #tpu.memory_space<vmem>>, vector<288x128xf32>
    %117 = arith.addf %116, %115 : vector<288x128xf32>
    %c0_115 = arith.constant 0 : index
    %c0_116 = arith.constant 0 : index
    %118 = vector.load %arg9[%c0_115, %c0_116] : memref<288x128xf32, #tpu.memory_space<vmem>>, vector<288x128xf32>
    tpu.vector_store %arg9[%c0_115, %c0_116], %117 {strides = array<i32>} : memref<288x128xf32, #tpu.memory_space<vmem>>, vector<288x128xf32>,
    %c2_117 = arith.constant 2 : index
    %c0_118 = arith.constant 0 : index
    %119 = vector.load %arg8[%c2_117, %c0_118] : memref<342x128xf32, #tpu.memory_space<vmem>>, vector<288x128xf32>
    %c2_119 = arith.constant 2 : index
    %c0_120 = arith.constant 0 : index
    %c0_121 = arith.constant 0 : index
    %120 = vector.load %arg4[%c2_119, %c0_120, %c0_121] : memref<9x128x128xf32, #tpu.memory_space<vmem>>, vector<1x128x128xf32>
    %121 = vector.shape_cast %120 : vector<1x128x128xf32> to vector<128x128xf32>
    %cst_122 = arith.constant dense<0.000000e+00> : vector<288x128xf32>
    %122 = tpu.matmul %119, %121, %cst_122 {dimension_numbers = #tpu.dot_dimension_numbers<[1], [0], [0], [1], [0, 0, 1, 1], [], []>} : vector<288x128xf32>, vector<128x128xf32>, vector<288x128xf32> -> vector<288x128xf32>
    %c0_123 = arith.constant 0 : index
    %c0_124 = arith.constant 0 : index
    %123 = vector.load %arg9[%c0_123, %c0_124] : memref<288x128xf32, #tpu.memory_space<vmem>>, vector<288x128xf32>
    %124 = arith.addf %123, %122 : vector<288x128xf32>
    %c0_125 = arith.constant 0 : index
    %c0_126 = arith.constant 0 : index
    %125 = vector.load %arg9[%c0_125, %c0_126] : memref<288x128xf32, #tpu.memory_space<vmem>>, vector<288x128xf32>
    tpu.vector_store %arg9[%c0_125, %c0_126], %124 {strides = array<i32>} : memref<288x128xf32, #tpu.memory_space<vmem>>, vector<288x128xf32>,
    %c18_127 = arith.constant 18 : index
    %c0_128 = arith.constant 0 : index
    %126 = vector.load %arg8[%c18_127, %c0_128] : memref<342x128xf32, #tpu.memory_space<vmem>>, vector<288x128xf32>
    %c3_129 = arith.constant 3 : index
    %c0_130 = arith.constant 0 : index
    %c0_131 = arith.constant 0 : index
    %127 = vector.load %arg4[%c3_129, %c0_130, %c0_131] : memref<9x128x128xf32, #tpu.memory_space<vmem>>, vector<1x128x128xf32>
    %128 = vector.shape_cast %127 : vector<1x128x128xf32> to vector<128x128xf32>
    %cst_132 = arith.constant dense<0.000000e+00> : vector<288x128xf32>
    %129 = tpu.matmul %126, %128, %cst_132 {dimension_numbers = #tpu.dot_dimension_numbers<[1], [0], [0], [1], [0, 0, 1, 1], [], []>} : vector<288x128xf32>, vector<128x128xf32>, vector<288x128xf32> -> vector<288x128xf32>
    %c0_133 = arith.constant 0 : index
    %c0_134 = arith.constant 0 : index
    %130 = vector.load %arg9[%c0_133, %c0_134] : memref<288x128xf32, #tpu.memory_space<vmem>>, vector<288x128xf32>
    %131 = arith.addf %130, %129 : vector<288x128xf32>
    %c0_135 = arith.constant 0 : index
    %c0_136 = arith.constant 0 : index
    %132 = vector.load %arg9[%c0_135, %c0_136] : memref<288x128xf32, #tpu.memory_space<vmem>>, vector<288x128xf32>
    tpu.vector_store %arg9[%c0_135, %c0_136], %131 {strides = array<i32>} : memref<288x128xf32, #tpu.memory_space<vmem>>, vector<288x128xf32>,
    %c19_137 = arith.constant 19 : index
    %c0_138 = arith.constant 0 : index
    %133 = vector.load %arg8[%c19_137, %c0_138] : memref<342x128xf32, #tpu.memory_space<vmem>>, vector<288x128xf32>
    %c4_139 = arith.constant 4 : index
    %c0_140 = arith.constant 0 : index
    %c0_141 = arith.constant 0 : index
    %134 = vector.load %arg4[%c4_139, %c0_140, %c0_141] : memref<9x128x128xf32, #tpu.memory_space<vmem>>, vector<1x128x128xf32>
    %135 = vector.shape_cast %134 : vector<1x128x128xf32> to vector<128x128xf32>
    %cst_142 = arith.constant dense<0.000000e+00> : vector<288x128xf32>
    %136 = tpu.matmul %133, %135, %cst_142 {dimension_numbers = #tpu.dot_dimension_numbers<[1], [0], [0], [1], [0, 0, 1, 1], [], []>} : vector<288x128xf32>, vector<128x128xf32>, vector<288x128xf32> -> vector<288x128xf32>
    %c0_143 = arith.constant 0 : index
    %c0_144 = arith.constant 0 : index
    %137 = vector.load %arg9[%c0_143, %c0_144] : memref<288x128xf32, #tpu.memory_space<vmem>>, vector<288x128xf32>
    %138 = arith.addf %137, %136 : vector<288x128xf32>
    %c0_145 = arith.constant 0 : index
    %c0_146 = arith.constant 0 : index
    %139 = vector.load %arg9[%c0_145, %c0_146] : memref<288x128xf32, #tpu.memory_space<vmem>>, vector<288x128xf32>
    tpu.vector_store %arg9[%c0_145, %c0_146], %138 {strides = array<i32>} : memref<288x128xf32, #tpu.memory_space<vmem>>, vector<288x128xf32>,
    %c20_147 = arith.constant 20 : index
    %c0_148 = arith.constant 0 : index
    %140 = vector.load %arg8[%c20_147, %c0_148] : memref<342x128xf32, #tpu.memory_space<vmem>>, vector<288x128xf32>
    %c5_149 = arith.constant 5 : index
    %c0_150 = arith.constant 0 : index
    %c0_151 = arith.constant 0 : index
    %141 = vector.load %arg4[%c5_149, %c0_150, %c0_151] : memref<9x128x128xf32, #tpu.memory_space<vmem>>, vector<1x128x128xf32>
    %142 = vector.shape_cast %141 : vector<1x128x128xf32> to vector<128x128xf32>
    %cst_152 = arith.constant dense<0.000000e+00> : vector<288x128xf32>
    %143 = tpu.matmul %140, %142, %cst_152 {dimension_numbers = #tpu.dot_dimension_numbers<[1], [0], [0], [1], [0, 0, 1, 1], [], []>} : vector<288x128xf32>, vector<128x128xf32>, vector<288x128xf32> -> vector<288x128xf32>
    %c0_153 = arith.constant 0 : index
    %c0_154 = arith.constant 0 : index
    %144 = vector.load %arg9[%c0_153, %c0_154] : memref<288x128xf32, #tpu.memory_space<vmem>>, vector<288x128xf32>
    %145 = arith.addf %144, %143 : vector<288x128xf32>
    %c0_155 = arith.constant 0 : index
    %c0_156 = arith.constant 0 : index
    %146 = vector.load %arg9[%c0_155, %c0_156] : memref<288x128xf32, #tpu.memory_space<vmem>>, vector<288x128xf32>
    tpu.vector_store %arg9[%c0_155, %c0_156], %145 {strides = array<i32>} : memref<288x128xf32, #tpu.memory_space<vmem>>, vector<288x128xf32>,
    %c36_157 = arith.constant 36 : index
    %c0_158 = arith.constant 0 : index
    %147 = vector.load %arg8[%c36_157, %c0_158] : memref<342x128xf32, #tpu.memory_space<vmem>>, vector<288x128xf32>
    %c6_159 = arith.constant 6 : index
    %c0_160 = arith.constant 0 : index
    %c0_161 = arith.constant 0 : index
    %148 = vector.load %arg4[%c6_159, %c0_160, %c0_161] : memref<9x128x128xf32, #tpu.memory_space<vmem>>, vector<1x128x128xf32>
    %149 = vector.shape_cast %148 : vector<1x128x128xf32> to vector<128x128xf32>
    %cst_162 = arith.constant dense<0.000000e+00> : vector<288x128xf32>
    %150 = tpu.matmul %147, %149, %cst_162 {dimension_numbers = #tpu.dot_dimension_numbers<[1], [0], [0], [1], [0, 0, 1, 1], [], []>} : vector<288x128xf32>, vector<128x128xf32>, vector<288x128xf32> -> vector<288x128xf32>
    %c0_163 = arith.constant 0 : index
    %c0_164 = arith.constant 0 : index
    %151 = vector.load %arg9[%c0_163, %c0_164] : memref<288x128xf32, #tpu.memory_space<vmem>>, vector<288x128xf32>
    %152 = arith.addf %151, %150 : vector<288x128xf32>
    %c0_165 = arith.constant 0 : index
    %c0_166 = arith.constant 0 : index
    %153 = vector.load %arg9[%c0_165, %c0_166] : memref<288x128xf32, #tpu.memory_space<vmem>>, vector<288x128xf32>
    tpu.vector_store %arg9[%c0_165, %c0_166], %152 {strides = array<i32>} : memref<288x128xf32, #tpu.memory_space<vmem>>, vector<288x128xf32>,
    %c37_167 = arith.constant 37 : index
    %c0_168 = arith.constant 0 : index
    %154 = vector.load %arg8[%c37_167, %c0_168] : memref<342x128xf32, #tpu.memory_space<vmem>>, vector<288x128xf32>
    %c7_169 = arith.constant 7 : index
    %c0_170 = arith.constant 0 : index
    %c0_171 = arith.constant 0 : index
    %155 = vector.load %arg4[%c7_169, %c0_170, %c0_171] : memref<9x128x128xf32, #tpu.memory_space<vmem>>, vector<1x128x128xf32>
    %156 = vector.shape_cast %155 : vector<1x128x128xf32> to vector<128x128xf32>
    %cst_172 = arith.constant dense<0.000000e+00> : vector<288x128xf32>
    %157 = tpu.matmul %154, %156, %cst_172 {dimension_numbers = #tpu.dot_dimension_numbers<[1], [0], [0], [1], [0, 0, 1, 1], [], []>} : vector<288x128xf32>, vector<128x128xf32>, vector<288x128xf32> -> vector<288x128xf32>
    %c0_173 = arith.constant 0 : index
    %c0_174 = arith.constant 0 : index
    %158 = vector.load %arg9[%c0_173, %c0_174] : memref<288x128xf32, #tpu.memory_space<vmem>>, vector<288x128xf32>
    %159 = arith.addf %158, %157 : vector<288x128xf32>
    %c0_175 = arith.constant 0 : index
    %c0_176 = arith.constant 0 : index
    %160 = vector.load %arg9[%c0_175, %c0_176] : memref<288x128xf32, #tpu.memory_space<vmem>>, vector<288x128xf32>
    tpu.vector_store %arg9[%c0_175, %c0_176], %159 {strides = array<i32>} : memref<288x128xf32, #tpu.memory_space<vmem>>, vector<288x128xf32>,
    %c38_177 = arith.constant 38 : index
    %c0_178 = arith.constant 0 : index
    %161 = vector.load %arg8[%c38_177, %c0_178] : memref<342x128xf32, #tpu.memory_space<vmem>>, vector<288x128xf32>
    %c8_179 = arith.constant 8 : index
    %c0_180 = arith.constant 0 : index
    %c0_181 = arith.constant 0 : index
    %162 = vector.load %arg4[%c8_179, %c0_180, %c0_181] : memref<9x128x128xf32, #tpu.memory_space<vmem>>, vector<1x128x128xf32>
    %163 = vector.shape_cast %162 : vector<1x128x128xf32> to vector<128x128xf32>
    %cst_182 = arith.constant dense<0.000000e+00> : vector<288x128xf32>
    %164 = tpu.matmul %161, %163, %cst_182 {dimension_numbers = #tpu.dot_dimension_numbers<[1], [0], [0], [1], [0, 0, 1, 1], [], []>} : vector<288x128xf32>, vector<128x128xf32>, vector<288x128xf32> -> vector<288x128xf32>
    %c0_183 = arith.constant 0 : index
    %c0_184 = arith.constant 0 : index
    %165 = vector.load %arg9[%c0_183, %c0_184] : memref<288x128xf32, #tpu.memory_space<vmem>>, vector<288x128xf32>
    %166 = arith.addf %165, %164 : vector<288x128xf32>
    %c0_185 = arith.constant 0 : index
    %c0_186 = arith.constant 0 : index
    %167 = vector.load %arg9[%c0_185, %c0_186] : memref<288x128xf32, #tpu.memory_space<vmem>>, vector<288x128xf32>
    tpu.vector_store %arg9[%c0_185, %c0_186], %166 {strides = array<i32>} : memref<288x128xf32, #tpu.memory_space<vmem>>, vector<288x128xf32>,
    %c0_187 = arith.constant 0 : index
    %c0_188 = arith.constant 0 : index
    %168 = vector.load %arg9[%c0_187, %c0_188] : memref<288x128xf32, #tpu.memory_space<vmem>>, vector<288x128xf32>
    %cst_189 = arith.constant 0.000000e+00 : f32
    %169 = vector.broadcast %cst_189 : f32 to vector<288x128xf32>
    %170 = arith.maximumf %168, %169 : vector<288x128xf32>
    %c0_190 = arith.constant 0 : index
    %c0_191 = arith.constant 0 : index
    %c0_192 = arith.constant 0 : index
    %171 = vector.load %arg6[%c0_190, %c0_191, %c0_192] : memref<1x288x128xf32, #tpu.memory_space<vmem>>, vector<1x288x128xf32>
    %172 = vector.shape_cast %171 : vector<1x288x128xf32> to vector<288x128xf32>
    %173 = vector.shape_cast %170 : vector<288x128xf32> to vector<1x288x128xf32>
    tpu.vector_store %arg6[%c0_190, %c0_191, %c0_192], %173 {strides = array<i32>} : memref<1x288x128xf32, #tpu.memory_space<vmem>>, vector<1x288x128xf32>,
    return
  }
  func.func @transform_0(%arg0: i32) -> (i32, i32, i32) {
    %c0_i32 = arith.constant 0 : i32
    %c0_i32_0 = arith.constant 0 : i32
    %c0_i32_1 = arith.constant 0 : i32
    return %arg0, %c0_i32, %c0_i32_0 : i32, i32, i32
  }
  func.func @transform_1(%arg0: i32) -> (i32, i32, i32) {
    %c0_i32 = arith.constant 0 : i32
    %c0_i32_0 = arith.constant 0 : i32
    %c0_i32_1 = arith.constant 0 : i32
    %c0_i32_2 = arith.constant 0 : i32
    return %c0_i32, %c0_i32_0, %c0_i32_1 : i32, i32, i32
  }
  func.func @transform_2(%arg0: i32) -> (i32, i32) {
    %c0_i32 = arith.constant 0 : i32
    %c0_i32_0 = arith.constant 0 : i32
    %c0_i32_1 = arith.constant 0 : i32
    return %c0_i32, %c0_i32_0 : i32, i32
  }
  func.func @transform_3(%arg0: i32) -> (i32, i32, i32) {
    %c0_i32 = arith.constant 0 : i32
    %c0_i32_0 = arith.constant 0 : i32
    %c0_i32_1 = arith.constant 0 : i32
    %c0_i32_2 = arith.constant 0 : i32
    return %c0_i32, %c0_i32_0, %c0_i32_1 : i32, i32, i32
  }
  func.func @transform_4(%arg0: i32) -> (i32, i32) {
    %c0_i32 = arith.constant 0 : i32
    %c0_i32_0 = arith.constant 0 : i32
    %c0_i32_1 = arith.constant 0 : i32
    return %c0_i32, %c0_i32_0 : i32, i32
  }
  func.func @transform_5(%arg0: i32) -> (i32, i32, i32) {
    %c0_i32 = arith.constant 0 : i32
    %c0_i32_0 = arith.constant 0 : i32
    %c0_i32_1 = arith.constant 0 : i32
    return %arg0, %c0_i32, %c0_i32_0 : i32, i32, i32
  }
}

</mosaic_0001>

<bundles_post_ra>
// kernel: _lambda_.1
= control target key start
LH: loop header
LB: loop body
LE: loop exit
PB: predicated region body
PF: predicated region fallthrough
CT: control target
= control target key end

     0   :  { %s12537_s18 = smov 0   ;;  %s15646_s0 = inlined_call_operand.vmem [shape: f32[2,342,128], index: 0, kind: input, shape index: {}]   ;;  %s15647_s1 = inlined_call_operand.vmem [shape: f32[9,128,128], index: 1, kind: input, shape index: {}]   ;;  %s15648_s2 = inlined_call_operand.vmem [shape: f32[1,128], index: 2, kind: input, shape index: {}]   ;;  %s15649_s3 = inlined_call_operand.vmem [shape: f32[9,128,128], index: 3, kind: input, shape index: {}]   ;;  %s15650_s4 = inlined_call_operand.vmem [shape: f32[1,128], index: 4, kind: input, shape index: {}]   ;;  %s15651_s5 = inlined_call_operand.vmem [shape: f32[2,288,128], index: 5, kind: output, shape index: {}]  }
   0x1 LB: > { %s8437_s19 = sadd.s32 4294967295, %s12504_s18   ;;  %p8441_p0 = scmp.ge.s32.totalorder %s12504_s18, 1  ;;  %s12504_s18 = sphi %s12537_s18, %s15_s18  }
   0x2   : > { %p187_p1 = scmp.lt.s32.totalorder %s12504_s18, 3 }
   0x4   : > { %p188_p2 = pnand %p8441_p0, %p187_p1 }
   0x6   : > { %191 = sbr.rel (%p188_p2) target bundleno = 1717 (0x6b5), region = 40 }
   0xd   : > { %v261_v0 = vld [vmem:[%s15647_s1] sm:$0xff]  ;;  %v262_v1 = vld [vmem:[%s15647_s1 + $0x8] sm:$0xff]  ;;  %v263_v2 = vld [vmem:[%s15647_s1 + $0x10] sm:$0xff]  ;;  %p215_p3 = scmp.lt.s32.totalorder %s8437_s19, 1 }
   0xe   : > { %v11188_v3 = vpack.c.bf16 %v262_v1, %v261_v0  ;;  %v264_v4 = vld [vmem:[%s15647_s1 + $0x18] sm:$0xff]  ;;  %v265_v6 = vld [vmem:[%s15647_s1 + $0x20] sm:$0xff]  ;;  %v266_v7 = vld [vmem:[%s15647_s1 + $0x28] sm:$0xff] }
   0xf   : > { %v11192_v5 = vpack.c.bf16 %v264_v4, %v263_v2  ;;  %s15866_s19 = smov (!%p215_p3, %s8437_s19), 1  ;;  %v11196_v8 = vpack.c.bf16 %v266_v7, %v265_v6  ;;  %v267_v9 = vld [vmem:[%s15647_s1 + $0x30] sm:$0xff]  ;;  %v268_v10 = vld [vmem:[%s15647_s1 + $0x38] sm:$0xff]  ;;  %v269_v13 = vld [vmem:[%s15647_s1 + $0x40] sm:$0xff] }
  0x10   : > { %11189 = vmatprep.subr.bf16.mxu0 %v11188_v3  ;;  %s12412_s7 = smul.u32 344, %s15866_s19  ;;  %v11200_v12 = vpack.c.bf16 %v268_v10, %v267_v9  ;;  %v270_v14 = vld [vmem:[%s15647_s1 + $0x48] sm:$0xff]  ;;  %v271_v16 = vld [vmem:[%s15647_s1 + $0x50] sm:$0xff]  ;;  %v272_v17 = vld [vmem:[%s15647_s1 + $0x58] sm:$0xff] }
  0x11   : > { %11191 = vmatpush3.bf16.msra.mxu0 %v11188_v3  ;;  %v11204_v15 = vpack.c.bf16 %v270_v14, %v269_v13  ;;  %v11208_v18 = vpack.c.bf16 %v272_v17, %v271_v16  ;;  %v273_v19 = vld [vmem:[%s15647_s1 + $0x60] sm:$0xff]  ;;  %v274_v20 = vld [vmem:[%s15647_s1 + $0x68] sm:$0xff]  ;;  %v275_v22 = vld [vmem:[%s15647_s1 + $0x70] sm:$0xff]  ;;  %s12413_s15 = smul.u32 288, %s15866_s19 }
  0x12   : > { %11193 = vmatprep.subr.bf16.mxu0 %v11192_v5  ;;  %s12575_s14 = scalar_lea.vmem %s15646_s0, %s12412_s7  ;;  %v11212_v21 = vpack.c.bf16 %v274_v20, %v273_v19  ;;  %v276_v23 = vld [vmem:[%s15647_s1 + $0x78] sm:$0xff]  ;;  %v8445_v25 = vld [vmem:[%s15647_s1 + $0x80] sm:$0xff]  ;;  %v8446_v26 = vld [vmem:[%s15647_s1 + $0x88] sm:$0xff] }
  0x13   : > { %v225_v11 = vld [vmem:[%s12575_s14] sm:$0xff]  ;;  %v11216_v24 = vpack.c.bf16 %v276_v23, %v275_v22  ;;  %v11220_v27 = vpack.c.bf16 %v8446_v26, %v8445_v25  ;;  %v8447_v28 = vld [vmem:[%s15647_s1 + $0x90] sm:$0xff]  ;;  %v8448_v29 = vld [vmem:[%s15647_s1 + $0x98] sm:$0xff]  ;;  %s15570_s22 = scalar_lea.vmem %s15651_s5, %s12413_s15 }
  0x14   : > { %9672 = vmatprep.mubr.f32.mxu0 %v225_v11  ;;  %v226_v30 = vld [vmem:[%s12575_s14 + $0x8] sm:$0xff]  ;;  %v227_v31 = vld [vmem:[%s12575_s14 + $0x10] sm:$0xff]  ;;  %v11224_v32 = vpack.c.bf16 %v8448_v29, %v8447_v28  ;;  %v8449_v33 = vld [vmem:[%s15647_s1 + $0xa0] sm:$0xff] }
  0x15   : > { %11195 = vmatpush3.bf16.msra.mxu0 %v11192_v5  ;;  %v8450_v34 = vld [vmem:[%s15647_s1 + $0xa8] sm:$0xff]  ;;  %v228_v35 = vld [vmem:[%s12575_s14 + $0x18] sm:$0xff]  ;;  %v229_v36 = vld [vmem:[%s12575_s14 + $0x20] sm:$0xff] }
  0x16   : > { %11197 = vmatprep.subr.bf16.mxu0 %v11196_v8  ;;  %v11228_v37 = vpack.c.bf16 %v8450_v34, %v8449_v33  ;;  %v8451_v38 = vld [vmem:[%s15647_s1 + $0xb0] sm:$0xff]  ;;  %v8452_v39 = vld [vmem:[%s15647_s1 + $0xb8] sm:$0xff]  ;;  %v230_v40 = vld [vmem:[%s12575_s14 + $0x28] sm:$0xff] }
  0x17   : > { %v231_v41 = vld [vmem:[%s12575_s14 + $0x30] sm:$0xff]  ;;  %v11232_v42 = vpack.c.bf16 %v8452_v39, %v8451_v38  ;;  %v8453_v43 = vld [vmem:[%s15647_s1 + $0xc0] sm:$0xff]  ;;  %v8454_v44 = vld [vmem:[%s15647_s1 + $0xc8] sm:$0xff] }
  0x18   : > { %v232_v45 = vld [vmem:[%s12575_s14 + $0x38] sm:$0xff]  ;;  %v233_v46 = vld [vmem:[%s12575_s14 + $0x40] sm:$0xff]  ;;  %v11236_v47 = vpack.c.bf16 %v8454_v44, %v8453_v43  ;;  %v8455_v48 = vld [vmem:[%s15647_s1 + $0xd0] sm:$0xff] }
  0x19   : > { %11199 = vmatpush3.bf16.msra.mxu0 %v11196_v8  ;;  %v8456_v49 = vld [vmem:[%s15647_s1 + $0xd8] sm:$0xff]  ;;  %v234_v50 = vld [vmem:[%s12575_s14 + $0x48] sm:$0xff]  ;;  %v235_v51 = vld [vmem:[%s12575_s14 + $0x50] sm:$0xff] }
  0x1a   : > { %11201 = vmatprep.subr.bf16.mxu0 %v11200_v12  ;;  %v11240_v52 = vpack.c.bf16 %v8456_v49, %v8455_v48  ;;  %v8457_v53 = vld [vmem:[%s15647_s1 + $0xe0] sm:$0xff]  ;;  %v8458_v54 = vld [vmem:[%s15647_s1 + $0xe8] sm:$0xff]  ;;  %v236_v55 = vld [vmem:[%s12575_s14 + $0x58] sm:$0xff] }
  0x1b   : > { %v237_v56 = vld [vmem:[%s12575_s14 + $0x60] sm:$0xff]  ;;  %v11244_v57 = vpack.c.bf16 %v8458_v54, %v8457_v53  ;;  %v8459_v58 = vld [vmem:[%s15647_s1 + $0xf0] sm:$0xff]  ;;  %v8460_v59 = vld [vmem:[%s15647_s1 + $0xf8] sm:$0xff] }
  0x1c   : > { %v238_v60 = vld [vmem:[%s12575_s14 + $0x68] sm:$0xff]  ;;  %v239_v61 = vld [vmem:[%s12575_s14 + $0x70] sm:$0xff]  ;;  %v11248_v62 = vpack.c.bf16 %v8460_v59, %v8459_v58  ;;  %v8461_v63 = vld [vmem:[%s15647_s1 + $0x100] sm:$0xff] }
  0x1d   : > { %11203 = vmatpush3.bf16.msra.mxu0 %v11200_v12  ;;  %v8462_v0 = vld [vmem:[%s15647_s1 + $0x108] sm:$0xff]  ;;  %v240_v1 = vld [vmem:[%s12575_s14 + $0x78] sm:$0xff]  ;;  %v241_v2 = vld [vmem:[%s12575_s14 + $0x80] sm:$0xff] }
  0x1e   : > { %11205 = vmatprep.subr.bf16.mxu0 %v11204_v15  ;;  %v11252_v3 = vpack.c.bf16 %v8462_v0, %v8461_v63  ;;  %v242_v4 = vld [vmem:[%s12575_s14 + $0x88] sm:$0xff]  ;;  %v243_v5 = vld [vmem:[%s12575_s14 + $0x90] sm:$0xff]  ;;  %v244_v6 = vld [vmem:[%s12575_s14 + $0x98] sm:$0xff] }
  0x1f   : > { %v245_v7 = vld [vmem:[%s12575_s14 + $0xa0] sm:$0xff]  ;;  %v246_v8 = vld [vmem:[%s12575_s14 + $0xa8] sm:$0xff]  ;;  %v247_v9 = vld [vmem:[%s12575_s14 + $0xb0] sm:$0xff] }
  0x20   : > { %v248_v10 = vld [vmem:[%s12575_s14 + $0xb8] sm:$0xff]  ;;  %v249_v11 = vld [vmem:[%s12575_s14 + $0xc0] sm:$0xff]  ;;  %v250_v12 = vld [vmem:[%s12575_s14 + $0xc8] sm:$0xff] }
  0x21   : > { %11207 = vmatpush3.bf16.msra.mxu0 %v11204_v15  ;;  %v251_v13 = vld [vmem:[%s12575_s14 + $0xd0] sm:$0xff]  ;;  %v252_v14 = vld [vmem:[%s12575_s14 + $0xd8] sm:$0xff]  ;;  %v253_v15 = vld [vmem:[%s12575_s14 + $0xe0] sm:$0xff] }
  0x22   : > { %11209 = vmatprep.subr.bf16.mxu0 %v11208_v18  ;;  %v254_v16 = vld [vmem:[%s12575_s14 + $0xe8] sm:$0xff]  ;;  %v255_v17 = vld [vmem:[%s12575_s14 + $0xf0] sm:$0xff]  ;;  %v257_v19 = vld [vmem:[%s12575_s14 + $0x100] sm:$0xff] }
  0x23   : > { %v258_v20 = vld [vmem:[%s12575_s14 + $0x108] sm:$0xff]  ;;  %v260_v22 = vld [vmem:[%s12575_s14 + $0x118] sm:$0xff]  ;;  %v8465_v29 = vld [vmem:[%s15647_s1 + $0x120] sm:$0xff] }
  0x24   : > { %v565_v23 = vld [vmem:[%s12575_s14 + $0x1] sm:$0xff]  ;;  %v8464_v25 = vld [vmem:[%s15647_s1 + $0x118] sm:$0xff]  ;;  %v566_v26 = vld [vmem:[%s12575_s14 + $0x9] sm:$0xff] }
  0x25   : > { %11211 = vmatpush3.bf16.msra.mxu0 %v11208_v18  ;;  %v256_v18 = vld [vmem:[%s12575_s14 + $0xf8] sm:$0xff]  ;;  %v8467_v34 = vld [vmem:[%s15647_s1 + $0x130] sm:$0xff]  ;;  %v8469_v39 = vld [vmem:[%s15647_s1 + $0x140] sm:$0xff] }
  0x26   : > { %11213 = vmatprep.subr.bf16.mxu0 %v11212_v21  ;;  %v8471_v44 = vld [vmem:[%s15647_s1 + $0x150] sm:$0xff]  ;;  %v8473_v49 = vld [vmem:[%s15647_s1 + $0x160] sm:$0xff] }
  0x27   : > { %v8475_v54 = vld [vmem:[%s15647_s1 + $0x170] sm:$0xff]  ;;  %v8477_v59 = vld [vmem:[%s15647_s1 + $0x180] sm:$0xff] }
  0x28   : > { %v582_v0 = vld [vmem:[%s12575_s14 + $0x89] sm:$0xff] }
  0x29   : > { %11215 = vmatpush3.bf16.msra.mxu0 %v11212_v21  ;;  %v259_v21 = vld [vmem:[%s12575_s14 + $0x110] sm:$0xff] }
  0x2a   : > { %11217 = vmatprep.subr.bf16.mxu0 %v11216_v24 }
  0x2d   : > { %11219 = vmatpush3.bf16.msra.mxu0 %v11216_v24  ;;  %v8463_v24 = vld [vmem:[%s15647_s1 + $0x110] sm:$0xff] }
  0x2e   : > { %11221 = vmatprep.subr.bf16.mxu0 %v11220_v27  ;;  %v11256_v28 = vpack.c.bf16 %v8464_v25, %v8463_v24  ;;  %v8481_v25 = vld [vmem:[%s15647_s1 + $0x1a0] sm:$0xff] }
  0x30   : > { %9673 = vmatmul.mubr.f32.vlgmr.msra.gmra.mrb[0].mxu0 %v226_v30  ;;  %v8466_v30 = vld [vmem:[%s15647_s1 + $0x128] sm:$0xff] }
  0x31   : > { %11223 = vmatpush3.bf16.msra.mxu0 %v11220_v27  ;;  %9675 = vmatprep.mubr.f32.mxu0 %v227_v31  ;;  %v567_v27 = vld [vmem:[%s12575_s14 + $0x11] sm:$0xff]  ;;  %v568_v31 = vld [vmem:[%s12575_s14 + $0x19] sm:$0xff]  ;;  %v11260_v33 = vpack.c.bf16 %v8466_v30, %v8465_v29 }
  0x32   : > { %11225 = vmatprep.subr.bf16.mxu0 %v11224_v32  ;;  %v8483_v30 = vld [vmem:[%s15647_s1 + $0x1b0] sm:$0xff] }
  0x34   : > { %9676 = vmatmul.mubr.f32.gmra.mrb[2].mxu0 %v228_v35  ;;  %v8468_v35 = vld [vmem:[%s15647_s1 + $0x138] sm:$0xff] }
  0x35   : > { %9678 = vmatprep.mubr.f32.mxu0 %v229_v36  ;;  %11227 = vmatpush3.bf16.msra.mxu0 %v11224_v32  ;;  %v569_v32 = vld [vmem:[%s12575_s14 + $0x21] sm:$0xff]  ;;  %v570_v36 = vld [vmem:[%s12575_s14 + $0x29] sm:$0xff]  ;;  %v11264_v38 = vpack.c.bf16 %v8468_v35, %v8467_v34 }
  0x36   : > { %11229 = vmatprep.subr.bf16.mxu0 %v11228_v37  ;;  %v8485_v35 = vld [vmem:[%s15647_s1 + $0x1c0] sm:$0xff] }
  0x38   : > { %9679 = vmatmul.mubr.f32.gmra.mrb[4].mxu0 %v230_v40  ;;  %v8470_v40 = vld [vmem:[%s15647_s1 + $0x148] sm:$0xff] }
  0x39   : > { %9681 = vmatprep.mubr.f32.mxu0 %v231_v41  ;;  %11231 = vmatpush3.bf16.msra.mxu0 %v11228_v37  ;;  %v571_v37 = vld [vmem:[%s12575_s14 + $0x31] sm:$0xff]  ;;  %v572_v41 = vld [vmem:[%s12575_s14 + $0x39] sm:$0xff]  ;;  %v11268_v43 = vpack.c.bf16 %v8470_v40, %v8469_v39 }
  0x3a   : > { %11233 = vmatprep.subr.bf16.mxu0 %v11232_v42  ;;  %v8487_v40 = vld [vmem:[%s15647_s1 + $0x1d0] sm:$0xff] }
  0x3c   : > { %9682 = vmatmul.mubr.f32.gmra.mrb[6].mxu0 %v232_v45  ;;  %v8472_v45 = vld [vmem:[%s15647_s1 + $0x158] sm:$0xff] }
  0x3d   : > { %9684 = vmatprep.mubr.f32.mxu0 %v233_v46  ;;  %11235 = vmatpush3.bf16.msra.mxu0 %v11232_v42  ;;  %v573_v42 = vld [vmem:[%s12575_s14 + $0x41] sm:$0xff]  ;;  %v574_v46 = vld [vmem:[%s12575_s14 + $0x49] sm:$0xff]  ;;  %v11272_v48 = vpack.c.bf16 %v8472_v45, %v8471_v44 }
  0x3e   : > { %11237 = vmatprep.subr.bf16.mxu0 %v11236_v47  ;;  %v8489_v45 = vld [vmem:[%s15647_s1 + $0x1e0] sm:$0xff] }
  0x40   : > { %9685 = vmatmul.mubr.f32.gmra.mrb[8].mxu0 %v234_v50  ;;  %v8474_v50 = vld [vmem:[%s15647_s1 + $0x168] sm:$0xff] }
  0x41   : > { %9687 = vmatprep.mubr.f32.mxu0 %v235_v51  ;;  %11239 = vmatpush3.bf16.msra.mxu0 %v11236_v47  ;;  %v575_v47 = vld [vmem:[%s12575_s14 + $0x51] sm:$0xff]  ;;  %v576_v51 = vld [vmem:[%s12575_s14 + $0x59] sm:$0xff]  ;;  %v11276_v53 = vpack.c.bf16 %v8474_v50, %v8473_v49 }
  0x42   : > { %11241 = vmatprep.subr.bf16.mxu0 %v11240_v52  ;;  %v8491_v50 = vld [vmem:[%s15647_s1 + $0x1f0] sm:$0xff] }
  0x44   : > { %9688 = vmatmul.mubr.f32.gmra.mrb[10].mxu0 %v236_v55  ;;  %v8476_v55 = vld [vmem:[%s15647_s1 + $0x178] sm:$0xff] }
  0x45   : > { %9690 = vmatprep.mubr.f32.mxu0 %v237_v56  ;;  %11243 = vmatpush3.bf16.msra.mxu0 %v11240_v52  ;;  %v577_v52 = vld [vmem:[%s12575_s14 + $0x61] sm:$0xff]  ;;  %v578_v56 = vld [vmem:[%s12575_s14 + $0x69] sm:$0xff]  ;;  %v11280_v58 = vpack.c.bf16 %v8476_v55, %v8475_v54 }
  0x46   : > { %11245 = vmatprep.subr.bf16.mxu0 %v11244_v57  ;;  %v8493_v55 = vld [vmem:[%s15647_s1 + $0x200] sm:$0xff] }
  0x48   : > { %9691 = vmatmul.mubr.f32.gmra.mrb[12].mxu0 %v238_v60  ;;  %v8478_v60 = vld [vmem:[%s15647_s1 + $0x188] sm:$0xff] }
  0x49   : > { %9693 = vmatprep.mubr.f32.mxu0 %v239_v61  ;;  %11247 = vmatpush3.bf16.msra.mxu0 %v11244_v57  ;;  %v579_v57 = vld [vmem:[%s12575_s14 + $0x71] sm:$0xff]  ;;  %v580_v61 = vld [vmem:[%s12575_s14 + $0x79] sm:$0xff]  ;;  %v11284_v63 = vpack.c.bf16 %v8478_v60, %v8477_v59 }
  0x4a   : > { %11249 = vmatprep.subr.bf16.mxu0 %v11248_v62  ;;  %v12886_v60 = vld [vmem:[%s12575_s14 + $0x8a] sm:$0xff] }
  0x4c   : > { %9694 = vmatmul.mubr.f32.gmra.mrb[14].mxu0 %v240_v1  ;;  %v583_v1 = vld [vmem:[%s12575_s14 + $0x91] sm:$0xff] }
  0x4d   : > { %9696 = vmatprep.mubr.f32.mxu0 %v241_v2  ;;  %11251 = vmatpush3.bf16.msra.mxu0 %v11248_v62  ;;  %v581_v62 = vld [vmem:[%s12575_s14 + $0x81] sm:$0xff]  ;;  %v584_v2 = vld [vmem:[%s12575_s14 + $0x99] sm:$0xff] }
  0x4e   : > { %11253 = vmatprep.subr.bf16.mxu0 %v11252_v3 }
  0x50   : > { %9697 = vmatmul.mubr.f32.gmra.mrb[16].mxu0 %v242_v4  ;;  %v586_v4 = vld [vmem:[%s12575_s14 + $0xa9] sm:$0xff] }
  0x51   : > { %9699 = vmatprep.mubr.f32.mxu0 %v243_v5  ;;  %v587_v5 = vld [vmem:[%s12575_s14 + $0xb1] sm:$0xff] }
  0x54   : > { %9700 = vmatmul.mubr.f32.gmra.mrb[18].mxu0 %v244_v6  ;;  %v588_v6 = vld [vmem:[%s12575_s14 + $0xb9] sm:$0xff] }
  0x55   : > { %9702 = vmatprep.mubr.f32.mxu0 %v245_v7  ;;  %v589_v7 = vld [vmem:[%s12575_s14 + $0xc1] sm:$0xff] }
  0x58   : > { %9703 = vmatmul.mubr.f32.gmra.mrb[20].mxu0 %v246_v8  ;;  %v590_v8 = vld [vmem:[%s12575_s14 + $0xc9] sm:$0xff] }
  0x59   : > { %9705 = vmatprep.mubr.f32.mxu0 %v247_v9  ;;  %v591_v9 = vld [vmem:[%s12575_s14 + $0xd1] sm:$0xff] }
  0x5c   : > { %9706 = vmatmul.mubr.f32.gmra.mrb[22].mxu0 %v248_v10  ;;  %v592_v10 = vld [vmem:[%s12575_s14 + $0xd9] sm:$0xff] }
  0x5d   : > { %9708 = vmatprep.mubr.f32.mxu0 %v249_v11  ;;  %v593_v11 = vld [vmem:[%s12575_s14 + $0xe1] sm:$0xff] }
  0x60   : > { %9709 = vmatmul.mubr.f32.gmra.mrb[24].mxu0 %v250_v12  ;;  %v594_v12 = vld [vmem:[%s12575_s14 + $0xe9] sm:$0xff] }
  0x61   : > { %9711 = vmatprep.mubr.f32.mxu0 %v251_v13  ;;  %v595_v13 = vld [vmem:[%s12575_s14 + $0xf1] sm:$0xff] }
  0x64   : > { %9712 = vmatmul.mubr.f32.gmra.mrb[26].mxu0 %v252_v14  ;;  %v596_v14 = vld [vmem:[%s12575_s14 + $0xf9] sm:$0xff] }
  0x65   : > { %9714 = vmatprep.mubr.f32.mxu0 %v253_v15  ;;  %v597_v15 = vld [vmem:[%s12575_s14 + $0x101] sm:$0xff] }
  0x68   : > { %9715 = vmatmul.mubr.f32.gmra.mrb[28].mxu0 %v254_v16  ;;  %v598_v16 = vld [vmem:[%s12575_s14 + $0x109] sm:$0xff] }
  0x69   : > { %9717 = vmatprep.mubr.f32.mxu0 %v255_v17  ;;  %v599_v17 = vld [vmem:[%s12575_s14 + $0x111] sm:$0xff] }
  0x6c   : > { %9718 = vmatmul.mubr.f32.gmra.mrb[30].mxu0 %v256_v18  ;;  %v600_v18 = vld [vmem:[%s12575_s14 + $0x119] sm:$0xff] }
  0x6d   : > { %9720 = vmatprep.mubr.f32.mxu0 %v257_v19  ;;  %v971_v19 = vld [vmem:[%s12575_s14 + $0x2] sm:$0xff] }
  0x70   : > { %9721 = vmatmul.mubr.f32.gmra.mrb[32].mxu0 %v258_v20  ;;  %v8479_v20 = vld [vmem:[%s15647_s1 + $0x190] sm:$0xff] }
  0x71   : > { %9723 = vmatprep.mubr.f32.mxu0 %v259_v21  ;;  %v8480_v21 = vld [vmem:[%s15647_s1 + $0x198] sm:$0xff] }
  0x72   : > { %v11288_v24 = vpack.c.bf16 %v8480_v21, %v8479_v20  ;;  %v8499_v21 = vld [vmem:[%s15647_s1 + $0x230] sm:$0xff] }
  0x74   : > { %9724 = vmatmul.mubr.f32.gmra.mrb[34].mxu0 %v260_v22  ;;  %v972_v22 = vld [vmem:[%s12575_s14 + $0xa] sm:$0xff] }
  0x75   : > { %9758 = vmatprep.mubr.f32.mxu0 %v565_v23  ;;  %v12784_v23 = vld [vmem:[%s12575_s14 + $0x12] sm:$0xff] }
  0x78   : > { %9759 = vmatmul.mubr.f32.vlgmr.msra.gmra.mrb[0].mxu0 %v566_v26  ;;  %v8482_v26 = vld [vmem:[%s15647_s1 + $0x1a8] sm:$0xff] }
  0x79   : > { %11255 = vmatpush3.bf16.msra.mxu0 %v11252_v3  ;;  %9761 = vmatprep.mubr.f32.mxu0 %v567_v27  ;;  %v585_v3 = vld [vmem:[%s12575_s14 + $0xa1] sm:$0xff]  ;;  %v11292_v29 = vpack.c.bf16 %v8482_v26, %v8481_v25 }
  0x7a   : > { %11257 = vmatprep.subr.bf16.mxu0 %v11256_v28  ;;  %v12794_v27 = vld [vmem:[%s12575_s14 + $0x1a] sm:$0xff]  ;;  %v8502_v25 = vld [vmem:[%s15647_s1 + $0x248] sm:$0xff] }
  0x7c   : > { %9762 = vmatmul.mubr.f32.gmra.mrb[2].mxu0 %v568_v31  ;;  %v8484_v31 = vld [vmem:[%s15647_s1 + $0x1b8] sm:$0xff] }
  0x7d   : > { %9764 = vmatprep.mubr.f32.mxu0 %v569_v32  ;;  %11259 = vmatpush3.bf16.msra.mxu0 %v11256_v28  ;;  %v12797_v28 = vld [vmem:[%s12575_s14 + $0x22] sm:$0xff]  ;;  %v12808_v32 = vld [vmem:[%s12575_s14 + $0x2a] sm:$0xff]  ;;  %v11296_v34 = vpack.c.bf16 %v8484_v31, %v8483_v30 }
  0x7e   : > { %11261 = vmatprep.subr.bf16.mxu0 %v11260_v33  ;;  %v8505_v30 = vld [vmem:[%s15647_s1 + $0x260] sm:$0xff]  ;;  %v8506_v31 = vld [vmem:[%s15647_s1 + $0x268] sm:$0xff] }
  0x80   : > { %9765 = vmatmul.mubr.f32.gmra.mrb[4].mxu0 %v570_v36  ;;  %v8486_v36 = vld [vmem:[%s15647_s1 + $0x1c8] sm:$0xff] }
  0x81   : > { %9767 = vmatprep.mubr.f32.mxu0 %v571_v37  ;;  %11263 = vmatpush3.bf16.msra.mxu0 %v11260_v33  ;;  %v12811_v33 = vld [vmem:[%s12575_s14 + $0x32] sm:$0xff]  ;;  %v12822_v37 = vld [vmem:[%s12575_s14 + $0x3a] sm:$0xff]  ;;  %v11300_v39 = vpack.c.bf16 %v8486_v36, %v8485_v35 }
  0x82   : > { %11265 = vmatprep.subr.bf16.mxu0 %v11264_v38  ;;  %v8509_v36 = vld [vmem:[%s15647_s1 + $0x280] sm:$0xff] }
  0x84   : > { %9768 = vmatmul.mubr.f32.gmra.mrb[6].mxu0 %v572_v41  ;;  %v8488_v41 = vld [vmem:[%s15647_s1 + $0x1d8] sm:$0xff] }
  0x85   : > { %9770 = vmatprep.mubr.f32.mxu0 %v573_v42  ;;  %11267 = vmatpush3.bf16.msra.mxu0 %v11264_v38  ;;  %v12825_v38 = vld [vmem:[%s12575_s14 + $0x42] sm:$0xff]  ;;  %v12836_v42 = vld [vmem:[%s12575_s14 + $0x4a] sm:$0xff]  ;;  %v11304_v44 = vpack.c.bf16 %v8488_v41, %v8487_v40  ;;  %v1783_v41 = vld [vmem:[%s12575_s14 + $0x13] sm:$0xff] }
  0x86   : > { %11269 = vmatprep.subr.bf16.mxu0 %v11268_v43  ;;  %v1412_v40 = vld [vmem:[%s12575_s14 + $0x12a] sm:$0xff] }
  0x88   : > { %9771 = vmatmul.mubr.f32.gmra.mrb[8].mxu0 %v574_v46  ;;  %v8490_v46 = vld [vmem:[%s15647_s1 + $0x1e8] sm:$0xff] }
  0x89   : > { %9773 = vmatprep.mubr.f32.mxu0 %v575_v47  ;;  %11271 = vmatpush3.bf16.msra.mxu0 %v11268_v43  ;;  %v12839_v43 = vld [vmem:[%s12575_s14 + $0x52] sm:$0xff]  ;;  %v12850_v47 = vld [vmem:[%s12575_s14 + $0x5a] sm:$0xff]  ;;  %v11308_v49 = vpack.c.bf16 %v8490_v46, %v8489_v45  ;;  %v1785_v45 = vld [vmem:[%s12575_s14 + $0x23] sm:$0xff] }
  0x8a   : > { %11273 = vmatprep.subr.bf16.mxu0 %v11272_v48 }
  0x8c   : > { %9774 = vmatmul.mubr.f32.gmra.mrb[10].mxu0 %v576_v51  ;;  %v8492_v51 = vld [vmem:[%s15647_s1 + $0x1f8] sm:$0xff] }
  0x8d   : > { %9776 = vmatprep.mubr.f32.mxu0 %v577_v52  ;;  %11275 = vmatpush3.bf16.msra.mxu0 %v11272_v48  ;;  %v12853_v48 = vld [vmem:[%s12575_s14 + $0x62] sm:$0xff]  ;;  %v12864_v52 = vld [vmem:[%s12575_s14 + $0x6a] sm:$0xff]  ;;  %v11312_v54 = vpack.c.bf16 %v8492_v51, %v8491_v50  ;;  %v1787_v50 = vld [vmem:[%s12575_s14 + $0x33] sm:$0xff] }
  0x8e   : > { %11277 = vmatprep.subr.bf16.mxu0 %v11276_v53 }
  0x90   : > { %9777 = vmatmul.mubr.f32.gmra.mrb[12].mxu0 %v578_v56  ;;  %v8494_v56 = vld [vmem:[%s15647_s1 + $0x208] sm:$0xff] }
  0x91   : > { %9779 = vmatprep.mubr.f32.mxu0 %v579_v57  ;;  %11279 = vmatpush3.bf16.msra.mxu0 %v11276_v53  ;;  %v12867_v53 = vld [vmem:[%s12575_s14 + $0x72] sm:$0xff]  ;;  %v12878_v57 = vld [vmem:[%s12575_s14 + $0x7a] sm:$0xff]  ;;  %v11316_v59 = vpack.c.bf16 %v8494_v56, %v8493_v55  ;;  %v1789_v55 = vld [vmem:[%s12575_s14 + $0x43] sm:$0xff] }
  0x92   : > { %11281 = vmatprep.subr.bf16.mxu0 %v11280_v58 }
  0x94   : > { %9780 = vmatmul.mubr.f32.gmra.mrb[14].mxu0 %v580_v61  ;;  %v12889_v61 = vld [vmem:[%s12575_s14 + $0x92] sm:$0xff] }
  0x95   : > { %9782 = vmatprep.mubr.f32.mxu0 %v581_v62  ;;  %11283 = vmatpush3.bf16.msra.mxu0 %v11280_v58  ;;  %v12881_v58 = vld [vmem:[%s12575_s14 + $0x82] sm:$0xff]  ;;  %v12894_v62 = vld [vmem:[%s12575_s14 + $0x9a] sm:$0xff] }
  0x96   : > { %11285 = vmatprep.subr.bf16.mxu0 %v11284_v63 }
  0x98   : > { %9783 = vmatmul.mubr.f32.gmra.mrb[16].mxu0 %v582_v0  ;;  %v12902_v0 = vld [vmem:[%s12575_s14 + $0xaa] sm:$0xff] }
  0x99   : > { %9785 = vmatprep.mubr.f32.mxu0 %v583_v1  ;;  %v12905_v1 = vld [vmem:[%s12575_s14 + $0xb2] sm:$0xff] }
  0x9c   : > { %9786 = vmatmul.mubr.f32.gmra.mrb[18].mxu0 %v584_v2  ;;  %v12910_v2 = vld [vmem:[%s12575_s14 + $0xba] sm:$0xff] }
  0x9d   : > { %9788 = vmatprep.mubr.f32.mxu0 %v585_v3  ;;  %v12913_v3 = vld [vmem:[%s12575_s14 + $0xc2] sm:$0xff] }
  0xa0   : > { %9789 = vmatmul.mubr.f32.gmra.mrb[20].mxu0 %v586_v4  ;;  %v12918_v4 = vld [vmem:[%s12575_s14 + $0xca] sm:$0xff] }
  0xa1   : > { %9791 = vmatprep.mubr.f32.mxu0 %v587_v5  ;;  %v12921_v5 = vld [vmem:[%s12575_s14 + $0xd2] sm:$0xff] }
  0xa4   : > { %9792 = vmatmul.mubr.f32.gmra.mrb[22].mxu0 %v588_v6  ;;  %v12926_v6 = vld [vmem:[%s12575_s14 + $0xda] sm:$0xff] }
  0xa5   : > { %9794 = vmatprep.mubr.f32.mxu0 %v589_v7  ;;  %v12929_v7 = vld [vmem:[%s12575_s14 + $0xe2] sm:$0xff] }
  0xa8   : > { %9795 = vmatmul.mubr.f32.gmra.mrb[24].mxu0 %v590_v8  ;;  %v12934_v8 = vld [vmem:[%s12575_s14 + $0xea] sm:$0xff] }
  0xa9   : > { %9797 = vmatprep.mubr.f32.mxu0 %v591_v9  ;;  %v12937_v9 = vld [vmem:[%s12575_s14 + $0xf2] sm:$0xff] }
  0xac   : > { %9798 = vmatmul.mubr.f32.gmra.mrb[26].mxu0 %v592_v10  ;;  %v12942_v10 = vld [vmem:[%s12575_s14 + $0xfa] sm:$0xff] }
  0xad   : > { %9800 = vmatprep.mubr.f32.mxu0 %v593_v11  ;;  %v12945_v11 = vld [vmem:[%s12575_s14 + $0x102] sm:$0xff] }
  0xb0   : > { %9801 = vmatmul.mubr.f32.gmra.mrb[28].mxu0 %v594_v12  ;;  %v12950_v12 = vld [vmem:[%s12575_s14 + $0x10a] sm:$0xff] }
  0xb1   : > { %9803 = vmatprep.mubr.f32.mxu0 %v595_v13  ;;  %v12953_v13 = vld [vmem:[%s12575_s14 + $0x112] sm:$0xff] }
  0xb4   : > { %9804 = vmatmul.mubr.f32.gmra.mrb[30].mxu0 %v596_v14  ;;  %v12958_v14 = vld [vmem:[%s12575_s14 + $0x11a] sm:$0xff] }
  0xb5   : > { %9806 = vmatprep.mubr.f32.mxu0 %v597_v15  ;;  %v8495_v15 = vld [vmem:[%s15647_s1 + $0x210] sm:$0xff] }
  0xb8   : > { %9807 = vmatmul.mubr.f32.gmra.mrb[32].mxu0 %v598_v16  ;;  %v8496_v16 = vld [vmem:[%s15647_s1 + $0x218] sm:$0xff] }
  0xb9   : > { %9809 = vmatprep.mubr.f32.mxu0 %v599_v17  ;;  %v11320_v17 = vpack.c.bf16 %v8496_v16, %v8495_v15  ;;  %v1798_v15 = vld [vmem:[%s12575_s14 + $0x8b] sm:$0xff]  ;;  %v1799_v16 = vld [vmem:[%s12575_s14 + $0x93] sm:$0xff] }
  0xbc   : > { %9810 = vmatmul.mubr.f32.gmra.mrb[34].mxu0 %v600_v18  ;;  %v8497_v18 = vld [vmem:[%s15647_s1 + $0x220] sm:$0xff] }
  0xbd   : > { %9844 = vmatprep.mubr.f32.mxu0 %v971_v19  ;;  %v8498_v19 = vld [vmem:[%s15647_s1 + $0x228] sm:$0xff] }
  0xbe   : > { %v11324_v20 = vpack.c.bf16 %v8498_v19, %v8497_v18  ;;  %v1800_v18 = vld [vmem:[%s12575_s14 + $0x9b] sm:$0xff]  ;;  %v1801_v19 = vld [vmem:[%s12575_s14 + $0xa3] sm:$0xff] }
  0xc0   : > { %9845 = vmatmul.mubr.f32.vlgmr.msra.gmra.mrb[0].mxu0 %v972_v22  ;;  %v8500_v22 = vld [vmem:[%s15647_s1 + $0x238] sm:$0xff] }
  0xc1   : > { %11287 = vmatpush3.bf16.msra.mxu0 %v11284_v63  ;;  %9847 = vmatprep.mubr.f32.mxu0 %v12784_v23  ;;  %v12897_v63 = vld [vmem:[%s12575_s14 + $0xa2] sm:$0xff] }
  0xc2   : > { %11289 = vmatprep.subr.bf16.mxu0 %v11288_v24 }
  0xc4   : > { %9848 = vmatmul.mubr.f32.gmra.mrb[2].mxu0 %v12794_v27 }
  0xc5   : > { %9850 = vmatprep.mubr.f32.mxu0 %v12797_v28  ;;  %11291 = vmatpush3.bf16.msra.mxu0 %v11288_v24  ;;  %v8501_v24 = vld [vmem:[%s15647_s1 + $0x240] sm:$0xff] }
  0xc6   : > { %11293 = vmatprep.subr.bf16.mxu0 %v11292_v29  ;;  %v11332_v26 = vpack.c.bf16 %v8502_v25, %v8501_v24  ;;  %v1806_v24 = vld [vmem:[%s12575_s14 + $0xcb] sm:$0xff]  ;;  %v1807_v25 = vld [vmem:[%s12575_s14 + $0xd3] sm:$0xff] }
  0xc8   : > { %9851 = vmatmul.mubr.f32.gmra.mrb[4].mxu0 %v12808_v32 }
  0xc9   : > { %9853 = vmatprep.mubr.f32.mxu0 %v12811_v33  ;;  %11295 = vmatpush3.bf16.msra.mxu0 %v11292_v29 }
  0xca   : > { %11297 = vmatprep.subr.bf16.mxu0 %v11296_v34 }
  0xcc   : > { %9854 = vmatmul.mubr.f32.gmra.mrb[6].mxu0 %v12822_v37 }
  0xcd   : > { %9856 = vmatprep.mubr.f32.mxu0 %v12825_v38  ;;  %11299 = vmatpush3.bf16.msra.mxu0 %v11296_v34  ;;  %v8508_v34 = vld [vmem:[%s15647_s1 + $0x278] sm:$0xff] }
  0xce   : > { %11301 = vmatprep.subr.bf16.mxu0 %v11300_v39 }
  0xd0   : > { %9857 = vmatmul.mubr.f32.gmra.mrb[8].mxu0 %v12836_v42 }
  0xd1   : > { %9859 = vmatprep.mubr.f32.mxu0 %v12839_v43  ;;  %11303 = vmatpush3.bf16.msra.mxu0 %v11300_v39  ;;  %v1411_v39 = vld [vmem:[%s12575_s14 + $0x122] sm:$0xff] }
  0xd2   : > { %11305 = vmatprep.subr.bf16.mxu0 %v11304_v44 }
  0xd4   : > { %9860 = vmatmul.mubr.f32.gmra.mrb[10].mxu0 %v12850_v47 }
  0xd5   : > { %9862 = vmatprep.mubr.f32.mxu0 %v12853_v48  ;;  %11307 = vmatpush3.bf16.msra.mxu0 %v11304_v44  ;;  %v1784_v44 = vld [vmem:[%s12575_s14 + $0x1b] sm:$0xff] }
  0xd6   : > { %11309 = vmatprep.subr.bf16.mxu0 %v11308_v49 }
  0xd8   : > { %9863 = vmatmul.mubr.f32.gmra.mrb[12].mxu0 %v12864_v52 }
  0xd9   : > { %9865 = vmatprep.mubr.f32.mxu0 %v12867_v53  ;;  %11311 = vmatpush3.bf16.msra.mxu0 %v11308_v49  ;;  %v1786_v49 = vld [vmem:[%s12575_s14 + $0x2b] sm:$0xff] }
  0xda   : > { %11313 = vmatprep.subr.bf16.mxu0 %v11312_v54 }
  0xdc   : > { %9866 = vmatmul.mubr.f32.gmra.mrb[14].mxu0 %v12878_v57 }
  0xdd   : > { %9868 = vmatprep.mubr.f32.mxu0 %v12881_v58  ;;  %11315 = vmatpush3.bf16.msra.mxu0 %v11312_v54  ;;  %v1788_v54 = vld [vmem:[%s12575_s14 + $0x3b] sm:$0xff] }
  0xde   : > { %11317 = vmatprep.subr.bf16.mxu0 %v11316_v59 }
  0xe0   : > { %9869 = vmatmul.mubr.f32.gmra.mrb[16].mxu0 %v12886_v60 }
  0xe1   : > { %9871 = vmatprep.mubr.f32.mxu0 %v12889_v61 }
  0xe4   : > { %9872 = vmatmul.mubr.f32.gmra.mrb[18].mxu0 %v12894_v62 }
  0xe5   : > { %9874 = vmatprep.mubr.f32.mxu0 %v12897_v63 }
  0xe8   : > { %9875 = vmatmul.mubr.f32.gmra.mrb[20].mxu0 %v12902_v0 }
  0xe9   : > { %9877 = vmatprep.mubr.f32.mxu0 %v12905_v1 }
  0xec   : > { %9878 = vmatmul.mubr.f32.gmra.mrb[22].mxu0 %v12910_v2 }
  0xed   : > { %9880 = vmatprep.mubr.f32.mxu0 %v12913_v3 }
  0xf0   : > { %9881 = vmatmul.mubr.f32.gmra.mrb[24].mxu0 %v12918_v4 }
  0xf1   : > { %9883 = vmatprep.mubr.f32.mxu0 %v12921_v5 }
  0xf4   : > { %9884 = vmatmul.mubr.f32.gmra.mrb[26].mxu0 %v12926_v6 }
  0xf5   : > { %9886 = vmatprep.mubr.f32.mxu0 %v12929_v7 }
  0xf8   : > { %9887 = vmatmul.mubr.f32.gmra.mrb[28].mxu0 %v12934_v8 }
  0xf9   : > { %9889 = vmatprep.mubr.f32.mxu0 %v12937_v9 }
  0xfc   : > { %9890 = vmatmul.mubr.f32.gmra.mrb[30].mxu0 %v12942_v10 }
  0xfd   : > { %9892 = vmatprep.mubr.f32.mxu0 %v12945_v11 }
 0x100   : > { %9893 = vmatmul.mubr.f32.gmra.mrb[32].mxu0 %v12950_v12 }
 0x101   : > { %9895 = vmatprep.mubr.f32.mxu0 %v12953_v13 }
 0x104   : > { %9896 = vmatmul.mubr.f32.gmra.mrb[34].mxu0 %v12958_v14 }
 0x105   : > { %9930 = vmatprep.mubr.f32.mxu0 %v12784_v23  ;;  %v11328_v23 = vpack.c.bf16 %v8500_v22, %v8499_v21  ;;  %v1803_v21 = vld [vmem:[%s12575_s14 + $0xb3] sm:$0xff]  ;;  %v1804_v22 = vld [vmem:[%s12575_s14 + $0xbb] sm:$0xff] }
 0x108   : > { %9931 = vmatmul.mubr.f32.vlgmr.msra.gmra.mrb[0].mxu0 %v12794_v27  ;;  %v8503_v27 = vld [vmem:[%s15647_s1 + $0x250] sm:$0xff] }
 0x109   : > { %11319 = vmatpush3.bf16.msra.mxu0 %v11316_v59  ;;  %9933 = vmatprep.mubr.f32.mxu0 %v12797_v28  ;;  %v8504_v28 = vld [vmem:[%s15647_s1 + $0x258] sm:$0xff]  ;;  %v1790_v59 = vld [vmem:[%s12575_s14 + $0x4b] sm:$0xff] }
 0x10a   : > { %11321 = vmatprep.subr.bf16.mxu0 %v11320_v17  ;;  %v11336_v29 = vpack.c.bf16 %v8504_v28, %v8503_v27  ;;  %v1809_v27 = vld [vmem:[%s12575_s14 + $0xe3] sm:$0xff]  ;;  %v1810_v28 = vld [vmem:[%s12575_s14 + $0xeb] sm:$0xff] }
 0x10c   : > { %9934 = vmatmul.mubr.f32.gmra.mrb[2].mxu0 %v12808_v32  ;;  %v11340_v32 = vpack.c.bf16 %v8506_v31, %v8505_v30  ;;  %v1812_v30 = vld [vmem:[%s12575_s14 + $0xfb] sm:$0xff]  ;;  %v1813_v31 = vld [vmem:[%s12575_s14 + $0x103] sm:$0xff] }
 0x10d   : > { %9936 = vmatprep.mubr.f32.mxu0 %v12811_v33  ;;  %11323 = vmatpush3.bf16.msra.mxu0 %v11320_v17  ;;  %v8507_v33 = vld [vmem:[%s15647_s1 + $0x270] sm:$0xff] }
 0x10e   : > { %11325 = vmatprep.subr.bf16.mxu0 %v11324_v20  ;;  %v11344_v35 = vpack.c.bf16 %v8508_v34, %v8507_v33  ;;  %v1815_v33 = vld [vmem:[%s12575_s14 + $0x113] sm:$0xff]  ;;  %v1816_v34 = vld [vmem:[%s12575_s14 + $0x11b] sm:$0xff] }
 0x110   : > { %9937 = vmatmul.mubr.f32.gmra.mrb[4].mxu0 %v12822_v37  ;;  %v8510_v37 = vld [vmem:[%s15647_s1 + $0x288] sm:$0xff] }
 0x111   : > { %9939 = vmatprep.mubr.f32.mxu0 %v12825_v38  ;;  %11327 = vmatpush3.bf16.msra.mxu0 %v11324_v20  ;;  %v11348_v38 = vpack.c.bf16 %v8510_v37, %v8509_v36  ;;  %v1802_v20 = vld [vmem:[%s12575_s14 + $0xab] sm:$0xff]  ;;  %v2189_v37 = vld [vmem:[%s12575_s14 + $0x14] sm:$0xff] }
 0x112   : > { %11329 = vmatprep.subr.bf16.mxu0 %v11328_v23  ;;  %v1818_v36 = vld [vmem:[%s12575_s14 + $0x12b] sm:$0xff] }
 0x114   : > { %9940 = vmatmul.mubr.f32.gmra.mrb[6].mxu0 %v12836_v42  ;;  %v8511_v42 = vld [vmem:[%s15647_s1 + $0x290] sm:$0xff] }
 0x115   : > { %9942 = vmatprep.mubr.f32.mxu0 %v12839_v43  ;;  %11331 = vmatpush3.bf16.msra.mxu0 %v11328_v23  ;;  %v8512_v43 = vld [vmem:[%s15647_s1 + $0x298] sm:$0xff]  ;;  %v1805_v23 = vld [vmem:[%s12575_s14 + $0xc3] sm:$0xff] }
 0x116   : > { %11333 = vmatprep.subr.bf16.mxu0 %v11332_v26  ;;  %v11352_v46 = vpack.c.bf16 %v8512_v43, %v8511_v42  ;;  %v8529_v43 = vld [vmem:[%s15647_s1 + $0x320] sm:$0xff] }
 0x118   : > { %9943 = vmatmul.mubr.f32.gmra.mrb[8].mxu0 %v12850_v47  ;;  %v8513_v47 = vld [vmem:[%s15647_s1 + $0x2a0] sm:$0xff] }
 0x119   : > { %9945 = vmatprep.mubr.f32.mxu0 %v12853_v48  ;;  %11335 = vmatpush3.bf16.msra.mxu0 %v11332_v26  ;;  %v8514_v48 = vld [vmem:[%s15647_s1 + $0x2a8] sm:$0xff]  ;;  %v1808_v26 = vld [vmem:[%s12575_s14 + $0xdb] sm:$0xff] }
 0x11a   : > { %11337 = vmatprep.subr.bf16.mxu0 %v11336_v29  ;;  %v11356_v51 = vpack.c.bf16 %v8514_v48, %v8513_v47  ;;  %v8531_v48 = vld [vmem:[%s15647_s1 + $0x330] sm:$0xff] }
 0x11c   : > { %9946 = vmatmul.mubr.f32.gmra.mrb[10].mxu0 %v12864_v52  ;;  %v8515_v52 = vld [vmem:[%s15647_s1 + $0x2b0] sm:$0xff] }
 0x11d   : > { %9948 = vmatprep.mubr.f32.mxu0 %v12867_v53  ;;  %11339 = vmatpush3.bf16.msra.mxu0 %v11336_v29  ;;  %v8516_v53 = vld [vmem:[%s15647_s1 + $0x2b8] sm:$0xff] }
 0x11e   : > { %11341 = vmatprep.subr.bf16.mxu0 %v11340_v32  ;;  %v11360_v56 = vpack.c.bf16 %v8516_v53, %v8515_v52  ;;  %v1811_v29 = vld [vmem:[%s12575_s14 + $0xf3] sm:$0xff]  ;;  %v8533_v53 = vld [vmem:[%s15647_s1 + $0x340] sm:$0xff] }
 0x120   : > { %9949 = vmatmul.mubr.f32.gmra.mrb[12].mxu0 %v12878_v57  ;;  %v8517_v57 = vld [vmem:[%s15647_s1 + $0x2c0] sm:$0xff] }
 0x121   : > { %9951 = vmatprep.mubr.f32.mxu0 %v12881_v58  ;;  %11343 = vmatpush3.bf16.msra.mxu0 %v11340_v32  ;;  %v8518_v58 = vld [vmem:[%s15647_s1 + $0x2c8] sm:$0xff] }
 0x122   : > { %11345 = vmatprep.subr.bf16.mxu0 %v11344_v35  ;;  %v1814_v32 = vld [vmem:[%s12575_s14 + $0x10b] sm:$0xff] }
 0x124   : > { %9952 = vmatmul.mubr.f32.gmra.mrb[14].mxu0 %v12886_v60  ;;  %v1791_v60 = vld [vmem:[%s12575_s14 + $0x53] sm:$0xff] }
 0x125   : > { %9954 = vmatprep.mubr.f32.mxu0 %v12889_v61  ;;  %11347 = vmatpush3.bf16.msra.mxu0 %v11344_v35  ;;  %v11364_v61 = vpack.c.bf16 %v8518_v58, %v8517_v57  ;;  %v1817_v35 = vld [vmem:[%s12575_s14 + $0x123] sm:$0xff]  ;;  %v8535_v58 = vld [vmem:[%s15647_s1 + $0x350] sm:$0xff] }
 0x126   : > { %11349 = vmatprep.subr.bf16.mxu0 %v11348_v38 }
 0x128   : > { %9955 = vmatmul.mubr.f32.gmra.mrb[16].mxu0 %v12894_v62  ;;  %v8519_v62 = vld [vmem:[%s15647_s1 + $0x2d0] sm:$0xff] }
 0x129   : > { %9957 = vmatprep.mubr.f32.mxu0 %v12897_v63  ;;  %v8520_v63 = vld [vmem:[%s15647_s1 + $0x2d8] sm:$0xff] }
 0x12c   : > { %9958 = vmatmul.mubr.f32.gmra.mrb[18].mxu0 %v12902_v0  ;;  %v1792_v0 = vld [vmem:[%s12575_s14 + $0x5b] sm:$0xff] }
 0x12d   : > { %9960 = vmatprep.mubr.f32.mxu0 %v12905_v1  ;;  %v1793_v1 = vld [vmem:[%s12575_s14 + $0x63] sm:$0xff] }
 0x130   : > { %9961 = vmatmul.mubr.f32.gmra.mrb[20].mxu0 %v12910_v2  ;;  %v11368_v2 = vpack.c.bf16 %v8520_v63, %v8519_v62  ;;  %v8537_v63 = vld [vmem:[%s15647_s1 + $0x360] sm:$0xff] }
 0x131   : > { %9963 = vmatprep.mubr.f32.mxu0 %v12913_v3  ;;  %v8521_v3 = vld [vmem:[%s15647_s1 + $0x2e0] sm:$0xff] }
 0x134   : > { %9964 = vmatmul.mubr.f32.gmra.mrb[22].mxu0 %v12918_v4  ;;  %v8522_v4 = vld [vmem:[%s15647_s1 + $0x2e8] sm:$0xff] }
 0x135   : > { %9966 = vmatprep.mubr.f32.mxu0 %v12921_v5  ;;  %v1794_v5 = vld [vmem:[%s12575_s14 + $0x6b] sm:$0xff] }
 0x138   : > { %9967 = vmatmul.mubr.f32.gmra.mrb[24].mxu0 %v12926_v6  ;;  %v1795_v6 = vld [vmem:[%s12575_s14 + $0x73] sm:$0xff] }
 0x139   : > { %9969 = vmatprep.mubr.f32.mxu0 %v12929_v7  ;;  %v11372_v7 = vpack.c.bf16 %v8522_v4, %v8521_v3  ;;  %v8539_v4 = vld [vmem:[%s15647_s1 + $0x370] sm:$0xff] }
 0x13c   : > { %9970 = vmatmul.mubr.f32.gmra.mrb[26].mxu0 %v12934_v8  ;;  %v8523_v8 = vld [vmem:[%s15647_s1 + $0x2f0] sm:$0xff] }
 0x13d   : > { %9972 = vmatprep.mubr.f32.mxu0 %v12937_v9  ;;  %v8524_v9 = vld [vmem:[%s15647_s1 + $0x2f8] sm:$0xff] }
 0x140   : > { %9973 = vmatmul.mubr.f32.gmra.mrb[28].mxu0 %v12942_v10  ;;  %v1796_v10 = vld [vmem:[%s12575_s14 + $0x7b] sm:$0xff] }
 0x141   : > { %9975 = vmatprep.mubr.f32.mxu0 %v12945_v11  ;;  %v1797_v11 = vld [vmem:[%s12575_s14 + $0x83] sm:$0xff] }
 0x144   : > { %9976 = vmatmul.mubr.f32.gmra.mrb[30].mxu0 %v12950_v12  ;;  %v11376_v12 = vpack.c.bf16 %v8524_v9, %v8523_v8  ;;  %v8541_v9 = vld [vmem:[%s15647_s1 + $0x380] sm:$0xff] }
 0x145   : > { %9978 = vmatprep.mubr.f32.mxu0 %v12953_v13  ;;  %v8525_v13 = vld [vmem:[%s15647_s1 + $0x300] sm:$0xff] }
 0x148   : > { %9979 = vmatmul.mubr.f32.gmra.mrb[32].mxu0 %v12958_v14  ;;  %v8526_v14 = vld [vmem:[%s15647_s1 + $0x308] sm:$0xff] }
 0x149   : > { %9981 = vmatprep.mubr.f32.mxu0 %v1411_v39  ;;  %v11380_v17 = vpack.c.bf16 %v8526_v14, %v8525_v13  ;;  %v8528_v39 = vld [vmem:[%s15647_s1 + $0x318] sm:$0xff] }
 0x14a   : > { %v13240_v14 = vld [vmem:[%s12575_s14 + $0x9c] sm:$0xff] }
 0x14c   : > { %9982 = vmatmul.mubr.f32.gmra.mrb[34].mxu0 %v1412_v40  ;;  %v2190_v40 = vld [vmem:[%s12575_s14 + $0x1c] sm:$0xff] }
 0x14d   : > { %10016 = vmatprep.mubr.f32.mxu0 %v1783_v41  ;;  %v13138_v41 = vld [vmem:[%s12575_s14 + $0x24] sm:$0xff] }
 0x150   : > { %10017 = vmatmul.mubr.f32.vlgmr.msra.gmra.mrb[0].mxu0 %v1784_v44  ;;  %v8530_v44 = vld [vmem:[%s15647_s1 + $0x328] sm:$0xff] }
 0x151   : > { %11351 = vmatpush3.bf16.msra.mxu0 %v11348_v38  ;;  %10019 = vmatprep.mubr.f32.mxu0 %v1785_v45  ;;  %v8527_v38 = vld [vmem:[%s15647_s1 + $0x310] sm:$0xff]  ;;  %v11388_v47 = vpack.c.bf16 %v8530_v44, %v8529_v43  ;;  %v8550_v43 = vld [vmem:[%s15647_s1 + $0x3c8] sm:$0xff] }
 0x152   : > { %11353 = vmatprep.subr.bf16.mxu0 %v11352_v46  ;;  %v11384_v42 = vpack.c.bf16 %v8528_v39, %v8527_v38  ;;  %v13148_v45 = vld [vmem:[%s12575_s14 + $0x2c] sm:$0xff] }
 0x153   : > { %v8547_v39 = vld [vmem:[%s15647_s1 + $0x3b0] sm:$0xff] }
 0x154   : > { %10020 = vmatmul.mubr.f32.gmra.mrb[2].mxu0 %v1786_v49  ;;  %v8532_v49 = vld [vmem:[%s15647_s1 + $0x338] sm:$0xff] }
 0x155   : > { %10022 = vmatprep.mubr.f32.mxu0 %v1787_v50  ;;  %11355 = vmatpush3.bf16.msra.mxu0 %v11352_v46  ;;  %v13151_v46 = vld [vmem:[%s12575_s14 + $0x34] sm:$0xff]  ;;  %v13162_v50 = vld [vmem:[%s12575_s14 + $0x3c] sm:$0xff]  ;;  %v11392_v52 = vpack.c.bf16 %v8532_v49, %v8531_v48  ;;  %v8554_v49 = vld [vmem:[%s15647_s1 + $0x3e8] sm:$0xff] }
 0x156   : > { %11357 = vmatprep.subr.bf16.mxu0 %v11356_v51  ;;  %v8553_v48 = vld [vmem:[%s15647_s1 + $0x3e0] sm:$0xff] }
 0x158   : > { %10023 = vmatmul.mubr.f32.gmra.mrb[4].mxu0 %v1788_v54  ;;  %v8534_v54 = vld [vmem:[%s15647_s1 + $0x348] sm:$0xff] }
 0x159   : > { %10025 = vmatprep.mubr.f32.mxu0 %v1789_v55  ;;  %11359 = vmatpush3.bf16.msra.mxu0 %v11356_v51  ;;  %v13165_v51 = vld [vmem:[%s12575_s14 + $0x44] sm:$0xff]  ;;  %v13176_v55 = vld [vmem:[%s12575_s14 + $0x4c] sm:$0xff]  ;;  %v11396_v57 = vpack.c.bf16 %v8534_v54, %v8533_v53 }
 0x15a   : > { %11361 = vmatprep.subr.bf16.mxu0 %v11360_v56  ;;  %v8557_v54 = vld [vmem:[%s15647_s1 + $0x400] sm:$0xff] }
 0x15c   : > { %10026 = vmatmul.mubr.f32.gmra.mrb[6].mxu0 %v1790_v59  ;;  %v8536_v59 = vld [vmem:[%s15647_s1 + $0x358] sm:$0xff] }
 0x15d   : > { %10028 = vmatprep.mubr.f32.mxu0 %v1791_v60  ;;  %11363 = vmatpush3.bf16.msra.mxu0 %v11360_v56  ;;  %v13179_v56 = vld [vmem:[%s12575_s14 + $0x54] sm:$0xff]  ;;  %v13190_v60 = vld [vmem:[%s12575_s14 + $0x5c] sm:$0xff]  ;;  %v11400_v62 = vpack.c.bf16 %v8536_v59, %v8535_v58  ;;  %v3001_v59 = vld [vmem:[%s12575_s14 + $0x25] sm:$0xff] }
 0x15e   : > { %11365 = vmatprep.subr.bf16.mxu0 %v11364_v61  ;;  %v2630_v58 = vld [vmem:[%s12575_s14 + $0x13c] sm:$0xff] }
 0x160   : > { %10029 = vmatmul.mubr.f32.gmra.mrb[8].mxu0 %v1792_v0  ;;  %v8538_v0 = vld [vmem:[%s15647_s1 + $0x368] sm:$0xff] }
 0x161   : > { %10031 = vmatprep.mubr.f32.mxu0 %v1793_v1  ;;  %11367 = vmatpush3.bf16.msra.mxu0 %v11364_v61  ;;  %v13193_v61 = vld [vmem:[%s12575_s14 + $0x64] sm:$0xff]  ;;  %v13204_v1 = vld [vmem:[%s12575_s14 + $0x6c] sm:$0xff]  ;;  %v11404_v3 = vpack.c.bf16 %v8538_v0, %v8537_v63  ;;  %v3003_v63 = vld [vmem:[%s12575_s14 + $0x35] sm:$0xff] }
 0x162   : > { %11369 = vmatprep.subr.bf16.mxu0 %v11368_v2 }
 0x164   : > { %10032 = vmatmul.mubr.f32.gmra.mrb[10].mxu0 %v1794_v5  ;;  %v8540_v5 = vld [vmem:[%s15647_s1 + $0x378] sm:$0xff] }
 0x165   : > { %10034 = vmatprep.mubr.f32.mxu0 %v1795_v6  ;;  %11371 = vmatpush3.bf16.msra.mxu0 %v11368_v2  ;;  %v13207_v2 = vld [vmem:[%s12575_s14 + $0x74] sm:$0xff]  ;;  %v13218_v6 = vld [vmem:[%s12575_s14 + $0x7c] sm:$0xff]  ;;  %v11408_v8 = vpack.c.bf16 %v8540_v5, %v8539_v4  ;;  %v3005_v4 = vld [vmem:[%s12575_s14 + $0x45] sm:$0xff] }
 0x166   : > { %11373 = vmatprep.subr.bf16.mxu0 %v11372_v7 }
 0x168   : > { %10035 = vmatmul.mubr.f32.gmra.mrb[12].mxu0 %v1796_v10  ;;  %v8542_v10 = vld [vmem:[%s15647_s1 + $0x388] sm:$0xff] }
 0x169   : > { %10037 = vmatprep.mubr.f32.mxu0 %v1797_v11  ;;  %11375 = vmatpush3.bf16.msra.mxu0 %v11372_v7  ;;  %v13221_v7 = vld [vmem:[%s12575_s14 + $0x84] sm:$0xff]  ;;  %v13232_v11 = vld [vmem:[%s12575_s14 + $0x8c] sm:$0xff]  ;;  %v11412_v13 = vpack.c.bf16 %v8542_v10, %v8541_v9  ;;  %v3007_v9 = vld [vmem:[%s12575_s14 + $0x55] sm:$0xff] }
 0x16a   : > { %11377 = vmatprep.subr.bf16.mxu0 %v11376_v12 }
 0x16c   : > { %10038 = vmatmul.mubr.f32.gmra.mrb[14].mxu0 %v1798_v15  ;;  %v13243_v15 = vld [vmem:[%s12575_s14 + $0xa4] sm:$0xff] }
 0x16d   : > { %10040 = vmatprep.mubr.f32.mxu0 %v1799_v16  ;;  %11379 = vmatpush3.bf16.msra.mxu0 %v11376_v12  ;;  %v13235_v12 = vld [vmem:[%s12575_s14 + $0x94] sm:$0xff]  ;;  %v13248_v16 = vld [vmem:[%s12575_s14 + $0xac] sm:$0xff] }
 0x16e   : > { %11381 = vmatprep.subr.bf16.mxu0 %v11380_v17 }
 0x170   : > { %10041 = vmatmul.mubr.f32.gmra.mrb[16].mxu0 %v1800_v18  ;;  %v13256_v18 = vld [vmem:[%s12575_s14 + $0xbc] sm:$0xff] }
 0x171   : > { %10043 = vmatprep.mubr.f32.mxu0 %v1801_v19  ;;  %v13259_v19 = vld [vmem:[%s12575_s14 + $0xc4] sm:$0xff] }
 0x174   : > { %10044 = vmatmul.mubr.f32.gmra.mrb[18].mxu0 %v1802_v20  ;;  %v13264_v20 = vld [vmem:[%s12575_s14 + $0xcc] sm:$0xff] }
 0x175   : > { %10046 = vmatprep.mubr.f32.mxu0 %v1803_v21  ;;  %v13267_v21 = vld [vmem:[%s12575_s14 + $0xd4] sm:$0xff] }
 0x178   : > { %10047 = vmatmul.mubr.f32.gmra.mrb[20].mxu0 %v1804_v22  ;;  %v13272_v22 = vld [vmem:[%s12575_s14 + $0xdc] sm:$0xff] }
 0x179   : > { %10049 = vmatprep.mubr.f32.mxu0 %v1805_v23  ;;  %v13275_v23 = vld [vmem:[%s12575_s14 + $0xe4] sm:$0xff] }
 0x17c   : > { %10050 = vmatmul.mubr.f32.gmra.mrb[22].mxu0 %v1806_v24  ;;  %v13280_v24 = vld [vmem:[%s12575_s14 + $0xec] sm:$0xff] }
 0x17d   : > { %10052 = vmatprep.mubr.f32.mxu0 %v1807_v25  ;;  %v13283_v25 = vld [vmem:[%s12575_s14 + $0xf4] sm:$0xff] }
 0x180   : > { %10053 = vmatmul.mubr.f32.gmra.mrb[24].mxu0 %v1808_v26  ;;  %v13288_v26 = vld [vmem:[%s12575_s14 + $0xfc] sm:$0xff] }
 0x181   : > { %10055 = vmatprep.mubr.f32.mxu0 %v1809_v27  ;;  %v13291_v27 = vld [vmem:[%s12575_s14 + $0x104] sm:$0xff] }
 0x184   : > { %10056 = vmatmul.mubr.f32.gmra.mrb[26].mxu0 %v1810_v28  ;;  %v13296_v28 = vld [vmem:[%s12575_s14 + $0x10c] sm:$0xff] }
 0x185   : > { %10058 = vmatprep.mubr.f32.mxu0 %v1811_v29  ;;  %v13299_v29 = vld [vmem:[%s12575_s14 + $0x114] sm:$0xff] }
 0x188   : > { %10059 = vmatmul.mubr.f32.gmra.mrb[28].mxu0 %v1812_v30  ;;  %v13304_v30 = vld [vmem:[%s12575_s14 + $0x11c] sm:$0xff] }
 0x189   : > { %10061 = vmatprep.mubr.f32.mxu0 %v1813_v31  ;;  %v13307_v31 = vld [vmem:[%s12575_s14 + $0x124] sm:$0xff] }
 0x18c   : > { %10062 = vmatmul.mubr.f32.gmra.mrb[30].mxu0 %v1814_v32  ;;  %v13312_v32 = vld [vmem:[%s12575_s14 + $0x12c] sm:$0xff] }
 0x18d   : > { %10064 = vmatprep.mubr.f32.mxu0 %v1815_v33  ;;  %v8543_v33 = vld [vmem:[%s15647_s1 + $0x390] sm:$0xff] }
 0x190   : > { %10065 = vmatmul.mubr.f32.gmra.mrb[32].mxu0 %v1816_v34  ;;  %v8544_v34 = vld [vmem:[%s15647_s1 + $0x398] sm:$0xff] }
 0x191   : > { %10067 = vmatprep.mubr.f32.mxu0 %v1817_v35  ;;  %v11416_v35 = vpack.c.bf16 %v8544_v34, %v8543_v33  ;;  %v8571_v34 = vld [vmem:[%s15647_s1 + $0x470] sm:$0xff] }
 0x194   : > { %10068 = vmatmul.mubr.f32.gmra.mrb[34].mxu0 %v1818_v36  ;;  %v8545_v36 = vld [vmem:[%s15647_s1 + $0x3a0] sm:$0xff] }
 0x195   : > { %10102 = vmatprep.mubr.f32.mxu0 %v2189_v37  ;;  %v8546_v37 = vld [vmem:[%s15647_s1 + $0x3a8] sm:$0xff] }
 0x196   : > { %v11420_v38 = vpack.c.bf16 %v8546_v37, %v8545_v36  ;;  %v8572_v36 = vld [vmem:[%s15647_s1 + $0x478] sm:$0xff]  ;;  %v4728_v37 = vld [vmem:[%s15649_s3 + $0x30] sm:$0xff] }
 0x198   : > { %10103 = vmatmul.mubr.f32.vlgmr.msra.gmra.mrb[0].mxu0 %v2190_v40  ;;  %v8548_v40 = vld [vmem:[%s15647_s1 + $0x3b8] sm:$0xff] }
 0x199   : > { %11383 = vmatpush3.bf16.msra.mxu0 %v11380_v17  ;;  %10105 = vmatprep.mubr.f32.mxu0 %v13138_v41  ;;  %v13251_v17 = vld [vmem:[%s12575_s14 + $0xb4] sm:$0xff] }
 0x19a   : > { %11385 = vmatprep.subr.bf16.mxu0 %v11384_v42 }
 0x19c   : > { %10106 = vmatmul.mubr.f32.gmra.mrb[2].mxu0 %v13148_v45 }
 0x19d   : > { %10108 = vmatprep.mubr.f32.mxu0 %v13151_v46  ;;  %11387 = vmatpush3.bf16.msra.mxu0 %v11384_v42  ;;  %v8549_v42 = vld [vmem:[%s15647_s1 + $0x3c0] sm:$0xff] }
 0x19e   : > { %11389 = vmatprep.subr.bf16.mxu0 %v11388_v47  ;;  %v11428_v44 = vpack.c.bf16 %v8550_v43, %v8549_v42  ;;  %v4730_v43 = vld [vmem:[%s15649_s3 + $0x40] sm:$0xff] }
 0x1a0   : > { %10109 = vmatmul.mubr.f32.gmra.mrb[4].mxu0 %v13162_v50 }
 0x1a1   : > { %10111 = vmatprep.mubr.f32.mxu0 %v13165_v51  ;;  %11391 = vmatpush3.bf16.msra.mxu0 %v11388_v47 }
 0x1a2   : > { %11393 = vmatprep.subr.bf16.mxu0 %v11392_v52 }
 0x1a4   : > { %10112 = vmatmul.mubr.f32.gmra.mrb[6].mxu0 %v13176_v55 }
 0x1a5   : > { %10114 = vmatprep.mubr.f32.mxu0 %v13179_v56  ;;  %11395 = vmatpush3.bf16.msra.mxu0 %v11392_v52  ;;  %v8556_v52 = vld [vmem:[%s15647_s1 + $0x3f8] sm:$0xff] }
 0x1a6   : > { %11397 = vmatprep.subr.bf16.mxu0 %v11396_v57 }
 0x1a8   : > { %10115 = vmatmul.mubr.f32.gmra.mrb[8].mxu0 %v13190_v60 }
 0x1a9   : > { %10117 = vmatprep.mubr.f32.mxu0 %v13193_v61  ;;  %11399 = vmatpush3.bf16.msra.mxu0 %v11396_v57  ;;  %v2629_v57 = vld [vmem:[%s12575_s14 + $0x134] sm:$0xff] }
 0x1aa   : > { %11401 = vmatprep.subr.bf16.mxu0 %v11400_v62 }
 0x1ac   : > { %10118 = vmatmul.mubr.f32.gmra.mrb[10].mxu0 %v13204_v1 }
 0x1ad   : > { %10120 = vmatprep.mubr.f32.mxu0 %v13207_v2  ;;  %11403 = vmatpush3.bf16.msra.mxu0 %v11400_v62  ;;  %v3002_v62 = vld [vmem:[%s12575_s14 + $0x2d] sm:$0xff] }
 0x1ae   : > { %11405 = vmatprep.subr.bf16.mxu0 %v11404_v3 }
 0x1b0   : > { %10121 = vmatmul.mubr.f32.gmra.mrb[12].mxu0 %v13218_v6 }
 0x1b1   : > { %10123 = vmatprep.mubr.f32.mxu0 %v13221_v7  ;;  %11407 = vmatpush3.bf16.msra.mxu0 %v11404_v3  ;;  %v3004_v3 = vld [vmem:[%s12575_s14 + $0x3d] sm:$0xff] }
 0x1b2   : > { %11409 = vmatprep.subr.bf16.mxu0 %v11408_v8 }
 0x1b4   : > { %10124 = vmatmul.mubr.f32.gmra.mrb[14].mxu0 %v13232_v11 }
 0x1b5   : > { %10126 = vmatprep.mubr.f32.mxu0 %v13235_v12  ;;  %11411 = vmatpush3.bf16.msra.mxu0 %v11408_v8  ;;  %v3006_v8 = vld [vmem:[%s12575_s14 + $0x4d] sm:$0xff] }
 0x1b6   : > { %11413 = vmatprep.subr.bf16.mxu0 %v11412_v13 }
 0x1b8   : > { %10127 = vmatmul.mubr.f32.gmra.mrb[16].mxu0 %v13240_v14 }
 0x1b9   : > { %10129 = vmatprep.mubr.f32.mxu0 %v13243_v15 }
 0x1bc   : > { %10130 = vmatmul.mubr.f32.gmra.mrb[18].mxu0 %v13248_v16 }
 0x1bd   : > { %10132 = vmatprep.mubr.f32.mxu0 %v13251_v17 }
 0x1c0   : > { %10133 = vmatmul.mubr.f32.gmra.mrb[20].mxu0 %v13256_v18 }
 0x1c1   : > { %10135 = vmatprep.mubr.f32.mxu0 %v13259_v19 }
 0x1c4   : > { %10136 = vmatmul.mubr.f32.gmra.mrb[22].mxu0 %v13264_v20 }
 0x1c5   : > { %10138 = vmatprep.mubr.f32.mxu0 %v13267_v21 }
 0x1c8   : > { %10139 = vmatmul.mubr.f32.gmra.mrb[24].mxu0 %v13272_v22 }
 0x1c9   : > { %10141 = vmatprep.mubr.f32.mxu0 %v13275_v23 }
 0x1cc   : > { %10142 = vmatmul.mubr.f32.gmra.mrb[26].mxu0 %v13280_v24 }
 0x1cd   : > { %10144 = vmatprep.mubr.f32.mxu0 %v13283_v25 }
 0x1d0   : > { %10145 = vmatmul.mubr.f32.gmra.mrb[28].mxu0 %v13288_v26 }
 0x1d1   : > { %10147 = vmatprep.mubr.f32.mxu0 %v13291_v27 }
 0x1d4   : > { %10148 = vmatmul.mubr.f32.gmra.mrb[30].mxu0 %v13296_v28 }
 0x1d5   : > { %10150 = vmatprep.mubr.f32.mxu0 %v13299_v29 }
 0x1d8   : > { %10151 = vmatmul.mubr.f32.gmra.mrb[32].mxu0 %v13304_v30 }
 0x1d9   : > { %10153 = vmatprep.mubr.f32.mxu0 %v13307_v31 }
 0x1dc   : > { %10154 = vmatmul.mubr.f32.gmra.mrb[34].mxu0 %v13312_v32 }
 0x1dd   : > { %10188 = vmatprep.mubr.f32.mxu0 %v13138_v41  ;;  %v11424_v41 = vpack.c.bf16 %v8548_v40, %v8547_v39  ;;  %v3014_v39 = vld [vmem:[%s12575_s14 + $0x8d] sm:$0xff]  ;;  %v3015_v40 = vld [vmem:[%s12575_s14 + $0x95] sm:$0xff] }
 0x1e0   : > { %10189 = vmatmul.mubr.f32.vlgmr.msra.gmra.mrb[0].mxu0 %v13148_v45  ;;  %v8551_v45 = vld [vmem:[%s15647_s1 + $0x3d0] sm:$0xff] }
 0x1e1   : > { %11415 = vmatpush3.bf16.msra.mxu0 %v11412_v13  ;;  %10191 = vmatprep.mubr.f32.mxu0 %v13151_v46  ;;  %v8552_v46 = vld [vmem:[%s15647_s1 + $0x3d8] sm:$0xff] }
 0x1e2   : > { %11417 = vmatprep.subr.bf16.mxu0 %v11416_v35  ;;  %v11432_v47 = vpack.c.bf16 %v8552_v46, %v8551_v45  ;;  %v3008_v13 = vld [vmem:[%s12575_s14 + $0x5d] sm:$0xff]  ;;  %v3017_v46 = vld [vmem:[%s12575_s14 + $0xa5] sm:$0xff] }
 0x1e3   : > { %v3016_v45 = vld [vmem:[%s12575_s14 + $0x9d] sm:$0xff] }
 0x1e4   : > { %10192 = vmatmul.mubr.f32.gmra.mrb[2].mxu0 %v13162_v50  ;;  %v11436_v50 = vpack.c.bf16 %v8554_v49, %v8553_v48  ;;  %v3018_v48 = vld [vmem:[%s12575_s14 + $0xad] sm:$0xff]  ;;  %v3019_v49 = vld [vmem:[%s12575_s14 + $0xb5] sm:$0xff] }
 0x1e5   : > { %10194 = vmatprep.mubr.f32.mxu0 %v13165_v51  ;;  %11419 = vmatpush3.bf16.msra.mxu0 %v11416_v35  ;;  %v8555_v51 = vld [vmem:[%s15647_s1 + $0x3f0] sm:$0xff] }
 0x1e6   : > { %11421 = vmatprep.subr.bf16.mxu0 %v11420_v38  ;;  %v11440_v53 = vpack.c.bf16 %v8556_v52, %v8555_v51  ;;  %v3021_v51 = vld [vmem:[%s12575_s14 + $0xc5] sm:$0xff]  ;;  %v3022_v52 = vld [vmem:[%s12575_s14 + $0xcd] sm:$0xff] }
 0x1e8   : > { %10195 = vmatmul.mubr.f32.gmra.mrb[4].mxu0 %v13176_v55  ;;  %v8558_v55 = vld [vmem:[%s15647_s1 + $0x408] sm:$0xff] }
 0x1e9   : > { %10197 = vmatprep.mubr.f32.mxu0 %v13179_v56  ;;  %11423 = vmatpush3.bf16.msra.mxu0 %v11420_v38  ;;  %v11444_v56 = vpack.c.bf16 %v8558_v55, %v8557_v54  ;;  %v4729_v38 = vld [vmem:[%s15649_s3 + $0x38] sm:$0xff]  ;;  %v3025_v55 = vld [vmem:[%s12575_s14 + $0xe5] sm:$0xff] }
 0x1ea   : > { %11425 = vmatprep.subr.bf16.mxu0 %v11424_v41  ;;  %v11488_v42 = vpack.c.bf16 %v4729_v38, %v4728_v37  ;;  %v3024_v54 = vld [vmem:[%s12575_s14 + $0xdd] sm:$0xff] }
 0x1eb   : > { %v3441_v37 = vld [vmem:[%s12575_s14 + $0x136] sm:$0xff]  ;;  %v3442_v38 = vld [vmem:[%s12575_s14 + $0x13e] sm:$0xff] }
 0x1ec   : > { %10198 = vmatmul.mubr.f32.gmra.mrb[6].mxu0 %v13190_v60  ;;  %v8559_v60 = vld [vmem:[%s15647_s1 + $0x410] sm:$0xff] }
 0x1ed   : > { %10200 = vmatprep.mubr.f32.mxu0 %v13193_v61  ;;  %11427 = vmatpush3.bf16.msra.mxu0 %v11424_v41  ;;  %v8560_v61 = vld [vmem:[%s15647_s1 + $0x418] sm:$0xff]  ;;  %v11472_v41 = vpack.c.bf16 %v8572_v36, %v8571_v34  ;;  %v3440_v36 = vld [vmem:[%s12575_s14 + $0x12e] sm:$0xff] }
 0x1ee   : > { %11429 = vmatprep.subr.bf16.mxu0 %v11428_v44  ;;  %v11448_v0 = vpack.c.bf16 %v8560_v61, %v8559_v60  ;;  %v3030_v60 = vld [vmem:[%s12575_s14 + $0x10d] sm:$0xff]  ;;  %v3031_v61 = vld [vmem:[%s12575_s14 + $0x115] sm:$0xff]  ;;  %v3438_v34 = vld [vmem:[%s12575_s14 + $0x11e] sm:$0xff] }
 0x1f0   : > { %10201 = vmatmul.mubr.f32.gmra.mrb[8].mxu0 %v13204_v1  ;;  %v8561_v1 = vld [vmem:[%s15647_s1 + $0x420] sm:$0xff] }
 0x1f1   : > { %10203 = vmatprep.mubr.f32.mxu0 %v13207_v2  ;;  %11431 = vmatpush3.bf16.msra.mxu0 %v11428_v44  ;;  %v8562_v2 = vld [vmem:[%s15647_s1 + $0x428] sm:$0xff] }
 0x1f2   : > { %11433 = vmatprep.subr.bf16.mxu0 %v11432_v47  ;;  %v11452_v5 = vpack.c.bf16 %v8562_v2, %v8561_v1  ;;  %v4731_v44 = vld [vmem:[%s15649_s3 + $0x48] sm:$0xff]  ;;  %v3035_v1 = vld [vmem:[%s12575_s14 + $0x135] sm:$0xff]  ;;  %v3036_v2 = vld [vmem:[%s12575_s14 + $0x13d] sm:$0xff] }
 0x1f4   : > { %10204 = vmatmul.mubr.f32.gmra.mrb[10].mxu0 %v13218_v6  ;;  %v8563_v6 = vld [vmem:[%s15647_s1 + $0x430] sm:$0xff] }
 0x1f5   : > { %10206 = vmatprep.mubr.f32.mxu0 %v13221_v7  ;;  %11435 = vmatpush3.bf16.msra.mxu0 %v11432_v47  ;;  %v8564_v7 = vld [vmem:[%s15647_s1 + $0x438] sm:$0xff]  ;;  %v11492_v47 = vpack.c.bf16 %v4731_v44, %v4730_v43  ;;  %v4735_v43 = vld [vmem:[%s15649_s3 + $0x68] sm:$0xff] }
 0x1f6   : > { %11437 = vmatprep.subr.bf16.mxu0 %v11436_v50  ;;  %v11456_v10 = vpack.c.bf16 %v8564_v7, %v8563_v6  ;;  %v3410_v6 = vld [vmem:[%s12575_s14 + $0x3e] sm:$0xff]  ;;  %v3411_v7 = vld [vmem:[%s12575_s14 + $0x46] sm:$0xff] }
 0x1f8   : > { %10207 = vmatmul.mubr.f32.gmra.mrb[12].mxu0 %v13232_v11  ;;  %v8565_v11 = vld [vmem:[%s15647_s1 + $0x440] sm:$0xff] }
 0x1f9   : > { %10209 = vmatprep.mubr.f32.mxu0 %v13235_v12  ;;  %11439 = vmatpush3.bf16.msra.mxu0 %v11436_v50  ;;  %v8566_v12 = vld [vmem:[%s15647_s1 + $0x448] sm:$0xff]  ;;  %v3020_v50 = vld [vmem:[%s12575_s14 + $0xbd] sm:$0xff] }
 0x1fa   : > { %11441 = vmatprep.subr.bf16.mxu0 %v11440_v53 }
 0x1fc   : > { %10210 = vmatmul.mubr.f32.gmra.mrb[14].mxu0 %v13240_v14  ;;  %v3009_v14 = vld [vmem:[%s12575_s14 + $0x65] sm:$0xff] }
 0x1fd   : > { %10212 = vmatprep.mubr.f32.mxu0 %v13243_v15  ;;  %11443 = vmatpush3.bf16.msra.mxu0 %v11440_v53  ;;  %v11460_v15 = vpack.c.bf16 %v8566_v12, %v8565_v11  ;;  %v3023_v53 = vld [vmem:[%s12575_s14 + $0xd5] sm:$0xff]  ;;  %v3415_v11 = vld [vmem:[%s12575_s14 + $0x66] sm:$0xff] }
 0x1fe   : > { %11445 = vmatprep.subr.bf16.mxu0 %v11444_v56  ;;  %v3416_v12 = vld [vmem:[%s12575_s14 + $0x6e] sm:$0xff] }
 0x200   : > { %10213 = vmatmul.mubr.f32.gmra.mrb[16].mxu0 %v13248_v16  ;;  %v8567_v16 = vld [vmem:[%s15647_s1 + $0x450] sm:$0xff] }
 0x201   : > { %10215 = vmatprep.mubr.f32.mxu0 %v13251_v17  ;;  %v8568_v17 = vld [vmem:[%s15647_s1 + $0x458] sm:$0xff] }
 0x204   : > { %10216 = vmatmul.mubr.f32.gmra.mrb[18].mxu0 %v13256_v18  ;;  %v4722_v18 = vld [vmem:[%s15649_s3] sm:$0xff] }
 0x205   : > { %10218 = vmatprep.mubr.f32.mxu0 %v13259_v19  ;;  %v4723_v19 = vld [vmem:[%s15649_s3 + $0x8] sm:$0xff] }
 0x208   : > { %10219 = vmatmul.mubr.f32.gmra.mrb[20].mxu0 %v13264_v20  ;;  %v4724_v20 = vld [vmem:[%s15649_s3 + $0x10] sm:$0xff] }
 0x209   : > { %10221 = vmatprep.mubr.f32.mxu0 %v13267_v21  ;;  %v3010_v21 = vld [vmem:[%s12575_s14 + $0x6d] sm:$0xff] }
 0x20c   : > { %10222 = vmatmul.mubr.f32.gmra.mrb[22].mxu0 %v13272_v22  ;;  %v11476_v22 = vpack.c.bf16 %v4723_v19, %v4722_v18  ;;  %v3422_v18 = vld [vmem:[%s12575_s14 + $0x9e] sm:$0xff]  ;;  %v3423_v19 = vld [vmem:[%s12575_s14 + $0xa6] sm:$0xff] }
 0x20d   : > { %10224 = vmatprep.mubr.f32.mxu0 %v13275_v23  ;;  %v4725_v23 = vld [vmem:[%s15649_s3 + $0x18] sm:$0xff] }
 0x20e   : > { %11477 = vmatprep.subr.bf16.mxu1 %v11476_v22 }
 0x20f   : > { %11479 = vmatpush3.bf16.msra.mxu1 %v11476_v22  ;;  %v3426_v22 = vld [vmem:[%s12575_s14 + $0xbe] sm:$0xff] }
 0x210   : > { %10225 = vmatmul.mubr.f32.gmra.mrb[24].mxu0 %v13280_v24  ;;  %v3011_v24 = vld [vmem:[%s12575_s14 + $0x75] sm:$0xff] }
 0x211   : > { %10227 = vmatprep.mubr.f32.mxu0 %v13283_v25  ;;  %v11464_v25 = vpack.c.bf16 %v8568_v17, %v8567_v16  ;;  %v3420_v16 = vld [vmem:[%s12575_s14 + $0x8e] sm:$0xff]  ;;  %v3421_v17 = vld [vmem:[%s12575_s14 + $0x96] sm:$0xff] }
 0x214   : > { %10228 = vmatmul.mubr.f32.gmra.mrb[26].mxu0 %v13288_v26  ;;  %v8569_v26 = vld [vmem:[%s15647_s1 + $0x460] sm:$0xff] }
 0x215   : > { %10230 = vmatprep.mubr.f32.mxu0 %v13291_v27  ;;  %v11480_v27 = vpack.c.bf16 %v4725_v23, %v4724_v20  ;;  %v3424_v20 = vld [vmem:[%s12575_s14 + $0xae] sm:$0xff]  ;;  %v3427_v23 = vld [vmem:[%s12575_s14 + $0xc6] sm:$0xff] }
 0x217   : > { %11481 = vmatprep.subr.bf16.mxu1 %v11480_v27 }
 0x218   : > { %10231 = vmatmul.mubr.f32.gmra.mrb[28].mxu0 %v13296_v28  ;;  %v8570_v28 = vld [vmem:[%s15647_s1 + $0x468] sm:$0xff]  ;;  %11483 = vmatpush3.bf16.msra.mxu1 %v11480_v27 }
 0x219   : > { %10233 = vmatprep.mubr.f32.mxu0 %v13299_v29  ;;  %v4726_v29 = vld [vmem:[%s15649_s3 + $0x20] sm:$0xff]  ;;  %v11468_v33 = vpack.c.bf16 %v8570_v28, %v8569_v26  ;;  %v3432_v28 = vld [vmem:[%s12575_s14 + $0xee] sm:$0xff] }
 0x21a   : > { %v3430_v26 = vld [vmem:[%s12575_s14 + $0xde] sm:$0xff]  ;;  %v3431_v27 = vld [vmem:[%s12575_s14 + $0xe6] sm:$0xff] }
 0x21c   : > { %10234 = vmatmul.mubr.f32.gmra.mrb[30].mxu0 %v13304_v30  ;;  %v4727_v30 = vld [vmem:[%s15649_s3 + $0x28] sm:$0xff] }
 0x21d   : > { %10236 = vmatprep.mubr.f32.mxu0 %v13307_v31  ;;  %v3012_v31 = vld [vmem:[%s12575_s14 + $0x7d] sm:$0xff]  ;;  %v11484_v35 = vpack.c.bf16 %v4727_v30, %v4726_v29 }
 0x21e   : > { %v3433_v29 = vld [vmem:[%s12575_s14 + $0xf6] sm:$0xff]  ;;  %v3434_v30 = vld [vmem:[%s12575_s14 + $0xfe] sm:$0xff] }
 0x21f   : > { %11485 = vmatprep.subr.bf16.mxu1 %v11484_v35 }
 0x220   : > { %10237 = vmatmul.mubr.f32.gmra.mrb[32].mxu0 %v13312_v32  ;;  %v3013_v32 = vld [vmem:[%s12575_s14 + $0x85] sm:$0xff]  ;;  %11487 = vmatpush3.bf16.msra.mxu1 %v11484_v35 }
 0x221   : > { %10239 = vmatprep.mubr.f32.mxu0 %v2629_v57  ;;  %11489 = vmatprep.subr.bf16.mxu1 %v11488_v42  ;;  %v3027_v57 = vld [vmem:[%s12575_s14 + $0xf5] sm:$0xff]  ;;  %v3439_v35 = vld [vmem:[%s12575_s14 + $0x126] sm:$0xff] }
 0x224   : > { %10240 = vmatmul.mubr.f32.gmra.mrb[34].mxu0 %v2630_v58  ;;  %11491 = vmatpush3.bf16.msra.mxu1 %v11488_v42  ;;  %v3028_v58 = vld [vmem:[%s12575_s14 + $0xfd] sm:$0xff] }
 0x225   : > { %10274 = vmatprep.mubr.f32.mxu0 %v3001_v59  ;;  %11493 = vmatprep.subr.bf16.mxu1 %v11492_v47  ;;  %v3029_v59 = vld [vmem:[%s12575_s14 + $0x105] sm:$0xff] }
 0x226   : > { %v4734_v42 = vld [vmem:[%s15649_s3 + $0x60] sm:$0xff] }
 0x227   : > { %v11500_v44 = vpack.c.bf16 %v4735_v43, %v4734_v42  ;;  %v8588_v43 = vld [vmem:[%s15649_s3 + $0xf0] sm:$0xff] }
 0x228   : > { %10275 = vmatmul.mubr.f32.vlgmr.msra.gmra.mrb[0].mxu0 %v3002_v62  ;;  %11495 = vmatpush3.bf16.msra.mxu1 %v11492_v47  ;;  %v3032_v62 = vld [vmem:[%s12575_s14 + $0x11d] sm:$0xff] }
 0x229   : > { %11447 = vmatpush3.bf16.msra.mxu0 %v11444_v56  ;;  %10277 = vmatprep.mubr.f32.mxu0 %v3003_v63  ;;  %v3026_v56 = vld [vmem:[%s12575_s14 + $0xed] sm:$0xff]  ;;  %v3033_v63 = vld [vmem:[%s12575_s14 + $0x125] sm:$0xff] }
 0x22a   : > { %11449 = vmatprep.subr.bf16.mxu0 %v11448_v0 }
 0x22c   : > { %10278 = vmatmul.mubr.f32.gmra.mrb[2].mxu0 %v3004_v3  ;;  %v3407_v3 = vld [vmem:[%s12575_s14 + $0x26] sm:$0xff] }
 0x22d   : > { %10280 = vmatprep.mubr.f32.mxu0 %v3005_v4  ;;  %11451 = vmatpush3.bf16.msra.mxu0 %v11448_v0  ;;  %v3034_v0 = vld [vmem:[%s12575_s14 + $0x12d] sm:$0xff] }
 0x22e   : > { %11453 = vmatprep.subr.bf16.mxu0 %v11452_v5  ;;  %v3408_v4 = vld [vmem:[%s12575_s14 + $0x2e] sm:$0xff] }
 0x230   : > { %10281 = vmatmul.mubr.f32.gmra.mrb[4].mxu0 %v3006_v8  ;;  %v3412_v8 = vld [vmem:[%s12575_s14 + $0x4e] sm:$0xff] }
 0x231   : > { %10283 = vmatprep.mubr.f32.mxu0 %v3007_v9  ;;  %11455 = vmatpush3.bf16.msra.mxu0 %v11452_v5  ;;  %v3409_v5 = vld [vmem:[%s12575_s14 + $0x36] sm:$0xff] }
 0x232   : > { %11457 = vmatprep.subr.bf16.mxu0 %v11456_v10  ;;  %v3413_v9 = vld [vmem:[%s12575_s14 + $0x56] sm:$0xff] }
 0x234   : > { %10284 = vmatmul.mubr.f32.gmra.mrb[6].mxu0 %v3008_v13  ;;  %v3417_v13 = vld [vmem:[%s12575_s14 + $0x76] sm:$0xff] }
 0x235   : > { %10286 = vmatprep.mubr.f32.mxu0 %v3009_v14  ;;  %11459 = vmatpush3.bf16.msra.mxu0 %v11456_v10  ;;  %v3414_v10 = vld [vmem:[%s12575_s14 + $0x5e] sm:$0xff] }
 0x236   : > { %11461 = vmatprep.subr.bf16.mxu0 %v11460_v15  ;;  %v3418_v14 = vld [vmem:[%s12575_s14 + $0x7e] sm:$0xff] }
 0x238   : > { %10287 = vmatmul.mubr.f32.gmra.mrb[8].mxu0 %v3010_v21  ;;  %v3425_v21 = vld [vmem:[%s12575_s14 + $0xb6] sm:$0xff] }
 0x239   : > { %10289 = vmatprep.mubr.f32.mxu0 %v3011_v24  ;;  %11463 = vmatpush3.bf16.msra.mxu0 %v11460_v15  ;;  %v3419_v15 = vld [vmem:[%s12575_s14 + $0x86] sm:$0xff]  ;;  %v3428_v24 = vld [vmem:[%s12575_s14 + $0xce] sm:$0xff] }
 0x23a   : > { %11465 = vmatprep.subr.bf16.mxu0 %v11464_v25 }
 0x23c   : > { %10290 = vmatmul.mubr.f32.gmra.mrb[10].mxu0 %v3012_v31  ;;  %v3435_v31 = vld [vmem:[%s12575_s14 + $0x106] sm:$0xff] }
 0x23d   : > { %10292 = vmatprep.mubr.f32.mxu0 %v3013_v32  ;;  %11467 = vmatpush3.bf16.msra.mxu0 %v11464_v25  ;;  %v3429_v25 = vld [vmem:[%s12575_s14 + $0xd6] sm:$0xff]  ;;  %v3436_v32 = vld [vmem:[%s12575_s14 + $0x10e] sm:$0xff] }
 0x23e   : > { %11469 = vmatprep.subr.bf16.mxu0 %v11468_v33 }
 0x240   : > { %10293 = vmatmul.mubr.f32.gmra.mrb[12].mxu0 %v3014_v39  ;;  %v4732_v39 = vld [vmem:[%s15649_s3 + $0x50] sm:$0xff] }
 0x241   : > { %10295 = vmatprep.mubr.f32.mxu0 %v3015_v40  ;;  %11471 = vmatpush3.bf16.msra.mxu0 %v11468_v33  ;;  %v3437_v33 = vld [vmem:[%s12575_s14 + $0x116] sm:$0xff] }
 0x242   : > { %11473 = vmatprep.subr.bf16.mxu0 %v11472_v41  ;;  %v4733_v40 = vld [vmem:[%s15649_s3 + $0x58] sm:$0xff] }
 0x244   : > { %10296 = vmatmul.mubr.f32.gmra.mrb[14].mxu0 %v3016_v45  ;;  %v4736_v45 = vld [vmem:[%s15649_s3 + $0x70] sm:$0xff] }
 0x245   : > { %10298 = vmatprep.mubr.f32.mxu0 %v3017_v46  ;;  %11475 = vmatpush3.bf16.msra.mxu0 %v11472_v41  ;;  %v11496_v41 = vpack.c.bf16 %v4733_v40, %v4732_v39  ;;  %v4737_v46 = vld [vmem:[%s15649_s3 + $0x78] sm:$0xff] }
 0x246   : > { %v11504_v47 = vpack.c.bf16 %v4737_v46, %v4736_v45  ;;  %v8589_v45 = vld [vmem:[%s15649_s3 + $0xf8] sm:$0xff]  ;;  %v8590_v46 = vld [vmem:[%s15649_s3 + $0x100] sm:$0xff] }
 0x247   : > { %11497 = vmatprep.subr.bf16.mxu1 %v11496_v41 }
 0x248   : > { %10299 = vmatmul.mubr.f32.gmra.mrb[16].mxu0 %v3018_v48  ;;  %11499 = vmatpush3.bf16.msra.mxu1 %v11496_v41  ;;  %v12506_v48 = vmov 0.0  }
 0x249   : > { %10301 = vmatprep.mubr.f32.mxu0 %v3019_v49  ;;  %11501 = vmatprep.subr.bf16.mxu1 %v11500_v44  ;;  %4642 = vst [vmem:[#allocation3] sm:$0xff] %v12506_v48  ;;  %4643 = vst [vmem:[#allocation3 + $0x8] sm:$0xff] %v12506_v48  ;;  %v8574_v49 = vld [vmem:[%s15649_s3 + $0x80] sm:$0xff] }
 0x24a   : > { %10446 = vmatprep.mubr.f32.mxu1 %v12506_v48  ;;  %4644 = vst [vmem:[#allocation3 + $0x10] sm:$0x7] %v12506_v48  ;;  %4681 = vst [vmem:[#allocation3 + $0x133] sm:$0xff] %v12506_v48 }
 0x24b   : > { %4682 = vst [vmem:[#allocation3 + $0x13b] sm:$0xff] %v12506_v48  ;;  %4683 = vst [vmem:[#allocation3 + $0x143] sm:$0xff] %v12506_v48 }
 0x24c   : > { %10302 = vmatmul.mubr.f32.gmra.mrb[18].mxu0 %v3020_v50  ;;  %11503 = vmatpush3.bf16.msra.mxu1 %v11500_v44  ;;  %v8575_v50 = vld [vmem:[%s15649_s3 + $0x88] sm:$0xff] }
 0x24d   : > { %10304 = vmatprep.mubr.f32.mxu0 %v3021_v51  ;;  %11505 = vmatprep.subr.bf16.mxu1 %v11504_v47  ;;  %v11508_v51 = vpack.c.bf16 %v8575_v50, %v8574_v49 }
 0x250   : > { %10305 = vmatmul.mubr.f32.gmra.mrb[20].mxu0 %v3022_v52  ;;  %11507 = vmatpush3.bf16.msra.mxu1 %v11504_v47  ;;  %v8576_v52 = vld [vmem:[%s15649_s3 + $0x90] sm:$0xff]  ;;  %v8591_v47 = vld [vmem:[%s15649_s3 + $0x108] sm:$0xff] }
 0x251   : > { %10307 = vmatprep.mubr.f32.mxu0 %v3023_v53  ;;  %11509 = vmatprep.subr.bf16.mxu1 %v11508_v51  ;;  %v8577_v53 = vld [vmem:[%s15649_s3 + $0x98] sm:$0xff] }
 0x253   : > { %10447 = vmatmul.mubr.f32.vlgmr.msra.gmra.mrb[0].mxu1 %v12506_v48 }
 0x254   : > { %10308 = vmatmul.mubr.f32.gmra.mrb[22].mxu0 %v3024_v54  ;;  %11511 = vmatpush3.bf16.msra.mxu1 %v11508_v51  ;;  %v11512_v54 = vpack.c.bf16 %v8577_v53, %v8576_v52 }
 0x255   : > { %10310 = vmatprep.mubr.f32.mxu0 %v3025_v55  ;;  %v8578_v55 = vld [vmem:[%s15649_s3 + $0xa0] sm:$0xff] }
 0x256   : > { %11513 = vmatprep.subr.bf16.mxu1 %v11512_v54 }
 0x258   : > { %10311 = vmatmul.mubr.f32.gmra.mrb[24].mxu0 %v3026_v56  ;;  %11515 = vmatpush3.bf16.msra.mxu1 %v11512_v54  ;;  %v8579_v56 = vld [vmem:[%s15649_s3 + $0xa8] sm:$0xff] }
 0x259   : > { %10313 = vmatprep.mubr.f32.mxu0 %v3027_v57  ;;  %v11516_v57 = vpack.c.bf16 %v8579_v56, %v8578_v55  ;;  %v11536_v55 = vpack.c.bf16 %v8589_v45, %v8588_v43  ;;  %v13693_v56 = vpack.c.bf16 %v8591_v47, %v8590_v46 }
 0x25b   : > { %11517 = vmatprep.subr.bf16.mxu1 %v11516_v57  ;;  %15667 = vst [vmem:[#allocation5_spill] sm:$0xff] %v13693_v56 }
 0x25c   : > { %10314 = vmatmul.mubr.f32.gmra.mrb[26].mxu0 %v3028_v58  ;;  %11519 = vmatpush3.bf16.msra.mxu1 %v11516_v57  ;;  %v8580_v58 = vld [vmem:[%s15649_s3 + $0xb0] sm:$0xff] }
 0x25d   : > { %10316 = vmatprep.mubr.f32.mxu0 %v3029_v59  ;;  %v8581_v59 = vld [vmem:[%s15649_s3 + $0xb8] sm:$0xff] }
 0x260   : > { %10317 = vmatmul.mubr.f32.gmra.mrb[28].mxu0 %v3030_v60  ;;  %v11520_v60 = vpack.c.bf16 %v8581_v59, %v8580_v58 }
 0x261   : > { %10319 = vmatprep.mubr.f32.mxu0 %v3031_v61  ;;  %v3813_v61 = vlaneseq }
 0x262   : > { %11521 = vmatprep.subr.bf16.mxu1 %v11520_v60 }
 0x263   : > { %11523 = vmatpush3.bf16.msra.mxu1 %v11520_v60 }
 0x264   : > { %10320 = vmatmul.mubr.f32.gmra.mrb[30].mxu0 %v3032_v62  ;;  %v8582_v62 = vld [vmem:[%s15649_s3 + $0xc0] sm:$0xff] }
 0x265   : > { %10322 = vmatprep.mubr.f32.mxu0 %v3033_v63  ;;  %v8583_v63 = vld [vmem:[%s15649_s3 + $0xc8] sm:$0xff] }
 0x268   : > { %10323 = vmatmul.mubr.f32.gmra.mrb[32].mxu0 %v3034_v0  ;;  %v11524_v0 = vpack.c.bf16 %v8583_v63, %v8582_v62 }
 0x269   : > { %10325 = vmatprep.mubr.f32.mxu0 %v3035_v1  ;;  %v13591_v1 = vshrl.u32 %v3813_v61, 7 }
 0x26a   : > { %11525 = vmatprep.subr.bf16.mxu1 %v11524_v0 }
 0x26b   : > { %11527 = vmatpush3.bf16.msra.mxu1 %v11524_v0  ;;  %v13678_v50 = vadd.s32 72, %v13591_v1  ;;  %v13686_v52 = vadd.s32 64, %v13591_v1  ;;  %v13691_v54 = vadd.s32 88, %v13591_v1  ;;  %v13700_v59 = vadd.s32 80, %v13591_v1 }
 0x26c   : > { %10326 = vmatmul.mubr.f32.gmra.mrb[34].mxu0 %v3036_v2  ;;  %v3815_v2 = vadd.s32 8, %v13591_v1  ;;  %v13838_v45 = vadd.s32 136, %v13591_v1  ;;  %v13843_v47 = vadd.s32 128, %v13591_v1 }
 0x26d   : > { %10360 = vmatprep.mubr.f32.mxu0 %v3407_v3  ;;  %v3817_v3 = vadd.s32 24, %v13591_v1  ;;  %v13706_v62 = vmul.u32.u64.low 3817748708, %v13678_v50  ;;  %v13707_v63 = vmul.u32.u64.high 3817748708, %v13678_v50, %v13706_v62 }
 0x270   : > { %10361 = vmatmul.mubr.f32.vlgmr.msra.gmra.mrb[0].mxu0 %v3408_v4  ;;  %v8584_v4 = vld [vmem:[%s15649_s3 + $0xd0] sm:$0xff] }
 0x271   : > { %10363 = vmatprep.mubr.f32.mxu0 %v3409_v5  ;;  %v8585_v5 = vld [vmem:[%s15649_s3 + $0xd8] sm:$0xff] }
 0x274   : > { %10364 = vmatmul.mubr.f32.gmra.mrb[2].mxu0 %v3410_v6 }
 0x275   : > { %10366 = vmatprep.mubr.f32.mxu0 %v3411_v7  ;;  %v13601_v6 = vmul.u32.u64.low 3817748708, %v3815_v2  ;;  %v13602_v7 = vmul.u32.u64.high 3817748708, %v3815_v2, %v13601_v6 }
 0x278   : > { %10367 = vmatmul.mubr.f32.gmra.mrb[4].mxu0 %v3412_v8 }
 0x279   : > { %10369 = vmatprep.mubr.f32.mxu0 %v3413_v9  ;;  %v13605_v8 = vmul.u32.u64.low 3817748708, %v13591_v1  ;;  %v13606_v9 = vmul.u32.u64.high 3817748708, %v13591_v1, %v13605_v8 }
 0x27a   : > { %v13731_v8 = vadd.s32 96, %v13591_v1 }
 0x27c   : > { %10370 = vmatmul.mubr.f32.gmra.mrb[6].mxu0 %v3414_v10 }
 0x27d   : > { %10372 = vmatprep.mubr.f32.mxu0 %v3415_v11  ;;  %v13608_v10 = vmul.u32.u64.low 3817748708, %v3817_v3  ;;  %v13609_v11 = vmul.u32.u64.high 3817748708, %v3817_v3, %v13608_v10 }
 0x280   : > { %10373 = vmatmul.mubr.f32.gmra.mrb[8].mxu0 %v3416_v12  ;;  %v11528_v12 = vpack.c.bf16 %v8585_v5, %v8584_v4  ;;  %v13715_v4 = vadd.s32 104, %v13591_v1 }
 0x281   : > { %10375 = vmatprep.mubr.f32.mxu0 %v3417_v13  ;;  %v3816_v13 = vadd.s32 16, %v13591_v1 }
 0x282   : > { %11529 = vmatprep.subr.bf16.mxu1 %v11528_v12 }
 0x283   : > { %11531 = vmatpush3.bf16.msra.mxu1 %v11528_v12 }
 0x284   : > { %10376 = vmatmul.mubr.f32.gmra.mrb[10].mxu0 %v3418_v14  ;;  %v3819_v14 = vadd.s32 40, %v13591_v1 }
 0x285   : > { %10378 = vmatprep.mubr.f32.mxu0 %v3419_v15 }
 0x288   : > { %10379 = vmatmul.mubr.f32.gmra.mrb[12].mxu0 %v3420_v16  ;;  %v13613_v15 = vmul.u32.u64.low 3817748708, %v3816_v13  ;;  %v13614_v16 = vmul.u32.u64.high 3817748708, %v3816_v13, %v13613_v15 }
 0x289   : > { %10381 = vmatprep.mubr.f32.mxu0 %v3421_v17  ;;  %v3867_v17 = vshrl.u32 %v13602_v7, 4  ;;  %v13727_v6 = vmul.u32.u64.low 3817748708, %v13691_v54  ;;  %v13728_v7 = vmul.u32.u64.high 3817748708, %v13691_v54, %v13727_v6  ;;  %v13761_v15 = vadd.s32 120, %v13591_v1 }
 0x28c   : > { %10382 = vmatmul.mubr.f32.gmra.mrb[14].mxu0 %v3422_v18  ;;  %v13618_v18 = vadd.s32 32, %v13591_v1 }
 0x28d   : > { %10384 = vmatprep.mubr.f32.mxu0 %v3423_v19  ;;  %v3856_v19 = vshrl.u32 %v13606_v9, 4  ;;  %v14082_v9 = vadd.s32 176, %v13591_v1 }
 0x290   : > { %10385 = vmatmul.mubr.f32.gmra.mrb[16].mxu0 %v3424_v20 }
 0x291   : > { %10387 = vmatprep.mubr.f32.mxu0 %v3425_v21  ;;  %v13621_v20 = vmul.u32.u64.low 3817748708, %v3819_v14  ;;  %v13622_v21 = vmul.u32.u64.high 3817748708, %v3819_v14, %v13621_v20 }
 0x294   : > { %10388 = vmatmul.mubr.f32.gmra.mrb[18].mxu0 %v3426_v22  ;;  %v3889_v22 = vshrl.u32 %v13609_v11, 4  ;;  %v13747_v11 = vmul.u32.u64.low 3817748708, %v13700_v59  ;;  %v13748_v12 = vmul.u32.u64.high 3817748708, %v13700_v59, %v13747_v11 }
 0x295   : > { %10390 = vmatprep.mubr.f32.mxu0 %v3427_v23  ;;  %v8586_v23 = vld [vmem:[%s15649_s3 + $0xe0] sm:$0xff] }
 0x296   : > { %v3966_v43 = vshrl.u32 %v13748_v12, 4  ;;  %v15682_v12 = vmov 0 }
 0x298   : > { %10391 = vmatmul.mubr.f32.gmra.mrb[20].mxu0 %v3428_v24  ;;  %v8587_v24 = vld [vmem:[%s15649_s3 + $0xe8] sm:$0xff]  ;;  %v3967_v6 = vmul.u32 18, %v3966_v43 }
 0x299   : > { %10393 = vmatprep.mubr.f32.mxu0 %v3429_v25  ;;  %v3868_v25 = vmul.u32 18, %v3867_v17 }
 0x29c   : > { %10394 = vmatmul.mubr.f32.gmra.mrb[22].mxu0 %v3430_v26 }
 0x29d   : > { %10396 = vmatprep.mubr.f32.mxu0 %v3431_v27  ;;  %v13632_v26 = vmul.u32.u64.low 3817748708, %v13618_v18  ;;  %v13633_v27 = vmul.u32.u64.high 3817748708, %v13618_v18, %v13632_v26 }
 0x29e   : > { %v15699_v26 = vmov 0 }
 0x29f   : > { %v3900_v44 = vshrl.u32 %v13633_v27, 4  ;;  %v15676_v27 = vmov 0 }
 0x2a0   : > { %10397 = vmatmul.mubr.f32.gmra.mrb[24].mxu0 %v3432_v28  ;;  %v3857_v28 = vmul.u32 18, %v3856_v19  ;;  %v13767_v19 = vmul.u32.u64.low 3817748708, %v13715_v4  ;;  %v13768_v20 = vmul.u32.u64.high 3817748708, %v13715_v4, %v13767_v19 }
 0x2a1   : > { %10399 = vmatprep.mubr.f32.mxu0 %v3433_v29  ;;  %v13636_v29 = vadd.s32 56, %v13591_v1  ;;  %v3901_v58 = vmul.u32 18, %v3900_v44 }
 0x2a4   : > { %10400 = vmatmul.mubr.f32.gmra.mrb[26].mxu0 %v3434_v30  ;;  %v3890_v30 = vmul.u32 18, %v3889_v22 }
 0x2a5   : > { %10402 = vmatprep.mubr.f32.mxu0 %v3435_v31  ;;  %v13639_v31 = vadd.s32 48, %v13591_v1 }
 0x2a6   : > { %v13652_v39 = vsub.s32 %v3817_v3, %v3890_v30 }
 0x2a7   : > { %v13655_v40 = vmul.u32.u64.low 3817748708, %v13639_v31  ;;  %v13656_v41 = vmul.u32.u64.high 3817748708, %v13639_v31, %v13655_v40 }
 0x2a8   : > { %10403 = vmatmul.mubr.f32.gmra.mrb[28].mxu0 %v3436_v32  ;;  %v11532_v32 = vpack.c.bf16 %v8587_v24, %v8586_v23  ;;  %vm4249_vm4 = vcmp.ne.s32.totalorder %v13652_v39, 0  ;;  %vm4285_vm5 = vcmp.lt.s32.totalorder %v13652_v39, 0  ;;  %v13697_v57 = vadd.s32 18, %v13652_v39 }
 0x2a9   : > { %10405 = vmatprep.mubr.f32.mxu0 %v3437_v33  ;;  %v3878_v33 = vshrl.u32 %v13614_v16, 4  ;;  %v3922_v0 = vshrl.u32 %v13656_v41, 4  ;;  %vm13754_vm10 = vmand %vm4285_vm5, %vm4249_vm4  ;;  %v13764_v16 = vsub.s32 %v13618_v18, %v3901_v58  ;;  %v15678_v58 = vmov 0 }
 0x2aa   : > { %11533 = vmatprep.subr.bf16.mxu1 %v11532_v32  ;;  %v13780_v23 = vmul.u32.u64.low 3817748708, %v13731_v8  ;;  %v13781_v24 = vmul.u32.u64.high 3817748708, %v13731_v8, %v13780_v23  ;;  %v14028_v18 = vadd.s32 184, %v13591_v1 }
 0x2ab   : > { %11535 = vmatpush3.bf16.msra.mxu1 %v11532_v32  ;;  %v3879_v42 = vmul.u32 18, %v3878_v33  ;;  %v3923_v17 = vmul.u32 18, %v3922_v0  ;;  %v3955_v32 = vshrl.u32 %v13707_v63, 4  ;;  %vm4250_vm15 = vcmp.ne.s32.totalorder %v13764_v16, 0 }
 0x2ac   : > { %10406 = vmatmul.mubr.f32.gmra.mrb[30].mxu0 %v3438_v34  ;;  %v13642_v34 = vsub.s32 %v3815_v2, %v3868_v25  ;;  %11537 = vmatprep.subr.bf16.mxu1 %v11536_v55  ;;  %v13711_v2 = vmul.u32.u64.low 3817748708, %v13686_v52  ;;  %v13712_v3 = vmul.u32.u64.high 3817748708, %v13686_v52, %v13711_v2  ;;  %v13829_v41 = vadd.s32 18, %v13764_v16 }
 0x2ad   : > { %10408 = vmatprep.mubr.f32.mxu0 %v3439_v35  ;;  %v13645_v35 = vsub.s32 %v13591_v1, %v3857_v28  ;;  %v13688_v53 = vsub.s32 %v3816_v13, %v3879_v42  ;;  %v13804_v28 = vadd.s32 112, %v13591_v1  ;;  %v3977_v42 = vshrl.u32 %v13728_v7, 4 }
 0x2ae   : > { %vm4247_vm0 = vcmp.ne.s32.totalorder %v13642_v34, 0  ;;  %vm4283_vm1 = vcmp.lt.s32.totalorder %v13642_v34, 0  ;;  %v13674_v48 = vadd.s32 18, %v13642_v34  ;;  %v3944_v40 = vshrl.u32 %v13712_v3, 4 }
 0x2af   : > { %vm4246_vm2 = vcmp.ne.s32.totalorder %v13645_v35, 0  ;;  %vm4282_vm3 = vcmp.lt.s32.totalorder %v13645_v35, 0  ;;  %v13682_v51 = vadd.s32 18, %v13645_v35  ;;  %11539 = vmatpush3.bf16.msra.mxu1 %v11536_v55  ;;  %vm13721_vm6 = vmand %vm4283_vm1, %vm4247_vm0  ;;  %vm4248_vm7 = vcmp.ne.s32.totalorder %v13688_v53, 0 }
 0x2b0   : > { %10409 = vmatmul.mubr.f32.gmra.mrb[32].mxu0 %v3440_v36  ;;  %v3911_v36 = vshrl.u32 %v13622_v21, 4  ;;  %11541 = vmatprep.subr.bf16.mxu1 %v13693_v56  ;;  %vm13738_vm8 = vmand %vm4282_vm3, %vm4246_vm2  ;;  %vm4284_vm9 = vcmp.lt.s32.totalorder %v13688_v53, 0  ;;  %v13744_v10 = vadd.s32 18, %v13688_v53  ;;  %vm4286_vm0 = vcmp.lt.s32.totalorder %v13764_v16, 0 }
 0x2b1   : > { %10411 = vmatprep.mubr.f32.mxu0 %v3441_v37  ;;  %vm13772_vm13 = vmand %vm4284_vm9, %vm4248_vm7  ;;  %v3956_v46 = vmul.u32 18, %v3955_v32  ;;  %v3999_v55 = vshrl.u32 %v13768_v20, 4  ;;  %v3978_v62 = vmul.u32 18, %v3977_v42  ;;  %v3988_v63 = vshrl.u32 %v13781_v24, 4 }
 0x2b2   : > { %v3912_v49 = vmul.u32 18, %v3911_v36  ;;  %v13811_v33 = vmul.u32.u64.low 3817748708, %v13761_v15  ;;  %v13812_v36 = vmul.u32.u64.high 3817748708, %v13761_v15, %v13811_v33  ;;  %vm13852_vm5 = vmand %vm4286_vm0, %vm4250_vm15  ;;  %v13861_v0 = vadd.s32 152, %v13591_v1 }
 0x2b3   : > { %v15679_v58 = vsel %vm13852_vm5, 4294967295, %v15678_v58  ;;  %v15680_v2 = vmov 0  ;;  %v13871_v7 = vmul.u32.u64.low 3817748708, %v13838_v45  ;;  %v13872_v11 = vmul.u32.u64.high 3817748708, %v13838_v45, %v13871_v7 }
 0x2b4   : > { %10412 = vmatmul.mubr.f32.gmra.mrb[34].mxu0 %v3442_v38  ;;  %v13649_v37 = vmul.u32.u64.low 3817748708, %v13636_v29  ;;  %v13650_v38 = vmul.u32.u64.high 3817748708, %v13636_v29, %v13649_v37  ;;  %v13702_v60 = vsub.s32 %v3819_v14, %v3912_v49  ;;  %v3945_v49 = vmul.u32 18, %v3944_v40 }
 0x2b5   : > { %v13883_v19 = vmul.u32.u64.low 3817748708, %v13843_v47  ;;  %v13884_v20 = vmul.u32.u64.high 3817748708, %v13843_v47, %v13883_v19  ;;  %v4000_v32 = vmul.u32 18, %v3999_v55  ;;  %v13894_v33 = vadd.s32 144, %v13591_v1 }
 0x2b6   : > { %v3933_v61 = vshrl.u32 %v13650_v38, 4  ;;  %vm4251_vm11 = vcmp.ne.s32.totalorder %v13702_v60, 0  ;;  %vm4287_vm12 = vcmp.lt.s32.totalorder %v13702_v60, 0  ;;  %v13777_v22 = vadd.s32 18, %v13702_v60 }
 0x2b7   : > { %vm13799_vm14 = vmand %vm4287_vm12, %vm4251_vm11  ;;  %v13820_v38 = vsub.s32 %v13639_v31, %v3923_v17  ;;  %v13834_v44 = vmul.u32.u64.low 3817748708, %v13804_v28  ;;  %v13835_v31 = vmul.u32.u64.high 3817748708, %v13804_v28, %v13834_v44  ;;  %v4021_v17 = vshrl.u32 %v13812_v36, 4 }
 0x2b8   : > { %v3934_v14 = vmul.u32 18, %v3933_v61  ;;  %v15677_v27 = vsel %vm13799_vm14, 4294967295, %v15676_v27  ;;  %v13891_v24 = vsub.s32 %v13686_v52, %v3945_v49  ;;  %v3989_v36 = vmul.u32 18, %v3988_v63 }
 0x2b9   : > { %vm4252_vm3 = vcmp.ne.s32.totalorder %v13820_v38, 0  ;;  %vm4288_vm4 = vcmp.lt.s32.totalorder %v13820_v38, 0  ;;  %v13868_v3 = vadd.s32 18, %v13820_v38  ;;  %v13912_v44 = vsub.s32 %v13700_v59, %v3967_v6 }
 0x2ba   : > { %v13807_v30 = vsub.s32 %v13636_v29, %v3934_v14  ;;  %vm13874_vm9 = vmand %vm4288_vm4, %vm4252_vm3  ;;  %v13879_v14 = vsub.s32 %v13678_v50, %v3956_v46  ;;  %v13897_v50 = vsub.s32 %v13691_v54, %v3978_v62  ;;  %v4010_v54 = vshrl.u32 %v13835_v31, 4 }
 0x2bb   : > { %v15683_v12 = vsel %vm13874_vm9, 4294967295, %v15682_v12  ;;  %v13900_v40 = vmul.u32.u64.low 3817748708, %v13861_v0  ;;  %v13901_v42 = vmul.u32.u64.high 3817748708, %v13861_v0, %v13900_v40  ;;  %v4022_v49 = vmul.u32 18, %v4021_v17 }
 0x2bc   : > { %vm4253_vm1 = vcmp.ne.s32.totalorder %v13807_v30, 0  ;;  %vm4289_vm2 = vcmp.lt.s32.totalorder %v13807_v30, 0  ;;  %v13857_v61 = vadd.s32 18, %v13807_v30  ;;  %vm4255_vm11 = vcmp.ne.s32.totalorder %v13879_v14, 0 }
 0x2bd   : > { %vm13863_vm7 = vmand %vm4289_vm2, %vm4253_vm1  ;;  %vm4291_vm12 = vcmp.lt.s32.totalorder %v13879_v14, 0  ;;  %v13918_v46 = vadd.s32 18, %v13879_v14  ;;  %vm4254_vm15 = vcmp.ne.s32.totalorder %v13891_v24, 0  ;;  %v13922_v55 = vsub.s32 %v13715_v4, %v4000_v32 }
 0x2be   : > { %v15681_v2 = vsel %vm13863_vm7, 4294967295, %v15680_v2  ;;  %v13925_v62 = vmul.u32.u64.low 3817748708, %v13894_v33  ;;  %v13926_v63 = vmul.u32.u64.high 3817748708, %v13894_v33, %v13925_v62  ;;  %vm4290_vm0 = vcmp.lt.s32.totalorder %v13891_v24, 0  ;;  %vm13943_vm4 = vmand %vm4291_vm12, %vm4255_vm11 }
 0x2bf   : > { %v13930_v59 = vadd.s32 18, %v13891_v24  ;;  %v13934_v31 = vsub.s32 %v13731_v8, %v3989_v36  ;;  %vm4293_vm2 = vcmp.lt.s32.totalorder %v13897_v50, 0  ;;  %v4011_v4 = vmul.u32 18, %v4010_v54  ;;  %vm13957_vm3 = vmand %vm4290_vm0, %vm4254_vm15 }
 0x2c0   : > { %v4043_v6 = vshrl.u32 %v13872_v11, 4  ;;  %v13949_v8 = vsub.s32 %v13761_v15, %v4022_v49  ;;  %v4032_v17 = vshrl.u32 %v13884_v20, 4  ;;  %v13953_v19 = vadd.s32 168, %v13591_v1 }
 0x2c1   : > { %15684 = vst [vmem:[#allocation6_spill] sm:$0xff] %v13934_v31  ;;  %v13962_v32 = vadd.s32 18, %v13897_v50  ;;  %vm4259_vm11 = vcmp.ne.s32.totalorder %v13922_v55, 0  ;;  %vm4295_vm12 = vcmp.lt.s32.totalorder %v13922_v55, 0  ;;  %v13967_v15 = vadd.s32 160, %v13591_v1 }
 0x2c2   : > { %15687 = vst [vmem:[#allocation7_spill] sm:$0xff] %v13949_v8  ;;  %vm15690_vm1 = vcmp.ne.s32.totalorder %v13897_v50, 0  ;;  %v15691_v20 = vmov 0  ;;  %v13978_v36 = vadd.s32 18, %v13912_v44  ;;  %vm4258_vm15 = vcmp.ne.s32.totalorder %v13934_v31, 0 }
 0x2c3   : > { %vm13973_vm9 = vmand %vm4293_vm2, %vm15690_vm1  ;;  %vm4294_vm0 = vcmp.lt.s32.totalorder %v13934_v31, 0  ;;  %v4065_v40 = vshrl.u32 %v13901_v42, 4  ;;  %vm15693_vm7 = vcmp.ne.s32.totalorder %v13912_v44, 0  ;;  %vm15694_vm5 = vcmp.lt.s32.totalorder %v13912_v44, 0 }
 0x2c4   : > { %v15692_v20 = vsel %vm13973_vm9, 4294967295, %v15691_v20  ;;  %vm13987_vm14 = vmand %vm15694_vm5, %vm15693_vm7  ;;  %v15695_v54 = vmov 0  ;;  %v13992_v49 = vadd.s32 18, %v13922_v55  ;;  %v13995_v62 = vadd.s32 18, %v13934_v31 }
 0x2c5   : > { %v15696_v54 = vsel %vm13987_vm14, 4294967295, %v15695_v54  ;;  %v13998_v52 = vsub.s32 %v13804_v28, %v4011_v4  ;;  %v4044_v43 = vmul.u32 18, %v4043_v6  ;;  %vm14000_vm1 = vmand %vm4295_vm12, %vm4259_vm11  ;;  %v15697_v42 = vmov 0 }
 0x2c6   : > { %v15698_v42 = vsel %vm14000_vm1, 4294967295, %v15697_v42  ;;  %vm4261_vm2 = vcmp.ne.s32.totalorder %v13949_v8, 0  ;;  %v4033_v23 = vmul.u32 18, %v4032_v17  ;;  %vm14009_vm5 = vmand %vm4294_vm0, %vm4258_vm15  ;;  %vm4297_vm7 = vcmp.lt.s32.totalorder %v13949_v8, 0 }
 0x2c7   : > { %v14006_v29 = vmul.u32.u64.low 3817748708, %v13953_v19  ;;  %v14007_v37 = vmul.u32.u64.high 3817748708, %v13953_v19, %v14006_v29  ;;  %v15700_v26 = vsel %vm14009_vm5, 4294967295, %v15699_v26  ;;  %v4054_v28 = vshrl.u32 %v13926_v63, 4  ;;  %vm14074_vm12 = vmand %vm4297_vm7, %vm4261_vm2 }
 0x2c8   : > { %v14016_v4 = vmul.u32.u64.low 3817748708, %v13967_v15  ;;  %v14017_v6 = vmul.u32.u64.high 3817748708, %v13967_v15, %v14016_v4  ;;  %v4066_v25 = vmul.u32 18, %v4065_v40  ;;  %v15701_v63 = vsel %vm13721_vm6, %v13674_v48, %v13642_v34 }
 0x2c9   : > { %vm14035_vm11 = vcmp.lt.s32.totalorder %v15701_v63, 16  ;;  %v14048_v29 = vadd.s32 18, %v13949_v8  ;;  %v14051_v5 = vsub.s32 %v13838_v45, %v4044_v43  ;;  %v15705_v34 = vsel %vm13738_vm8, %v13682_v51, %v13645_v35 }
 0x2ca   : > { %vm14058_vm6 = vcmp.lt.s32.totalorder %v15705_v34, 16  ;;  %v15708_v35 = vmov 0  ;;  %v14079_v51 = vsub.s32 %v13843_v47, %v4033_v23  ;;  %vm4260_vm8 = vcmp.ne.s32.totalorder %v13998_v52, 0  ;;  %v14102_v23 = vld [vmem:[%s15648_s2] ss:$0 sm:$0xff] }
 0x2cb   : > { %15704 = vst [vmem:[#allocation8_spill] sm:$0xff] %v14048_v29  ;;  %v15709_v35 = vsel %vm14074_vm12, 4294967295, %v15708_v35  ;;  %v14087_v43 = vadd.s32 18, %v13998_v52  ;;  %v4055_v34 = vmul.u32 18, %v4054_v28  ;;  %v14090_v45 = vsub.s32 %v13861_v0, %v4066_v25 }
 0x2cc   : > { %15710 = vst [vmem:[#allocation9_spill] sm:$0xff] %v15709_v35  ;;  %v14093_v63 = vmul.u32.u64.low 3817748708, %v14028_v18  ;;  %v14094_v40 = vmul.u32.u64.high 3817748708, %v14028_v18, %v14093_v63  ;;  %v14097_v47 = vadd.s32 200, %v13591_v1  ;;  %v15711_v28 = vsel %vm13754_vm10, %v13697_v57, %v13652_v39 }
 0x2cd   : > { %vm14109_vm0 = vcmp.lt.s32.totalorder %v15711_v28, 16  ;;  %v14120_v63 = vadd.s32 192, %v13591_v1  ;;  %v15714_v39 = vsel %vm13772_vm13, %v13744_v10, %v13688_v53  ;;  %v14132_v13 = vadd.s32 18, %v14051_v5 }
 0x2ce   : > { %vm14127_vm10 = vcmp.lt.s32.totalorder %v15714_v39, 16  ;;  %v4087_v28 = vshrl.u32 %v14007_v37, 4  ;;  %v14138_v17 = vsub.s32 %v13894_v33, %v4055_v34  ;;  %v4076_v21 = vshrl.u32 %v14017_v6, 4 }
 0x2cf   : > { %v14142_v53 = vmul.u32.u64.low 3817748708, %v14082_v9  ;;  %v14143_v10 = vmul.u32.u64.high 3817748708, %v14082_v9, %v14142_v53  ;;  %v14148_v8 = vmul.u32.u64.low 3817748708, %v14097_v47  ;;  %v14149_v29 = vmul.u32.u64.high 3817748708, %v14097_v47, %v14148_v8 }
 0x2d0   : > { %vm15717_vm2 = vnez %v15677_v27  ;;  %vm15721_vm7 = vcmp.lt.s32.totalorder %v13998_v52, 0  ;;  %v14192_v53 = vadd.s32 18, %v14079_v51  ;;  %vm15733_vm12 = vcmp.lt.s32.totalorder %v14079_v51, 0 }
 0x2d1   : > { %v15718_v33 = vsel %vm15717_vm2, %v13777_v22, %v13702_v60  ;;  %vm14165_vm13 = vmand %vm15721_vm7, %vm4260_vm8  ;;  %vm15724_vm2 = vnez %v15679_v58  ;;  %vm15728_vm8 = vcmp.ne.s32.totalorder %v14051_v5, 0  ;;  %vm15729_vm7 = vcmp.lt.s32.totalorder %v14051_v5, 0 }
 0x2d2   : > { %vm14157_vm15 = vcmp.lt.s32.totalorder %v15718_v33, 16  ;;  %v15725_v60 = vsel %vm15724_vm2, %v13829_v41, %v13764_v16  ;;  %vm14187_vm1 = vmand %vm15729_vm7, %vm15728_vm8  ;;  %v14195_v58 = vadd.s32 18, %v14090_v45  ;;  %vm15732_vm2 = vcmp.ne.s32.totalorder %v14079_v51, 0  ;;  %v15778_v25 = vld [vmem:[#allocation8_spill] sm:$0xff] }
 0x2d3   : > { %vm14179_vm5 = vcmp.lt.s32.totalorder %v15725_v60, 16  ;;  %vm14201_vm14 = vmand %vm15733_vm12, %vm15732_vm2  ;;  %vm4264_vm8 = vcmp.ne.s32.totalorder %v14138_v17, 0  ;;  %vm15736_vm12 = vcmp.ne.s32.totalorder %v14090_v45, 0  ;;  %vm15737_vm2 = vcmp.lt.s32.totalorder %v14090_v45, 0 }
 0x2d4   : > { %vm14218_vm9 = vmand %vm15737_vm2, %vm15736_vm12  ;;  %vm15748_vm2 = vcmp.lt.s32.totalorder %v14138_v17, 0  ;;  %v15754_v7 = vsel %vm13957_vm3, %v13930_v59, %v13891_v24  ;;  %v14314_v11 = vadd.s32 208, %v13591_v1  ;;  %v14524_v33 = vadd.s32 240, %v13591_v1 }
 0x343   : > { %v10362_v0 = vpop.f32.mrb[0].mxu0 }
 0x344   : > { %v11764_v39 = vadd.f32 %v10362_v0, %v14102_v23  ;;  %v3526_v56 = vpop.f32.mrb[1].mxu0 }
 0x345   : > { %v11765_v37 = vadd.f32 %v14102_v23, %v3526_v56  ;;  %v14171_v56 = vmul.u32.u64.low 3817748708, %v14120_v63  ;;  %v14172_v27 = vmul.u32.u64.high 3817748708, %v14120_v63, %v14171_v56 }
 0x346   : > { %v4499_v8 = vmax.f32 %v11764_v39, 0.0  ;;  %v4088_v39 = vmul.u32 18, %v4087_v28  ;;  %v4077_v56 = vmul.u32 18, %v4076_v21  ;;  %v4109_v21 = vshrl.u32 %v14094_v40, 4 }
 0x347   : > { %v4498_v16 = vmax.f32 %v11765_v37, 0.0  ;;  %v10365_v41 = vpop.f32.mrb[2].mxu0 }
 0x348   : > { %v4607_v60 = vsel %vm14035_vm11, %v4499_v8, 0.0  ;;  %v11766_v28 = vadd.f32 %v10365_v41, %v14102_v23  ;;  %v3536_v37 = vpop.f32.mrb[3].mxu0  ;;  %vm15740_vm11 = vnez %v15681_v2 }
 0x349   : > { %4646 = vst [vmem:[#allocation3 + $0x1b] sm:$0xff] %v4607_v60  ;;  %v4606_v4 = vsel %vm14058_vm6, %v4498_v16, 0.0  ;;  %v11767_v8 = vadd.f32 %v14102_v23, %v3536_v37  ;;  %v15741_v41 = vsel %vm15740_vm11, %v13857_v61, %v13807_v30  ;;  %v14240_v60 = vadd.s32 18, %v14138_v17  ;;  %vm14259_vm11 = vmand %vm15748_vm2, %vm4264_vm8 }
 0x34a   : > { %vm14231_vm7 = vcmp.lt.s32.totalorder %v15741_v41, 16  ;;  %4645 = vst [vmem:[#allocation3 + $0x13] sm:$0xff] %v4606_v4  ;;  %v4501_v48 = vmax.f32 %v11766_v28, 0.0  ;;  %vm15744_vm6 = vnez %v15683_v12  ;;  %v14264_v12 = vsub.s32 %v13953_v19, %v4088_v39 }
 0x34b   : > { %v15745_v2 = vsel %vm15744_vm6, %v13868_v3, %v13820_v38  ;;  %v14267_v38 = vadd.s32 216, %v13591_v1  ;;  %v4500_v3 = vmax.f32 %v11767_v8, 0.0  ;;  %v10368_v28 = vpop.f32.mrb[4].mxu0  ;;  %v14274_v4 = vsub.s32 %v13967_v15, %v4077_v56 }
 0x34c   : > { %vm14247_vm12 = vcmp.lt.s32.totalorder %v15745_v2, 16  ;;  %v4098_v41 = vshrl.u32 %v14143_v10, 4  ;;  %v4609_v2 = vsel %vm14109_vm0, %v4501_v48, 0.0  ;;  %v11768_v19 = vadd.f32 %v10368_v28, %v14102_v23  ;;  %v3546_v39 = vpop.f32.mrb[5].mxu0 }
 0x34d   : > { %v4110_v61 = vmul.u32 18, %v4109_v21  ;;  %v4131_v8 = vshrl.u32 %v14149_v29, 4  ;;  %4648 = vst [vmem:[#allocation3 + $0x2b] sm:$0xff] %v4609_v2  ;;  %v4608_v40 = vsel %vm14127_vm10, %v4500_v3, 0.0  ;;  %v11769_v37 = vadd.f32 %v14102_v23, %v3546_v39 }
 0x34e   : > { %v15751_v15 = vsel %vm13943_vm4, %v13918_v46, %v13879_v14  ;;  %v4408_v29 = vsel %vm14259_vm11, %v14240_v60, %v14138_v17  ;;  %v4120_v10 = vshrl.u32 %v14172_v27, 4  ;;  %4647 = vst [vmem:[#allocation3 + $0x23] sm:$0xff] %v4608_v40  ;;  %v4503_v57 = vmax.f32 %v11768_v19, 0.0 }
 0x34f   : > { %vm14289_vm8 = vcmp.lt.s32.totalorder %v15751_v15, 16  ;;  %vm14303_vm0 = vcmp.lt.s32.totalorder %v15754_v7, 16  ;;  %vm4267_vm4 = vcmp.ne.s32.totalorder %v14264_v12, 0  ;;  %vm4303_vm10 = vcmp.lt.s32.totalorder %v14264_v12, 0  ;;  %v10371_v27 = vpop.f32.mrb[6].mxu0 }
 0x350   : > { %v14310_v46 = vadd.s32 18, %v14264_v12  ;;  %v4502_v56 = vmax.f32 %v11769_v37, 0.0  ;;  %v4099_v21 = vmul.u32 18, %v4098_v41  ;;  %v4611_v24 = vsel %vm14157_vm15, %v4503_v57, 0.0  ;;  %v3556_v40 = vpop.f32.mrb[7].mxu0  ;;  %vm14336_vm3 = vmand %vm4303_vm10, %vm4267_vm4 }
 0x351   : > { %v11770_v59 = vadd.f32 %v10371_v27, %v14102_v23  ;;  %v4132_v48 = vmul.u32 18, %v4131_v8  ;;  %4650 = vst [vmem:[#allocation3 + $0x3b] sm:$0xff] %v4611_v24  ;;  %v11771_v28 = vadd.f32 %v14102_v23, %v3556_v40  ;;  %v4688_v37 = vld [vmem:[#allocation3 + $0x10] sm:$0xff]  ;;  %v4689_v41 = vld [vmem:[#allocation3 + $0x18] sm:$0xff]  ;;  %vm15757_vm2 = vnez %v15692_v20 }
 0x352   : > { %v4610_v3 = vsel %vm14179_vm5, %v4502_v56, 0.0  ;;  %v15758_v6 = vsel %vm15757_vm2, %v13962_v32, %v13897_v50  ;;  %v14341_v19 = vsub.s32 %v14028_v18, %v4110_v61  ;;  %v4121_v39 = vmul.u32 18, %v4120_v10  ;;  %10449 = vmatprep.mubr.f32.mxu1 %v4688_v37 }
 0x353   : > { %vm14328_vm15 = vcmp.lt.s32.totalorder %v15758_v6, 16  ;;  %4649 = vst [vmem:[#allocation3 + $0x33] sm:$0xff] %v4610_v3  ;;  %v4505_v20 = vmax.f32 %v11770_v59, 0.0  ;;  %vm15763_vm5 = vnez %v15696_v54  ;;  %v14353_v8 = vadd.s32 18, %v14274_v4  ;;  %v10374_v10 = vpop.f32.mrb[8].mxu0  ;;  %10450 = vmatmul.mubr.f32.gmra.mrb[2].mxu1 %v4689_v41 }
 0x354   : > { %v15764_v50 = vsel %vm15763_vm5, %v13978_v36, %v13912_v44  ;;  %v14356_v15 = vmul.u32.u64.low 3817748708, %v14267_v38  ;;  %v14357_v18 = vmul.u32.u64.high 3817748708, %v14267_v38, %v14356_v15  ;;  %v4504_v61 = vmax.f32 %v11771_v28, 0.0  ;;  %v3566_v56 = vpop.f32.mrb[9].mxu0 }
 0x355   : > { %vm14348_vm2 = vcmp.lt.s32.totalorder %v15764_v50, 16  ;;  %v14360_v57 = vsub.s32 %v14082_v9, %v4099_v21  ;;  %v14363_v54 = vmul.u32.u64.low 3817748708, %v14314_v11  ;;  %v14364_v44 = vmul.u32.u64.high 3817748708, %v14314_v11, %v14363_v54  ;;  %v4690_v59 = vld [vmem:[#allocation3 + $0x20] sm:$0xff]  ;;  %v4691_v35 = vld [vmem:[#allocation3 + $0x28] sm:$0xff] }
 0x356   : > { %v4613_v36 = vsel %vm14231_vm7, %v4505_v20, 0.0  ;;  %v11772_v7 = vadd.f32 %v10374_v10, %v14102_v23  ;;  %v4411_v27 = vsel %vm14336_vm3, %v14310_v46, %v14264_v12  ;;  %v14374_v24 = vsub.s32 %v14097_v47, %v4132_v48  ;;  %10452 = vmatprep.mubr.f32.mxu1 %v4690_v59  ;;  %v15772_v48 = vld [vmem:[#allocation6_spill] sm:$0xff]  ;;  %v15776_v10 = vld [vmem:[#allocation9_spill] sm:$0xff]  ;;  %v15779_v54 = vld [vmem:[#allocation7_spill] sm:$0xff] }
 0x357   : > { %4652 = vst [vmem:[#allocation3 + $0x4b] sm:$0xff] %v4613_v36  ;;  %v4612_v9 = vsel %vm14247_vm12, %v4504_v61, 0.0  ;;  %v11773_v21 = vadd.f32 %v14102_v23, %v3566_v56  ;;  %vm15767_vm7 = vnez %v15698_v42  ;;  %v14390_v47 = vsub.s32 %v14120_v63, %v4121_v39  ;;  %v10377_v37 = vpop.f32.mrb[10].mxu0  ;;  %10453 = vmatmul.mubr.f32.gmra.mrb[4].mxu1 %v4691_v35 }
 0x358   : > { %v15768_v40 = vsel %vm15767_vm7, %v13992_v49, %v13922_v55  ;;  %4651 = vst [vmem:[#allocation3 + $0x43] sm:$0xff] %v4612_v9  ;;  %v4507_v30 = vmax.f32 %v11772_v7, 0.0  ;;  %vm15771_vm12 = vnez %v15700_v26  ;;  %v14403_v55 = vadd.s32 18, %v14341_v19  ;;  %v3576_v6 = vpop.f32.mrb[11].mxu0 }
 0x359   : > { %vm14384_vm4 = vcmp.lt.s32.totalorder %v15768_v40, 16  ;;  %v15773_v42 = vsel %vm15771_vm12, %v13995_v62, %v15772_v48  ;;  %v14406_v49 = vadd.s32 232, %v13591_v1  ;;  %v4506_v63 = vmax.f32 %v11773_v21, 0.0 }
 0x35a   : > { %vm14397_vm5 = vcmp.lt.s32.totalorder %v15773_v42, 16  ;;  %v14411_v26 = vadd.s32 224, %v13591_v1  ;;  %v4615_v62 = vsel %vm14289_vm8, %v4507_v30, 0.0  ;;  %v11774_v41 = vadd.f32 %v10377_v37, %v14102_v23  ;;  %v4692_v15 = vld [vmem:[#allocation3 + $0x30] sm:$0xff]  ;;  %v4693_v61 = vld [vmem:[#allocation3 + $0x38] sm:$0xff] }
 0x35b   : > { %v14417_v39 = vadd.s32 18, %v14360_v57  ;;  %4654 = vst [vmem:[#allocation3 + $0x5b] sm:$0xff] %v4615_v62  ;;  %v4614_v20 = vsel %vm14303_vm0, %v4506_v63, 0.0  ;;  %v11775_v50 = vadd.f32 %v14102_v23, %v3576_v6  ;;  %vm15777_vm6 = vnez %v15776_v10  ;;  %10455 = vmatprep.mubr.f32.mxu1 %v4692_v15 }
 0x35c   : > { %v15780_v36 = vsel %vm15777_vm6, %v15778_v25, %v15779_v54  ;;  %vm4307_vm10 = vcmp.lt.s32.totalorder %v14374_v24, 0  ;;  %4653 = vst [vmem:[#allocation3 + $0x53] sm:$0xff] %v4614_v20  ;;  %v4509_v14 = vmax.f32 %v11774_v41, 0.0  ;;  %v15783_v56 = vsel %vm14165_vm13, %v14087_v43, %v13998_v52  ;;  %v10380_v52 = vpop.f32.mrb[12].mxu0  ;;  %10456 = vmatmul.mubr.f32.gmra.mrb[6].mxu1 %v4693_v61 }
 0x35d   : > { %vm14428_vm8 = vcmp.lt.s32.totalorder %v15780_v36, 16  ;;  %vm14439_vm0 = vcmp.lt.s32.totalorder %v15783_v56, 16  ;;  %vm15786_vm6 = vcmp.ne.s32.totalorder %v14274_v4, 0  ;;  %vm15787_vm7 = vcmp.lt.s32.totalorder %v14274_v4, 0 }
 0x35e   : > { %vm14447_vm3 = vmand %vm15787_vm7, %vm15786_vm6  ;;  %v4153_v59 = vshrl.u32 %v14357_v18, 4  ;;  %v14453_v35 = vmul.u32.u64.low 3817748708, %v14406_v49  ;;  %v14454_v34 = vmul.u32.u64.high 3817748708, %v14406_v49, %v14453_v35  ;;  %v4508_v40 = vmax.f32 %v11775_v50, 0.0  ;;  %v3586_v18 = vpop.f32.mrb[13].mxu0 }
 0x35f   : > { %vm4306_vm13 = vcmp.lt.s32.totalorder %v14390_v47, 0  ;;  %v4142_v43 = vshrl.u32 %v14364_v44, 4  ;;  %v14459_v30 = vadd.s32 248, %v13591_v1  ;;  %v4617_v48 = vsel %vm14328_vm15, %v4509_v14, 0.0  ;;  %v4694_v41 = vld [vmem:[#allocation3 + $0x40] sm:$0xff]  ;;  %v4695_v6 = vld [vmem:[#allocation3 + $0x48] sm:$0xff] }
 0x360   : > { %v11776_v42 = vadd.f32 %v10380_v52, %v14102_v23  ;;  %vm15790_vm7 = vcmp.ne.s32.totalorder %v14341_v19, 0  ;;  %vm15791_vm6 = vcmp.lt.s32.totalorder %v14341_v19, 0  ;;  %4656 = vst [vmem:[#allocation3 + $0x6b] sm:$0xff] %v4617_v48  ;;  %v4616_v2 = vsel %vm14348_vm2, %v4508_v40, 0.0  ;;  %10458 = vmatprep.mubr.f32.mxu1 %v4694_v41 }
 0x361   : > { %vm14468_vm12 = vmand %vm15791_vm6, %vm15790_vm7  ;;  %v14473_v37 = vmul.u32.u64.low 3817748708, %v14411_v26  ;;  %v14474_v44 = vmul.u32.u64.high 3817748708, %v14411_v26, %v14473_v37  ;;  %v11777_v62 = vadd.f32 %v14102_v23, %v3586_v18  ;;  %v15794_v20 = vsel %vm14187_vm1, %v14132_v13, %v14051_v5  ;;  %4655 = vst [vmem:[#allocation3 + $0x63] sm:$0xff] %v4616_v2  ;;  %10459 = vmatmul.mubr.f32.gmra.mrb[8].mxu1 %v4695_v6 }
 0x362   : > { %vm14484_vm15 = vcmp.lt.s32.totalorder %v15794_v20, 16  ;;  %v4410_v15 = vsel %vm14447_vm3, %v14353_v8, %v14274_v4  ;;  %vm15797_vm2 = vcmp.ne.s32.totalorder %v14360_v57, 0  ;;  %vm15798_vm7 = vcmp.lt.s32.totalorder %v14360_v57, 0  ;;  %v8606_v4 = vld [vmem:[%s15649_s3 + $0x180] sm:$0xff] }
 0x363   : > { %vm14496_vm6 = vmand %vm15798_vm7, %vm15797_vm2  ;;  %v14501_v0 = vadd.s32 18, %v14374_v24  ;;  %v4511_v5 = vmax.f32 %v11776_v42, 0.0  ;;  %v15801_v13 = vsel %vm14201_vm14, %v14192_v53, %v14079_v51  ;;  %vm15804_vm3 = vcmp.ne.s32.totalorder %v14374_v24, 0  ;;  %v10383_v53 = vpop.f32.mrb[14].mxu0  ;;  %v4697_v48 = vld [vmem:[#allocation3 + $0x58] sm:$0xff] }
 0x364   : > { %vm14508_vm1 = vcmp.lt.s32.totalorder %v15801_v13, 16  ;;  %vm14516_vm2 = vmand %vm4307_vm10, %vm15804_vm3  ;;  %v14521_v61 = vadd.s32 18, %v14390_v47  ;;  %v4154_v10 = vmul.u32 18, %v4153_v59  ;;  %v4510_v51 = vmax.f32 %v11777_v62, 0.0  ;;  %v3596_v59 = vpop.f32.mrb[15].mxu0 }
 0x365   : > { %vm15807_vm14 = vcmp.ne.s32.totalorder %v14390_v47, 0  ;;  %v4143_v54 = vmul.u32 18, %v4142_v43  ;;  %v14535_v36 = vmul.u32.u64.low 3817748708, %v14459_v30  ;;  %v14536_v14 = vmul.u32.u64.high 3817748708, %v14459_v30, %v14535_v36  ;;  %v4696_v43 = vld [vmem:[#allocation3 + $0x50] sm:$0xff]  ;;  %v10386_v2 = vpop.f32.mrb[16].mxu0 }
 0x366   : > { %vm14530_vm7 = vmand %vm4306_vm13, %vm15807_vm14  ;;  %v4619_v56 = vsel %vm14384_vm4, %v4511_v5, 0.0  ;;  %v11778_v21 = vadd.f32 %v10383_v53, %v14102_v23  ;;  %v4413_v35 = vsel %vm14468_vm12, %v14403_v55, %v14341_v19  ;;  %v4412_v40 = vsel %vm14496_vm6, %v14417_v39, %v14360_v57  ;;  %10461 = vmatprep.mubr.f32.mxu1 %v4696_v43  ;;  %v3606_v41 = vpop.f32.mrb[17].mxu0 }
 0x367   : > { %4658 = vst [vmem:[#allocation3 + $0x7b] sm:$0xff] %v4619_v56  ;;  %v4618_v52 = vsel %vm14397_vm5, %v4510_v51, 0.0  ;;  %v11779_v3 = vadd.f32 %v14102_v23, %v3596_v59  ;;  %v15810_v42 = vsel %vm14218_vm9, %v14195_v58, %v14090_v45  ;;  %v4415_v55 = vsel %vm14516_vm2, %v14501_v0, %v14374_v24  ;;  %10462 = vmatmul.mubr.f32.gmra.mrb[10].mxu1 %v4697_v48  ;;  %v10389_v22 = vpop.f32.mrb[18].mxu0 }
 0x368   : > { %vm14557_vm4 = vcmp.lt.s32.totalorder %v15810_v42, 16  ;;  %v14566_v28 = vadd.s32 264, %v13591_v1  ;;  %4657 = vst [vmem:[#allocation3 + $0x73] sm:$0xff] %v4618_v52  ;;  %v4513_v18 = vmax.f32 %v11778_v21, 0.0  ;;  %vm14573_vm9 = vcmp.lt.s32.totalorder %v4408_v29, 16  ;;  %v4698_v20 = vld [vmem:[#allocation3 + $0x60] sm:$0xff] }
 0x369   : > { %v4414_v45 = vsel %vm14530_vm7, %v14521_v61, %v14390_v47  ;;  %v14582_v58 = vsub.s32 %v14267_v38, %v4154_v10  ;;  %v4175_v63 = vshrl.u32 %v14454_v34, 4  ;;  %v4512_v37 = vmax.f32 %v11779_v3, 0.0  ;;  %v4699_v5 = vld [vmem:[#allocation3 + $0x68] sm:$0xff]  ;;  %10464 = vmatprep.mubr.f32.mxu1 %v4698_v20 }
 0x36a   : > { %v14586_v16 = vsub.s32 %v14314_v11, %v4143_v54  ;;  %v14589_v17 = vmul.u32.u64.low 3817748708, %v14524_v33  ;;  %v14590_v60 = vmul.u32.u64.high 3817748708, %v14524_v33, %v14589_v17  ;;  %v4621_v29 = vsel %vm14428_vm8, %v4513_v18, 0.0  ;;  %v3616_v54 = vpop.f32.mrb[19].mxu0 }
 0x36b   : > { %v11780_v62 = vadd.f32 %v10386_v2, %v14102_v23  ;;  %v4164_v38 = vshrl.u32 %v14474_v44, 4  ;;  %v14597_v34 = vadd.s32 256, %v13591_v1  ;;  %4660 = vst [vmem:[#allocation3 + $0x8b] sm:$0xff] %v4621_v29  ;;  %v4620_v11 = vsel %vm14439_vm0, %v4512_v37, 0.0  ;;  %10465 = vmatmul.mubr.f32.gmra.mrb[12].mxu1 %v4699_v5  ;;  %v10392_v18 = vpop.f32.mrb[20].mxu0 }
 0x36c   : > { %v11781_v6 = vadd.f32 %v14102_v23, %v3606_v41  ;;  %vm14607_vm10 = vcmp.lt.s32.totalorder %v4411_v27, 16  ;;  %v14612_v44 = vmul.u32.u64.low 3817748708, %v14566_v28  ;;  %v14613_v13 = vmul.u32.u64.high 3817748708, %v14566_v28, %v14612_v44  ;;  %4659 = vst [vmem:[#allocation3 + $0x83] sm:$0xff] %v4620_v11  ;;  %v3626_v2 = vpop.f32.mrb[21].mxu0 }
 0x36d   : > { %v4515_v9 = vmax.f32 %v11780_v62, 0.0  ;;  %vm14615_vm5 = vcmp.lt.s32.totalorder %v4410_v15, 16  ;;  %vm4273_vm12 = vcmp.ne.s32.totalorder %v14582_v58, 0  ;;  %vm4309_vm8 = vcmp.lt.s32.totalorder %v14582_v58, 0 }
 0x36e   : > { %v4176_v12 = vmul.u32 18, %v4175_v63  ;;  %v4514_v46 = vmax.f32 %v11781_v6, 0.0  ;;  %vm4272_vm0 = vcmp.ne.s32.totalorder %v14586_v16, 0  ;;  %v4197_v27 = vshrl.u32 %v14536_v14, 4  ;;  %vm14663_vm3 = vmand %vm4309_vm8, %vm4273_vm12 }
 0x36f   : > { %v14624_v51 = vadd.s32 280, %v13591_v1  ;;  %v4623_v15 = vsel %vm14484_vm15, %v4515_v9, 0.0  ;;  %v11782_v53 = vadd.f32 %v10389_v22, %v14102_v23  ;;  %v11783_v59 = vadd.f32 %v14102_v23, %v3616_v54  ;;  %v4700_v14 = vld [vmem:[#allocation3 + $0x70] sm:$0xff]  ;;  %v4701_v52 = vld [vmem:[#allocation3 + $0x78] sm:$0xff]  ;;  %v10395_v5 = vpop.f32.mrb[22].mxu0 }
 0x370   : > { %v14630_v36 = vmul.u32.u64.low 3817748708, %v14597_v34  ;;  %v14631_v56 = vmul.u32.u64.high 3817748708, %v14597_v34, %v14630_v36  ;;  %4662 = vst [vmem:[#allocation3 + $0x9b] sm:$0xff] %v4623_v15  ;;  %v4622_v21 = vsel %vm14508_vm1, %v4514_v46, 0.0  ;;  %vm14636_vm13 = vcmp.lt.s32.totalorder %v4413_v35, 16  ;;  %10467 = vmatprep.mubr.f32.mxu1 %v4700_v14 }
 0x371   : > { %vm4308_vm15 = vcmp.lt.s32.totalorder %v14586_v16, 0  ;;  %v14642_v50 = vadd.s32 272, %v13591_v1  ;;  %4661 = vst [vmem:[#allocation3 + $0x93] sm:$0xff] %v4622_v21  ;;  %v4517_v43 = vmax.f32 %v11782_v53, 0.0  ;;  %vm14649_vm1 = vcmp.lt.s32.totalorder %v4412_v40, 16  ;;  %10468 = vmatmul.mubr.f32.gmra.mrb[14].mxu1 %v4701_v52  ;;  %v8604_v52 = vld [vmem:[%s15649_s3 + $0x170] sm:$0xff] }
 0x372   : > { %v14654_v35 = vadd.s32 18, %v14582_v58  ;;  %v14657_v48 = vadd.s32 18, %v14586_v16  ;;  %v4165_v1 = vmul.u32 18, %v4164_v38  ;;  %v4516_v42 = vmax.f32 %v11783_v59, 0.0  ;;  %vm14678_vm6 = vmand %vm4308_vm15, %vm4272_vm0 }
 0x373   : > { %v14668_v39 = vsub.s32 %v14406_v49, %v4176_v12  ;;  %v4198_v32 = vmul.u32 18, %v4197_v27  ;;  %v4186_v40 = vshrl.u32 %v14590_v60, 4  ;;  %v4625_v63 = vsel %vm14557_vm4, %v4517_v43, 0.0  ;;  %v4702_v62 = vld [vmem:[#allocation3 + $0x80] sm:$0xff]  ;;  %v4703_v41 = vld [vmem:[#allocation3 + $0x88] sm:$0xff] }
 0x374   : > { %v11784_v37 = vadd.f32 %v10392_v18, %v14102_v23  ;;  %v14683_v49 = vmul.u32.u64.low 3817748708, %v14624_v51  ;;  %v14684_v29 = vmul.u32.u64.high 3817748708, %v14624_v51, %v14683_v49  ;;  %4664 = vst [vmem:[#allocation3 + $0xab] sm:$0xff] %v4625_v63  ;;  %v4624_v19 = vsel %vm14573_vm9, %v4516_v42, 0.0  ;;  %10470 = vmatprep.mubr.f32.mxu1 %v4702_v62 }
 0x375   : > { %v11785_v60 = vadd.f32 %v14102_v23, %v3626_v2  ;;  %vm14694_vm14 = vcmp.lt.s32.totalorder %v4415_v55, 16  ;;  %v14699_v11 = vmul.u32.u64.low 3817748708, %v14642_v50  ;;  %v14700_v6 = vmul.u32.u64.high 3817748708, %v14642_v50, %v14699_v11  ;;  %4663 = vst [vmem:[#allocation3 + $0xa3] sm:$0xff] %v4624_v19  ;;  %10471 = vmatmul.mubr.f32.gmra.mrb[16].mxu1 %v4703_v41 }
 0x376   : > { %v4519_v31 = vmax.f32 %v11784_v37, 0.0  ;;  %vm14707_vm4 = vcmp.lt.s32.totalorder %v4414_v45, 16  ;;  %v4417_v24 = vsel %vm14663_vm3, %v14654_v35, %v14582_v58  ;;  %v14716_v0 = vsub.s32 %v14411_v26, %v4165_v1  ;;  %v3636_v58 = vpop.f32.mrb[23].mxu0 }
 0x377   : > { %v4219_v55 = vshrl.u32 %v14613_v13, 4  ;;  %v4518_v20 = vmax.f32 %v11785_v60, 0.0  ;;  %v4416_v47 = vsel %vm14678_vm6, %v14657_v48, %v14586_v16  ;;  %v14724_v61 = vsub.s32 %v14459_v30, %v4198_v32  ;;  %v10398_v27 = vpop.f32.mrb[24].mxu0 }
 0x378   : > { %v4187_v25 = vmul.u32 18, %v4186_v40  ;;  %v4627_v45 = vsel %vm14607_vm10, %v4519_v31, 0.0  ;;  %v11786_v26 = vadd.f32 %v10395_v5, %v14102_v23  ;;  %vm4275_vm2 = vcmp.ne.s32.totalorder %v14668_v39, 0  ;;  %v4704_v9 = vld [vmem:[#allocation3 + $0x90] sm:$0xff]  ;;  %v4705_v30 = vld [vmem:[#allocation3 + $0x98] sm:$0xff]  ;;  %v3646_v54 = vpop.f32.mrb[25].mxu0 }
 0x379   : > { %v4208_v44 = vshrl.u32 %v14631_v56, 4  ;;  %4666 = vst [vmem:[#allocation3 + $0xbb] sm:$0xff] %v4627_v45  ;;  %v4626_v13 = vsel %vm14615_vm5, %v4518_v20, 0.0  ;;  %v11787_v16 = vadd.f32 %v14102_v23, %v3636_v58  ;;  %vm4311_vm7 = vcmp.lt.s32.totalorder %v14668_v39, 0  ;;  %10473 = vmatprep.mubr.f32.mxu1 %v4704_v9  ;;  %v10401_v57 = vpop.f32.mrb[26].mxu0  ;;  %v5030_v9 = vld [vmem:[#allocation3 + $0x21] sm:$0xff] }
 0x37a   : > { %v4383_v7 = vadd.s32 18, %v14668_v39  ;;  %4665 = vst [vmem:[#allocation3 + $0xb3] sm:$0xff] %v4626_v13  ;;  %v4521_v12 = vmax.f32 %v11786_v26, 0.0  ;;  %vm4274_vm9 = vcmp.ne.s32.totalorder %v14716_v0, 0  ;;  %vm4310_vm11 = vcmp.lt.s32.totalorder %v14716_v0, 0  ;;  %10474 = vmatmul.mubr.f32.gmra.mrb[18].mxu1 %v4705_v30  ;;  %vm14750_vm12 = vmand %vm4311_vm7, %vm4275_vm2  ;;  %v3656_v17 = vpop.f32.mrb[27].mxu0 }
 0x37b   : > { %v4220_v46 = vmul.u32 18, %v4219_v55  ;;  %v4520_v22 = vmax.f32 %v11787_v16, 0.0  ;;  %vm4277_vm10 = vcmp.ne.s32.totalorder %v14724_v61, 0  ;;  %vm4313_vm5 = vcmp.lt.s32.totalorder %v14724_v61, 0  ;;  %v10404_v31 = vpop.f32.mrb[28].mxu0  ;;  %v5031_v30 = vld [vmem:[#allocation3 + $0x29] sm:$0xff] }
 0x37c   : > { %v14741_v10 = vsub.s32 %v14524_v33, %v4187_v25  ;;  %v4629_v15 = vsel %vm14636_vm13, %v4521_v12, 0.0  ;;  %v11788_v53 = vadd.f32 %v10398_v27, %v14102_v23  ;;  %v4209_v56 = vmul.u32 18, %v4208_v44  ;;  %v4706_v14 = vld [vmem:[#allocation3 + $0xa0] sm:$0xff]  ;;  %v4707_v3 = vld [vmem:[#allocation3 + $0xa8] sm:$0xff]  ;;  %vm14771_vm13 = vmand %vm4310_vm11, %vm4274_vm9  ;;  %v3666_v20 = vpop.f32.mrb[29].mxu0 }
 0x37d   : > { %v4241_v21 = vshrl.u32 %v14684_v29, 4  ;;  %4668 = vst [vmem:[#allocation3 + $0xcb] sm:$0xff] %v4629_v15  ;;  %v4628_v33 = vsel %vm14649_vm1, %v4520_v22, 0.0  ;;  %v11789_v59 = vadd.f32 %v14102_v23, %v3646_v54  ;;  %vm14758_vm8 = vcmp.lt.s32.totalorder %v4417_v24, 16  ;;  %10476 = vmatprep.mubr.f32.mxu1 %v4706_v14  ;;  %vm14784_vm15 = vmand %vm4313_vm5, %vm4277_vm10  ;;  %v5033_v27 = vld [vmem:[#allocation3 + $0x39] sm:$0xff] }
 0x37e   : > { %v4230_v43 = vshrl.u32 %v14700_v6, 4  ;;  %4667 = vst [vmem:[#allocation3 + $0xc3] sm:$0xff] %v4628_v33  ;;  %v4523_v35 = vmax.f32 %v11788_v53, 0.0  ;;  %vm14763_vm0 = vcmp.lt.s32.totalorder %v4416_v47, 16  ;;  %v4382_v1 = vadd.s32 18, %v14716_v0  ;;  %10477 = vmatmul.mubr.f32.gmra.mrb[20].mxu1 %v4707_v3 }
 0x37f   : > { %v4385_v42 = vadd.s32 18, %v14724_v61  ;;  %v4522_v18 = vmax.f32 %v11789_v59, 0.0  ;;  %v4419_v32 = vsel %vm14750_vm12, %v4383_v7, %v14668_v39  ;;  %vm4276_vm1 = vcmp.ne.s32.totalorder %v14741_v10, 0  ;;  %v10407_v16 = vpop.f32.mrb[30].mxu0 }
 0x380   : > { %v14790_v63 = vsub.s32 %v14566_v28, %v4220_v46  ;;  %v4631_v37 = vsel %vm14694_vm14, %v4523_v35, 0.0  ;;  %v11790_v2 = vadd.f32 %v10401_v57, %v14102_v23  ;;  %v14796_v39 = vsub.s32 %v14597_v34, %v4209_v56  ;;  %v3676_v22 = vpop.f32.mrb[31].mxu0 }
 0x381   : > { %v4242_v49 = vmul.u32 18, %v4241_v21  ;;  %4670 = vst [vmem:[#allocation3 + $0xdb] sm:$0xff] %v4631_v37  ;;  %v4630_v29 = vsel %vm14707_vm4, %v4522_v18, 0.0  ;;  %v11791_v19 = vadd.f32 %v14102_v23, %v3656_v17  ;;  %v4708_v60 = vld [vmem:[#allocation3 + $0xb0] sm:$0xff]  ;;  %v4709_v62 = vld [vmem:[#allocation3 + $0xb8] sm:$0xff]  ;;  %vm4312_vm3 = vcmp.lt.s32.totalorder %v14741_v10, 0 }
 0x382   : > { %v4231_v28 = vmul.u32 18, %v4230_v43  ;;  %4669 = vst [vmem:[#allocation3 + $0xd3] sm:$0xff] %v4630_v29  ;;  %v4525_v41 = vmax.f32 %v11790_v2, 0.0  ;;  %10479 = vmatprep.mubr.f32.mxu1 %v4708_v60  ;;  %vm14802_vm6 = vcmp.lt.s32.totalorder %v4419_v32, 16  ;;  %v4418_v34 = vsel %vm14771_vm13, %v4382_v1, %v14716_v0  ;;  %vm14822_vm2 = vmand %vm4312_vm3, %vm4276_vm1  ;;  %v8592_v0 = vld [vmem:[%s15649_s3 + $0x110] sm:$0xff] }
 0x383   : > { %v4421_v11 = vsel %vm14784_vm15, %v4385_v42, %v14724_v61  ;;  %v4524_v6 = vmax.f32 %v11791_v19, 0.0  ;;  %10480 = vmatmul.mubr.f32.gmra.mrb[22].mxu1 %v4709_v62  ;;  %v4384_v8 = vadd.s32 18, %v14741_v10  ;;  %vm4279_vm14 = vcmp.ne.s32.totalorder %v14790_v63, 0  ;;  %v10410_v59 = vpop.f32.mrb[32].mxu0  ;;  %v15301_v60 = vld [vmem:[#allocation3 + $0x2c] sm:$0xff] }
 0x384   : > { %vm4315_vm4 = vcmp.lt.s32.totalorder %v14790_v63, 0  ;;  %v4633_v24 = vsel %vm14758_vm8, %v4525_v41, 0.0  ;;  %v11792_v55 = vadd.f32 %v10404_v31, %v14102_v23  ;;  %vm4278_vm7 = vcmp.ne.s32.totalorder %v14796_v39, 0  ;;  %v3686_v48 = vpop.f32.mrb[33].mxu0 }
 0x385   : > { %v14828_v5 = vsub.s32 %v14624_v51, %v4242_v49  ;;  %4672 = vst [vmem:[#allocation3 + $0xeb] sm:$0xff] %v4633_v24  ;;  %v4632_v47 = vsel %vm14763_vm0, %v4524_v6, 0.0  ;;  %v11793_v61 = vadd.f32 %v14102_v23, %v3666_v20  ;;  %v4710_v25 = vld [vmem:[#allocation3 + $0xc0] sm:$0xff]  ;;  %v4711_v45 = vld [vmem:[#allocation3 + $0xc8] sm:$0xff]  ;;  %vm4314_vm9 = vcmp.lt.s32.totalorder %v14796_v39, 0  ;;  %vm14853_vm5 = vmand %vm4315_vm4, %vm4279_vm14 }
 0x386   : > { %v14835_v26 = vsub.s32 %v14642_v50, %v4231_v28  ;;  %4671 = vst [vmem:[#allocation3 + $0xe3] sm:$0xff] %v4632_v47  ;;  %v4527_v58 = vmax.f32 %v11792_v55, 0.0  ;;  %vm14837_vm11 = vcmp.lt.s32.totalorder %v4418_v34, 16  ;;  %10482 = vmatprep.mubr.f32.mxu1 %v4710_v25  ;;  %v4387_v51 = vadd.s32 18, %v14790_v63  ;;  %vm14865_vm12 = vmand %vm4314_vm9, %vm4278_vm7  ;;  %v5026_v20 = vld [vmem:[#allocation3 + $0x1] sm:$0xff]  ;;  %v5027_v47 = vld [vmem:[#allocation3 + $0x9] sm:$0xff] }
 0x387   : > { %v4526_v13 = vmax.f32 %v11793_v61, 0.0  ;;  %vm14842_vm10 = vcmp.lt.s32.totalorder %v4421_v11, 16  ;;  %10483 = vmatmul.mubr.f32.gmra.mrb[24].mxu1 %v4711_v45  ;;  %v4420_v50 = vsel %vm14822_vm2, %v4384_v8, %v14741_v10  ;;  %v4386_v7 = vadd.s32 18, %v14796_v39  ;;  %v10413_v2 = vpop.f32.mrb[34].mxu0  ;;  %v8594_v25 = vld [vmem:[%s15649_s3 + $0x120] sm:$0xff]  ;;  %v8595_v45 = vld [vmem:[%s15649_s3 + $0x128] sm:$0xff] }
 0x388   : > { %v4635_v12 = vsel %vm14802_vm6, %v4527_v58, 0.0  ;;  %v11794_v46 = vadd.f32 %v10407_v16, %v14102_v23  ;;  %vm4281_vm8 = vcmp.ne.s32.totalorder %v14828_v5, 0  ;;  %vm4317_vm0 = vcmp.lt.s32.totalorder %v14828_v5, 0  ;;  %v3696_v29 = vpop.f32.mrb[35].mxu0  ;;  %v15864_v58 = vld [vmem:[#allocation5_spill] sm:$0xff]  ;;  %v8659_v34 = vld [vmem:[%s15649_s3 + $0x328] sm:$0xff] }
 0x389   : > { %4674 = vst [vmem:[#allocation3 + $0xfb] sm:$0xff] %v4635_v12  ;;  %v4634_v10 = vsel %vm14837_vm11, %v4526_v13, 0.0  ;;  %v11795_v15 = vadd.f32 %v14102_v23, %v3676_v22  ;;  %v4712_v53 = vld [vmem:[#allocation3 + $0xd0] sm:$0xff]  ;;  %v4713_v54 = vld [vmem:[#allocation3 + $0xd8] sm:$0xff]  ;;  %vm4280_vm13 = vcmp.ne.s32.totalorder %v14835_v26, 0  ;;  %vm4316_vm15 = vcmp.lt.s32.totalorder %v14835_v26, 0  ;;  %vm14887_vm3 = vmand %vm4317_vm0, %vm4281_vm8 }
 0x38a   : > { %4673 = vst [vmem:[#allocation3 + $0xf3] sm:$0xff] %v4634_v10  ;;  %v4529_v36 = vmax.f32 %v11794_v46, 0.0  ;;  %vm4456_vm1 = vcmp.lt.s32.totalorder %v4420_v50, 16  ;;  %10485 = vmatprep.mubr.f32.mxu1 %v4712_v53  ;;  %v4423_v56 = vsel %vm14853_vm5, %v4387_v51, %v14790_v63  ;;  %v4389_v21 = vadd.s32 18, %v14828_v5  ;;  %vm14899_vm6 = vmand %vm4316_vm15, %vm4280_vm13  ;;  %v5029_v51 = vld [vmem:[#allocation3 + $0x19] sm:$0xff]  ;;  %v8596_v13 = vld [vmem:[%s15649_s3 + $0x130] sm:$0xff] }
 0x38b   : > { %v4528_v33 = vmax.f32 %v11795_v15, 0.0  ;;  %10486 = vmatmul.mubr.f32.gmra.mrb[26].mxu1 %v4713_v54  ;;  %v4422_v14 = vsel %vm14865_vm12, %v4386_v7, %v14796_v39  ;;  %v4388_v3 = vadd.s32 18, %v14835_v26  ;;  %v11796_v35 = vadd.f32 %v10410_v59, %v14102_v23  ;;  %v8597_v16 = vld [vmem:[%s15649_s3 + $0x138] sm:$0xff]  ;;  %v8598_v7 = vld [vmem:[%s15649_s3 + $0x140] sm:$0xff]  ;;  %v8599_v12 = vld [vmem:[%s15649_s3 + $0x148] sm:$0xff] }
 0x38c   : > { %v4637_v43 = vsel %vm14842_vm10, %v4529_v36, 0.0  ;;  %vm4459_vm14 = vcmp.lt.s32.totalorder %v4423_v56, 16  ;;  %v14904_v42 = vadd.f32 %v14102_v23, %v3686_v48  ;;  %vm14906_vm4 = vcmp.lt.s32.totalorder %v4422_v14, 16  ;;  %v5032_v46 = vld [vmem:[#allocation3 + $0x31] sm:$0xff]  ;;  %v5034_v53 = vld [vmem:[#allocation3 + $0x41] sm:$0xff]  ;;  %v5035_v36 = vld [vmem:[#allocation3 + $0x49] sm:$0xff] }
 0x38d   : > { %4676 = vst [vmem:[#allocation3 + $0x10b] sm:$0xff] %v4637_v43  ;;  %v4636_v1 = vsel %vm4456_vm1, %v4528_v33, 0.0  ;;  %v4714_v18 = vld [vmem:[#allocation3 + $0xe0] sm:$0xff]  ;;  %v4715_v57 = vld [vmem:[#allocation3 + $0xe8] sm:$0xff]  ;;  %v4531_v32 = vmax.f32 %v11796_v35, 0.0  ;;  %v4425_v63 = vsel %vm14887_vm3, %v4389_v21, %v14828_v5  ;;  %v4424_v17 = vsel %vm14899_vm6, %v4388_v3, %v14835_v26  ;;  %v8593_v5 = vld [vmem:[%s15649_s3 + $0x118] sm:$0xff] }
 0x38e   : > { %4675 = vst [vmem:[#allocation3 + $0x103] sm:$0xff] %v4636_v1  ;;  %10488 = vmatprep.mubr.f32.mxu1 %v4714_v18  ;;  %v4530_v37 = vmax.f32 %v14904_v42, 0.0  ;;  %v14918_v49 = vadd.f32 %v10413_v2, %v14102_v23  ;;  %vm14924_vm2 = vcmp.lt.s32.totalorder %v4425_v63, 16  ;;  %v14929_v62 = vadd.f32 %v14102_v23, %v3696_v29  ;;  %v5028_v26 = vld [vmem:[#allocation3 + $0x11] sm:$0xff]  ;;  %v8602_v56 = vld [vmem:[%s15649_s3 + $0x160] sm:$0xff]  ;;  %v8603_v21 = vld [vmem:[%s15649_s3 + $0x168] sm:$0xff] }
 0x38f   : > { %10489 = vmatmul.mubr.f32.gmra.mrb[28].mxu1 %v4715_v57  ;;  %v4639_v39 = vsel %vm4459_vm14, %v4531_v32, 0.0  ;;  %vm14932_vm7 = vcmp.lt.s32.totalorder %v4424_v17, 16  ;;  %v11544_v61 = vpack.c.bf16 %v8593_v5, %v8592_v0  ;;  %v11548_v44 = vpack.c.bf16 %v8595_v45, %v8594_v25  ;;  %v8600_v10 = vld [vmem:[%s15649_s3 + $0x150] sm:$0xff]  ;;  %v8601_v15 = vld [vmem:[%s15649_s3 + $0x158] sm:$0xff]  ;;  %v5038_v43 = vld [vmem:[#allocation3 + $0x61] sm:$0xff] }
 0x390   : > { %4678 = vst [vmem:[#allocation3 + $0x11b] sm:$0xff] %v4639_v39  ;;  %v4638_v19 = vsel %vm14906_vm4, %v4530_v37, 0.0  ;;  %v4533_v38 = vmax.f32 %v14918_v49, 0.0  ;;  %v4532_v11 = vmax.f32 %v14929_v62, 0.0  ;;  %v11552_v50 = vpack.c.bf16 %v8597_v16, %v8596_v13  ;;  %v5036_v33 = vld [vmem:[#allocation3 + $0x51] sm:$0xff]  ;;  %v5037_v14 = vld [vmem:[#allocation3 + $0x59] sm:$0xff] }
 0x391   : > { %v4716_v28 = vld [vmem:[#allocation3 + $0xf0] sm:$0xff]  ;;  %v4717_v41 = vld [vmem:[#allocation3 + $0xf8] sm:$0xff]  ;;  %4677 = vst [vmem:[#allocation3 + $0x113] sm:$0xff] %v4638_v19  ;;  %v11556_v22 = vpack.c.bf16 %v8599_v12, %v8598_v7  ;;  %v11560_v54 = vpack.c.bf16 %v8601_v15, %v8600_v10  ;;  %v11564_v59 = vpack.c.bf16 %v8603_v21, %v8602_v56  ;;  %v8607_v1 = vld [vmem:[%s15649_s3 + $0x188] sm:$0xff] }
 0x392   : > { %10491 = vmatprep.mubr.f32.mxu1 %v4716_v28  ;;  %v4641_v6 = vsel %vm14924_vm2, %v4533_v38, 0.0  ;;  %v4640_v23 = vsel %vm14932_vm7, %v4532_v11, 0.0  ;;  %v8605_v3 = vld [vmem:[%s15649_s3 + $0x178] sm:$0xff]  ;;  %v5039_v48 = vld [vmem:[#allocation3 + $0x69] sm:$0xff]  ;;  %v11572_v57 = vpack.c.bf16 %v8607_v1, %v8606_v4  ;;  %v5042_v63 = vld [vmem:[#allocation3 + $0x81] sm:$0xff] }
 0x393   : > { %10492 = vmatmul.mubr.f32.gmra.mrb[30].mxu1 %v4717_v41  ;;  %4680 = vst [vmem:[#allocation3 + $0x12b] sm:$0xff] %v4641_v6  ;;  %4679 = vst [vmem:[#allocation3 + $0x123] sm:$0xff] %v4640_v23  ;;  %v11568_v35 = vpack.c.bf16 %v8605_v3, %v8604_v52  ;;  %v5040_v18 = vld [vmem:[#allocation3 + $0x71] sm:$0xff]  ;;  %v5041_v32 = vld [vmem:[#allocation3 + $0x79] sm:$0xff] }
 0x394   : > { %v5043_v2 = vld [vmem:[#allocation3 + $0x89] sm:$0xff]  ;;  %v5044_v17 = vld [vmem:[#allocation3 + $0x91] sm:$0xff]  ;;  %v5045_v39 = vld [vmem:[#allocation3 + $0x99] sm:$0xff] }
 0x395   : > { %v4718_v31 = vld [vmem:[#allocation3 + $0x100] sm:$0xff]  ;;  %v4719_v8 = vld [vmem:[#allocation3 + $0x108] sm:$0xff]  ;;  %v5048_v28 = vld [vmem:[#allocation3 + $0xb1] sm:$0xff] }
 0x396   : > { %10494 = vmatprep.mubr.f32.mxu1 %v4718_v31  ;;  %v5046_v29 = vld [vmem:[#allocation3 + $0xa1] sm:$0xff]  ;;  %v5047_v19 = vld [vmem:[#allocation3 + $0xa9] sm:$0xff]  ;;  %v5049_v41 = vld [vmem:[#allocation3 + $0xb9] sm:$0xff] }
 0x397   : > { %10495 = vmatmul.mubr.f32.gmra.mrb[32].mxu1 %v4719_v8  ;;  %v5050_v6 = vld [vmem:[#allocation3 + $0xc1] sm:$0xff]  ;;  %v5051_v23 = vld [vmem:[#allocation3 + $0xc9] sm:$0xff]  ;;  %v5052_v31 = vld [vmem:[#allocation3 + $0xd1] sm:$0xff] }
 0x398   : > { %v4720_v24 = vld [vmem:[#allocation3 + $0x110] sm:$0xff]  ;;  %v4721_v55 = vld [vmem:[#allocation3 + $0x118] sm:$0xff]  ;;  %v5058_v5 = vld [vmem:[#allocation3 + $0x101] sm:$0xff] }
 0x399   : > { %10497 = vmatprep.mubr.f32.mxu1 %v4720_v24  ;;  %v5053_v8 = vld [vmem:[#allocation3 + $0xd9] sm:$0xff]  ;;  %v5054_v24 = vld [vmem:[#allocation3 + $0xe1] sm:$0xff]  ;;  %v8612_v7 = vld [vmem:[%s15649_s3 + $0x1b0] sm:$0xff] }
 0x39a   : > { %v5057_v0 = vld [vmem:[#allocation3 + $0xf9] sm:$0xff]  ;;  %v5432_v25 = vld [vmem:[#allocation3 + $0x2] sm:$0xff]  ;;  %v8616_v56 = vld [vmem:[%s15649_s3 + $0x1d0] sm:$0xff] }
 0x39b   : > { %10498 = vmatmul.mubr.f32.gmra.mrb[34].mxu1 %v4721_v55  ;;  %v5055_v55 = vld [vmem:[#allocation3 + $0xe9] sm:$0xff]  ;;  %v5061_v45 = vld [vmem:[#allocation3 + $0x119] sm:$0xff] }
 0x39c   : > { %10532 = vmatprep.mubr.f32.mxu1 %v5026_v20  ;;  %v5056_v20 = vld [vmem:[#allocation3 + $0xf1] sm:$0xff]  ;;  %v8610_v13 = vld [vmem:[%s15649_s3 + $0x1a0] sm:$0xff]  ;;  %v8611_v16 = vld [vmem:[%s15649_s3 + $0x1a8] sm:$0xff] }
 0x39d   : > { %v8613_v12 = vld [vmem:[%s15649_s3 + $0x1b8] sm:$0xff]  ;;  %v8614_v10 = vld [vmem:[%s15649_s3 + $0x1c0] sm:$0xff]  ;;  %v8615_v15 = vld [vmem:[%s15649_s3 + $0x1c8] sm:$0xff] }
 0x39e   : > { %v8617_v21 = vld [vmem:[%s15649_s3 + $0x1d8] sm:$0xff]  ;;  %v8618_v52 = vld [vmem:[%s15649_s3 + $0x1e0] sm:$0xff]  ;;  %v8619_v3 = vld [vmem:[%s15649_s3 + $0x1e8] sm:$0xff] }
 0x39f   : > { %10533 = vmatmul.mubr.f32.vlgmr.msra.gmra.mrb[0].mxu1 %v5027_v47  ;;  %v5059_v47 = vld [vmem:[#allocation3 + $0x109] sm:$0xff]  ;;  %v8621_v1 = vld [vmem:[%s15649_s3 + $0x1f8] sm:$0xff]  ;;  %v8658_v62 = vld [vmem:[%s15649_s3 + $0x320] sm:$0xff] }
 0x3a0   : > { %10535 = vmatprep.mubr.f32.mxu1 %v5028_v26  ;;  %11543 = vmatpush3.bf16.msra.mxu1 %v15864_v58  ;;  %v8608_v26 = vld [vmem:[%s15649_s3 + $0x190] sm:$0xff]  ;;  %v8609_v58 = vld [vmem:[%s15649_s3 + $0x198] sm:$0xff]  ;;  %v11676_v49 = vpack.c.bf16 %v8659_v34, %v8658_v62  ;;  %v8678_v62 = vld [vmem:[%s15649_s3 + $0x3c0] sm:$0xff] }
 0x3a1   : > { %11545 = vmatprep.subr.bf16.mxu1 %v11544_v61  ;;  %v8620_v4 = vld [vmem:[%s15649_s3 + $0x1f0] sm:$0xff]  ;;  %v8679_v34 = vld [vmem:[%s15649_s3 + $0x3c8] sm:$0xff] }
 0x3a2   : > { %v6650_v42 = vld [vmem:[#allocation3 + $0x14] sm:$0xff] }
 0x3a3   : > { %10536 = vmatmul.mubr.f32.gmra.mrb[2].mxu1 %v5029_v51  ;;  %v11576_v51 = vpack.c.bf16 %v8609_v58, %v8608_v26  ;;  %v15132_v26 = vld [vmem:[#allocation3 + $0x102] sm:$0xff]  ;;  %v15135_v58 = vld [vmem:[#allocation3 + $0x10a] sm:$0xff] }
 0x3a4   : > { %10538 = vmatprep.mubr.f32.mxu1 %v5030_v9  ;;  %11547 = vmatpush3.bf16.msra.mxu1 %v11544_v61  ;;  %v5060_v61 = vld [vmem:[#allocation3 + $0x111] sm:$0xff] }
 0x3a5   : > { %11549 = vmatprep.subr.bf16.mxu1 %v11548_v44  ;;  %v15006_v9 = vld [vmem:[#allocation3 + $0x12] sm:$0xff] }
 0x3a7   : > { %10539 = vmatmul.mubr.f32.gmra.mrb[4].mxu1 %v5031_v30  ;;  %v15009_v30 = vld [vmem:[#allocation3 + $0x1a] sm:$0xff] }
 0x3a8   : > { %10541 = vmatprep.mubr.f32.mxu1 %v5032_v46  ;;  %11551 = vmatpush3.bf16.msra.mxu1 %v11548_v44  ;;  %v5433_v44 = vld [vmem:[#allocation3 + $0xa] sm:$0xff]  ;;  %v15018_v46 = vld [vmem:[#allocation3 + $0x22] sm:$0xff] }
 0x3a9   : > { %11553 = vmatprep.subr.bf16.mxu1 %v11552_v50 }
 0x3ab   : > { %10542 = vmatmul.mubr.f32.gmra.mrb[6].mxu1 %v5033_v27  ;;  %v15021_v27 = vld [vmem:[#allocation3 + $0x2a] sm:$0xff] }
 0x3ac   : > { %10544 = vmatprep.mubr.f32.mxu1 %v5034_v53  ;;  %11555 = vmatpush3.bf16.msra.mxu1 %v11552_v50  ;;  %v11580_v50 = vpack.c.bf16 %v8611_v16, %v8610_v13  ;;  %v15030_v53 = vld [vmem:[#allocation3 + $0x32] sm:$0xff] }
 0x3ad   : > { %11557 = vmatprep.subr.bf16.mxu1 %v11556_v22  ;;  %v8624_v13 = vld [vmem:[%s15649_s3 + $0x210] sm:$0xff]  ;;  %v8625_v16 = vld [vmem:[%s15649_s3 + $0x218] sm:$0xff] }
 0x3af   : > { %10545 = vmatmul.mubr.f32.gmra.mrb[8].mxu1 %v5035_v36  ;;  %v15033_v36 = vld [vmem:[#allocation3 + $0x3a] sm:$0xff] }
 0x3b0   : > { %10547 = vmatprep.mubr.f32.mxu1 %v5036_v33  ;;  %11559 = vmatpush3.bf16.msra.mxu1 %v11556_v22  ;;  %v11584_v22 = vpack.c.bf16 %v8613_v12, %v8612_v7  ;;  %v15042_v33 = vld [vmem:[#allocation3 + $0x42] sm:$0xff] }
 0x3b1   : > { %11561 = vmatprep.subr.bf16.mxu1 %v11560_v54  ;;  %v8626_v7 = vld [vmem:[%s15649_s3 + $0x220] sm:$0xff]  ;;  %v8627_v12 = vld [vmem:[%s15649_s3 + $0x228] sm:$0xff] }
 0x3b3   : > { %10548 = vmatmul.mubr.f32.gmra.mrb[10].mxu1 %v5037_v14  ;;  %v15045_v14 = vld [vmem:[#allocation3 + $0x4a] sm:$0xff] }
 0x3b4   : > { %10550 = vmatprep.mubr.f32.mxu1 %v5038_v43  ;;  %11563 = vmatpush3.bf16.msra.mxu1 %v11560_v54  ;;  %v11588_v54 = vpack.c.bf16 %v8615_v15, %v8614_v10  ;;  %v15054_v43 = vld [vmem:[#allocation3 + $0x52] sm:$0xff]  ;;  %v8631_v15 = vld [vmem:[%s15649_s3 + $0x248] sm:$0xff] }
 0x3b5   : > { %11565 = vmatprep.subr.bf16.mxu1 %v11564_v59  ;;  %v8629_v10 = vld [vmem:[%s15649_s3 + $0x238] sm:$0xff] }
 0x3b7   : > { %10551 = vmatmul.mubr.f32.gmra.mrb[12].mxu1 %v5039_v48  ;;  %v15057_v48 = vld [vmem:[#allocation3 + $0x5a] sm:$0xff] }
 0x3b8   : > { %10553 = vmatprep.mubr.f32.mxu1 %v5040_v18  ;;  %11567 = vmatpush3.bf16.msra.mxu1 %v11564_v59  ;;  %v11592_v59 = vpack.c.bf16 %v8617_v21, %v8616_v56  ;;  %v15066_v18 = vld [vmem:[#allocation3 + $0x62] sm:$0xff] }
 0x3b9   : > { %11569 = vmatprep.subr.bf16.mxu1 %v11568_v35  ;;  %v8634_v56 = vld [vmem:[%s15649_s3 + $0x260] sm:$0xff]  ;;  %v8635_v21 = vld [vmem:[%s15649_s3 + $0x268] sm:$0xff] }
 0x3bb   : > { %10554 = vmatmul.mubr.f32.gmra.mrb[14].mxu1 %v5041_v32  ;;  %v15069_v32 = vld [vmem:[#allocation3 + $0x6a] sm:$0xff] }
 0x3bc   : > { %10556 = vmatprep.mubr.f32.mxu1 %v5042_v63  ;;  %11571 = vmatpush3.bf16.msra.mxu1 %v11568_v35  ;;  %v11596_v35 = vpack.c.bf16 %v8619_v3, %v8618_v52  ;;  %v8622_v63 = vld [vmem:[%s15649_s3 + $0x200] sm:$0xff] }
 0x3bd   : > { %11573 = vmatprep.subr.bf16.mxu1 %v11572_v57  ;;  %v8638_v3 = vld [vmem:[%s15649_s3 + $0x280] sm:$0xff] }
 0x3bf   : > { %10557 = vmatmul.mubr.f32.gmra.mrb[16].mxu1 %v5043_v2  ;;  %v8623_v2 = vld [vmem:[%s15649_s3 + $0x208] sm:$0xff] }
 0x3c0   : > { %10559 = vmatprep.mubr.f32.mxu1 %v5044_v17  ;;  %v15078_v17 = vld [vmem:[#allocation3 + $0x72] sm:$0xff] }
 0x3c3   : > { %10560 = vmatmul.mubr.f32.gmra.mrb[18].mxu1 %v5045_v39  ;;  %v11604_v39 = vpack.c.bf16 %v8623_v2, %v8622_v63  ;;  %v6245_v63 = vld [vmem:[#allocation3 + $0x1b] sm:$0xff] }
 0x3c4   : > { %10562 = vmatprep.mubr.f32.mxu1 %v5046_v29  ;;  %v15081_v29 = vld [vmem:[#allocation3 + $0x7a] sm:$0xff] }
 0x3c5   : > { %v8642_v2 = vld [vmem:[%s15649_s3 + $0x2a0] sm:$0xff] }
 0x3c7   : > { %10563 = vmatmul.mubr.f32.gmra.mrb[20].mxu1 %v5047_v19  ;;  %v15084_v19 = vld [vmem:[#allocation3 + $0x82] sm:$0xff] }
 0x3c8   : > { %10565 = vmatprep.mubr.f32.mxu1 %v5048_v28  ;;  %v15087_v28 = vld [vmem:[#allocation3 + $0x8a] sm:$0xff] }
 0x3cb   : > { %10566 = vmatmul.mubr.f32.gmra.mrb[22].mxu1 %v5049_v41  ;;  %v15090_v41 = vld [vmem:[#allocation3 + $0x92] sm:$0xff] }
 0x3cc   : > { %10568 = vmatprep.mubr.f32.mxu1 %v5050_v6  ;;  %v15093_v6 = vld [vmem:[#allocation3 + $0x9a] sm:$0xff] }
 0x3cf   : > { %10569 = vmatmul.mubr.f32.gmra.mrb[24].mxu1 %v5051_v23  ;;  %v15096_v23 = vld [vmem:[#allocation3 + $0xa2] sm:$0xff] }
 0x3d0   : > { %10571 = vmatprep.mubr.f32.mxu1 %v5052_v31  ;;  %v15099_v31 = vld [vmem:[#allocation3 + $0xaa] sm:$0xff] }
 0x3d3   : > { %10572 = vmatmul.mubr.f32.gmra.mrb[26].mxu1 %v5053_v8  ;;  %v15102_v8 = vld [vmem:[#allocation3 + $0xb2] sm:$0xff] }
 0x3d4   : > { %10574 = vmatprep.mubr.f32.mxu1 %v5054_v24  ;;  %v15105_v24 = vld [vmem:[#allocation3 + $0xba] sm:$0xff] }
 0x3d7   : > { %10575 = vmatmul.mubr.f32.gmra.mrb[28].mxu1 %v5055_v55  ;;  %v15108_v55 = vld [vmem:[#allocation3 + $0xc2] sm:$0xff] }
 0x3d8   : > { %10577 = vmatprep.mubr.f32.mxu1 %v5056_v20  ;;  %v15111_v20 = vld [vmem:[#allocation3 + $0xca] sm:$0xff] }
 0x3db   : > { %10578 = vmatmul.mubr.f32.gmra.mrb[30].mxu1 %v5057_v0  ;;  %v15114_v0 = vld [vmem:[#allocation3 + $0xd2] sm:$0xff] }
 0x3dc   : > { %10580 = vmatprep.mubr.f32.mxu1 %v5058_v5  ;;  %v15117_v5 = vld [vmem:[#allocation3 + $0xda] sm:$0xff] }
 0x3df   : > { %10581 = vmatmul.mubr.f32.gmra.mrb[32].mxu1 %v5059_v47  ;;  %v15120_v47 = vld [vmem:[#allocation3 + $0xe2] sm:$0xff] }
 0x3e0   : > { %10583 = vmatprep.mubr.f32.mxu1 %v5060_v61  ;;  %v15123_v61 = vld [vmem:[#allocation3 + $0xea] sm:$0xff] }
 0x3e3   : > { %10584 = vmatmul.mubr.f32.gmra.mrb[34].mxu1 %v5061_v45  ;;  %v15129_v45 = vld [vmem:[#allocation3 + $0xfa] sm:$0xff] }
 0x3e4   : > { %10618 = vmatprep.mubr.f32.mxu1 %v5432_v25  ;;  %v15126_v25 = vld [vmem:[#allocation3 + $0xf2] sm:$0xff] }
 0x3e7   : > { %10619 = vmatmul.mubr.f32.vlgmr.msra.gmra.mrb[0].mxu1 %v5433_v44  ;;  %v15138_v44 = vld [vmem:[#allocation3 + $0x112] sm:$0xff] }
 0x3e8   : > { %10621 = vmatprep.mubr.f32.mxu1 %v15006_v9  ;;  %11575 = vmatpush3.bf16.msra.mxu1 %v11572_v57  ;;  %v11600_v57 = vpack.c.bf16 %v8621_v1, %v8620_v4  ;;  %v5873_v4 = vld [vmem:[#allocation3 + $0x12a] sm:$0xff] }
 0x3e9   : > { %11577 = vmatprep.subr.bf16.mxu1 %v11576_v51  ;;  %v8640_v1 = vld [vmem:[%s15649_s3 + $0x290] sm:$0xff] }
 0x3eb   : > { %10622 = vmatmul.mubr.f32.gmra.mrb[2].mxu1 %v15009_v30 }
 0x3ec   : > { %10624 = vmatprep.mubr.f32.mxu1 %v15018_v46  ;;  %11579 = vmatpush3.bf16.msra.mxu1 %v11576_v51  ;;  %v15141_v51 = vld [vmem:[#allocation3 + $0x11a] sm:$0xff] }
 0x3ed   : > { %11581 = vmatprep.subr.bf16.mxu1 %v11580_v50 }
 0x3ef   : > { %10625 = vmatmul.mubr.f32.gmra.mrb[4].mxu1 %v15021_v27 }
 0x3f0   : > { %10627 = vmatprep.mubr.f32.mxu1 %v15030_v53  ;;  %11583 = vmatpush3.bf16.msra.mxu1 %v11580_v50  ;;  %v11608_v50 = vpack.c.bf16 %v8625_v16, %v8624_v13  ;;  %v6255_v13 = vld [vmem:[#allocation3 + $0x6b] sm:$0xff] }
 0x3f1   : > { %11585 = vmatprep.subr.bf16.mxu1 %v11584_v22  ;;  %v8652_v16 = vld [vmem:[%s15649_s3 + $0x2f0] sm:$0xff] }
 0x3f3   : > { %10628 = vmatmul.mubr.f32.gmra.mrb[6].mxu1 %v15033_v36 }
 0x3f4   : > { %10630 = vmatprep.mubr.f32.mxu1 %v15042_v33  ;;  %11587 = vmatpush3.bf16.msra.mxu1 %v11584_v22  ;;  %v11612_v22 = vpack.c.bf16 %v8627_v12, %v8626_v7  ;;  %v6256_v7 = vld [vmem:[#allocation3 + $0x73] sm:$0xff] }
 0x3f5   : > { %11589 = vmatprep.subr.bf16.mxu1 %v11588_v54 }
 0x3f7   : > { %10631 = vmatmul.mubr.f32.gmra.mrb[8].mxu1 %v15045_v14 }
 0x3f8   : > { %10633 = vmatprep.mubr.f32.mxu1 %v15054_v43  ;;  %11591 = vmatpush3.bf16.msra.mxu1 %v11588_v54  ;;  %v8633_v54 = vld [vmem:[%s15649_s3 + $0x258] sm:$0xff] }
 0x3f9   : > { %11593 = vmatprep.subr.bf16.mxu1 %v11592_v59 }
 0x3fb   : > { %10634 = vmatmul.mubr.f32.gmra.mrb[10].mxu1 %v15057_v48 }
 0x3fc   : > { %10636 = vmatprep.mubr.f32.mxu1 %v15066_v18  ;;  %11595 = vmatpush3.bf16.msra.mxu1 %v11592_v59  ;;  %v8636_v59 = vld [vmem:[%s15649_s3 + $0x270] sm:$0xff] }
 0x3fd   : > { %11597 = vmatprep.subr.bf16.mxu1 %v11596_v35 }
 0x3ff   : > { %10637 = vmatmul.mubr.f32.gmra.mrb[12].mxu1 %v15069_v32 }
 0x400   : > { %10639 = vmatprep.mubr.f32.mxu1 %v15078_v17  ;;  %11599 = vmatpush3.bf16.msra.mxu1 %v11596_v35 }
 0x401   : > { %11601 = vmatprep.subr.bf16.mxu1 %v11600_v57 }
 0x403   : > { %10640 = vmatmul.mubr.f32.gmra.mrb[14].mxu1 %v15081_v29 }
 0x404   : > { %10642 = vmatprep.mubr.f32.mxu1 %v15084_v19  ;;  %11603 = vmatpush3.bf16.msra.mxu1 %v11600_v57  ;;  %v6244_v57 = vld [vmem:[#allocation3 + $0x13] sm:$0xff] }
 0x405   : > { %11605 = vmatprep.subr.bf16.mxu1 %v11604_v39 }
 0x407   : > { %10643 = vmatmul.mubr.f32.gmra.mrb[16].mxu1 %v15087_v28 }
 0x408   : > { %10645 = vmatprep.mubr.f32.mxu1 %v15090_v41 }
 0x40b   : > { %10646 = vmatmul.mubr.f32.gmra.mrb[18].mxu1 %v15093_v6 }
 0x40c   : > { %10648 = vmatprep.mubr.f32.mxu1 %v15096_v23 }
 0x40f   : > { %10649 = vmatmul.mubr.f32.gmra.mrb[20].mxu1 %v15099_v31 }
 0x410   : > { %10651 = vmatprep.mubr.f32.mxu1 %v15102_v8 }
 0x413   : > { %10652 = vmatmul.mubr.f32.gmra.mrb[22].mxu1 %v15105_v24 }
 0x414   : > { %10654 = vmatprep.mubr.f32.mxu1 %v15108_v55 }
 0x417   : > { %10655 = vmatmul.mubr.f32.gmra.mrb[24].mxu1 %v15111_v20 }
 0x418   : > { %10657 = vmatprep.mubr.f32.mxu1 %v15114_v0 }
 0x41b   : > { %10658 = vmatmul.mubr.f32.gmra.mrb[26].mxu1 %v15117_v5 }
 0x41c   : > { %10660 = vmatprep.mubr.f32.mxu1 %v15120_v47 }
 0x41f   : > { %10661 = vmatmul.mubr.f32.gmra.mrb[28].mxu1 %v15123_v61 }
 0x420   : > { %10663 = vmatprep.mubr.f32.mxu1 %v15126_v25 }
 0x423   : > { %10664 = vmatmul.mubr.f32.gmra.mrb[30].mxu1 %v15129_v45 }
 0x424   : > { %10666 = vmatprep.mubr.f32.mxu1 %v15132_v26 }
 0x427   : > { %10667 = vmatmul.mubr.f32.gmra.mrb[32].mxu1 %v15135_v58 }
 0x428   : > { %10669 = vmatprep.mubr.f32.mxu1 %v15138_v44 }
 0x42b   : > { %10670 = vmatmul.mubr.f32.gmra.mrb[34].mxu1 %v15141_v51 }
 0x42c   : > { %10704 = vmatprep.mubr.f32.mxu1 %v15006_v9  ;;  %v8628_v9 = vld [vmem:[%s15649_s3 + $0x230] sm:$0xff] }
 0x42f   : > { %10705 = vmatmul.mubr.f32.vlgmr.msra.gmra.mrb[0].mxu1 %v15009_v30  ;;  %v11616_v30 = vpack.c.bf16 %v8629_v10, %v8628_v9  ;;  %v8654_v9 = vld [vmem:[%s15649_s3 + $0x300] sm:$0xff]  ;;  %v8655_v10 = vld [vmem:[%s15649_s3 + $0x308] sm:$0xff] }
 0x430   : > { %10707 = vmatprep.mubr.f32.mxu1 %v15018_v46  ;;  %11607 = vmatpush3.bf16.msra.mxu1 %v11604_v39  ;;  %v8630_v46 = vld [vmem:[%s15649_s3 + $0x240] sm:$0xff] }
 0x431   : > { %11609 = vmatprep.subr.bf16.mxu1 %v11608_v50  ;;  %v6246_v39 = vld [vmem:[#allocation3 + $0x23] sm:$0xff] }
 0x433   : > { %10708 = vmatmul.mubr.f32.gmra.mrb[2].mxu1 %v15021_v27  ;;  %v11620_v27 = vpack.c.bf16 %v8631_v15, %v8630_v46  ;;  %v11668_v46 = vpack.c.bf16 %v8655_v10, %v8654_v9  ;;  %v6259_v15 = vld [vmem:[#allocation3 + $0x8b] sm:$0xff] }
 0x434   : > { %10710 = vmatprep.mubr.f32.mxu1 %v15030_v53  ;;  %11611 = vmatpush3.bf16.msra.mxu1 %v11608_v50  ;;  %v8632_v53 = vld [vmem:[%s15649_s3 + $0x250] sm:$0xff]  ;;  %v8653_v50 = vld [vmem:[%s15649_s3 + $0x2f8] sm:$0xff]  ;;  %v15382_v9 = vld [vmem:[#allocation3 + $0xa4] sm:$0xff] }
 0x435   : > { %11613 = vmatprep.subr.bf16.mxu1 %v11612_v22  ;;  %v11664_v12 = vpack.c.bf16 %v8653_v50, %v8652_v16  ;;  %v15370_v16 = vld [vmem:[#allocation3 + $0x84] sm:$0xff]  ;;  %v15385_v10 = vld [vmem:[#allocation3 + $0xac] sm:$0xff] }
 0x437   : > { %10711 = vmatmul.mubr.f32.gmra.mrb[4].mxu1 %v15033_v36  ;;  %v11624_v36 = vpack.c.bf16 %v8633_v54, %v8632_v53  ;;  %v6261_v53 = vld [vmem:[#allocation3 + $0x9b] sm:$0xff]  ;;  %v6262_v54 = vld [vmem:[#allocation3 + $0xa3] sm:$0xff] }
 0x438   : > { %10713 = vmatprep.mubr.f32.mxu1 %v15042_v33  ;;  %11615 = vmatpush3.bf16.msra.mxu1 %v11612_v22  ;;  %v11628_v33 = vpack.c.bf16 %v8635_v21, %v8634_v56  ;;  %v6257_v22 = vld [vmem:[#allocation3 + $0x7b] sm:$0xff]  ;;  %v6264_v56 = vld [vmem:[#allocation3 + $0xb3] sm:$0xff] }
 0x439   : > { %11617 = vmatprep.subr.bf16.mxu1 %v11616_v30  ;;  %v6265_v21 = vld [vmem:[#allocation3 + $0xbb] sm:$0xff] }
 0x43b   : > { %10714 = vmatmul.mubr.f32.gmra.mrb[6].mxu1 %v15045_v14  ;;  %v8637_v14 = vld [vmem:[%s15649_s3 + $0x278] sm:$0xff] }
 0x43c   : > { %10716 = vmatprep.mubr.f32.mxu1 %v15054_v43  ;;  %11619 = vmatpush3.bf16.msra.mxu1 %v11616_v30  ;;  %v11632_v52 = vpack.c.bf16 %v8637_v14, %v8636_v59  ;;  %v8639_v43 = vld [vmem:[%s15649_s3 + $0x288] sm:$0xff]  ;;  %v6268_v14 = vld [vmem:[#allocation3 + $0xd3] sm:$0xff] }
 0x43d   : > { %11621 = vmatprep.subr.bf16.mxu1 %v11620_v27  ;;  %v11636_v35 = vpack.c.bf16 %v8639_v43, %v8638_v3  ;;  %v6258_v30 = vld [vmem:[#allocation3 + $0x83] sm:$0xff]  ;;  %v6267_v59 = vld [vmem:[#allocation3 + $0xcb] sm:$0xff] }
 0x43e   : > { %v6270_v3 = vld [vmem:[#allocation3 + $0xe3] sm:$0xff]  ;;  %v6271_v43 = vld [vmem:[#allocation3 + $0xeb] sm:$0xff] }
 0x43f   : > { %10717 = vmatmul.mubr.f32.gmra.mrb[8].mxu1 %v15057_v48  ;;  %v5872_v48 = vld [vmem:[#allocation3 + $0x122] sm:$0xff] }
 0x440   : > { %10719 = vmatprep.mubr.f32.mxu1 %v15066_v18  ;;  %11623 = vmatpush3.bf16.msra.mxu1 %v11620_v27  ;;  %v8641_v18 = vld [vmem:[%s15649_s3 + $0x298] sm:$0xff] }
 0x441   : > { %11625 = vmatprep.subr.bf16.mxu1 %v11624_v36  ;;  %v6260_v27 = vld [vmem:[#allocation3 + $0x93] sm:$0xff] }
 0x443   : > { %10720 = vmatmul.mubr.f32.gmra.mrb[10].mxu1 %v15069_v32  ;;  %v11640_v32 = vpack.c.bf16 %v8641_v18, %v8640_v1  ;;  %v6275_v1 = vld [vmem:[#allocation3 + $0x10b] sm:$0xff]  ;;  %v6277_v18 = vld [vmem:[#allocation3 + $0x11b] sm:$0xff] }
 0x444   : > { %10722 = vmatprep.mubr.f32.mxu1 %v15078_v17  ;;  %11627 = vmatpush3.bf16.msra.mxu1 %v11624_v36  ;;  %v8643_v17 = vld [vmem:[%s15649_s3 + $0x2a8] sm:$0xff] }
 0x445   : > { %11629 = vmatprep.subr.bf16.mxu1 %v11628_v33  ;;  %v6263_v36 = vld [vmem:[#allocation3 + $0xab] sm:$0xff] }
 0x447   : > { %10723 = vmatmul.mubr.f32.gmra.mrb[12].mxu1 %v15081_v29  ;;  %v11644_v29 = vpack.c.bf16 %v8643_v17, %v8642_v2  ;;  %v15310_v2 = vld [vmem:[#allocation3 + $0x34] sm:$0xff] }
 0x448   : > { %10725 = vmatprep.mubr.f32.mxu1 %v15084_v19  ;;  %11631 = vmatpush3.bf16.msra.mxu1 %v11628_v33  ;;  %v6247_v19 = vld [vmem:[#allocation3 + $0x2b] sm:$0xff]  ;;  %v6266_v33 = vld [vmem:[#allocation3 + $0xc3] sm:$0xff] }
 0x449   : > { %11633 = vmatprep.subr.bf16.mxu1 %v11632_v52 }
 0x44b   : > { %10726 = vmatmul.mubr.f32.gmra.mrb[14].mxu1 %v15087_v28  ;;  %v8644_v28 = vld [vmem:[%s15649_s3 + $0x2b0] sm:$0xff] }
 0x44c   : > { %10728 = vmatprep.mubr.f32.mxu1 %v15090_v41  ;;  %11635 = vmatpush3.bf16.msra.mxu1 %v11632_v52  ;;  %v8645_v41 = vld [vmem:[%s15649_s3 + $0x2b8] sm:$0xff] }
 0x44d   : > { %11637 = vmatprep.subr.bf16.mxu1 %v11636_v35  ;;  %v6269_v52 = vld [vmem:[#allocation3 + $0xdb] sm:$0xff] }
 0x44f   : > { %10729 = vmatmul.mubr.f32.gmra.mrb[16].mxu1 %v15093_v6  ;;  %v6248_v6 = vld [vmem:[#allocation3 + $0x33] sm:$0xff] }
 0x450   : > { %10731 = vmatprep.mubr.f32.mxu1 %v15096_v23  ;;  %v11648_v23 = vpack.c.bf16 %v8645_v41, %v8644_v28  ;;  %v15322_v28 = vld [vmem:[#allocation3 + $0x44] sm:$0xff] }
 0x453   : > { %10732 = vmatmul.mubr.f32.gmra.mrb[18].mxu1 %v15099_v31  ;;  %v6249_v31 = vld [vmem:[#allocation3 + $0x3b] sm:$0xff] }
 0x454   : > { %10734 = vmatprep.mubr.f32.mxu1 %v15102_v8  ;;  %v8646_v8 = vld [vmem:[%s15649_s3 + $0x2c0] sm:$0xff] }
 0x457   : > { %10735 = vmatmul.mubr.f32.gmra.mrb[20].mxu1 %v15105_v24  ;;  %v8647_v24 = vld [vmem:[%s15649_s3 + $0x2c8] sm:$0xff] }
 0x458   : > { %10737 = vmatprep.mubr.f32.mxu1 %v15108_v55  ;;  %v6250_v55 = vld [vmem:[#allocation3 + $0x43] sm:$0xff] }
 0x45b   : > { %10738 = vmatmul.mubr.f32.gmra.mrb[22].mxu1 %v15111_v20  ;;  %v11652_v20 = vpack.c.bf16 %v8647_v24, %v8646_v8  ;;  %v15334_v8 = vld [vmem:[#allocation3 + $0x54] sm:$0xff] }
 0x45c   : > { %10740 = vmatprep.mubr.f32.mxu1 %v15114_v0  ;;  %v6251_v0 = vld [vmem:[#allocation3 + $0x4b] sm:$0xff] }
 0x45f   : > { %10741 = vmatmul.mubr.f32.gmra.mrb[24].mxu1 %v15117_v5  ;;  %v8648_v5 = vld [vmem:[%s15649_s3 + $0x2d0] sm:$0xff] }
 0x460   : > { %10743 = vmatprep.mubr.f32.mxu1 %v15120_v47  ;;  %v8649_v47 = vld [vmem:[%s15649_s3 + $0x2d8] sm:$0xff] }
 0x463   : > { %10744 = vmatmul.mubr.f32.gmra.mrb[26].mxu1 %v15123_v61  ;;  %v6252_v61 = vld [vmem:[#allocation3 + $0x53] sm:$0xff] }
 0x464   : > { %10746 = vmatprep.mubr.f32.mxu1 %v15126_v25  ;;  %v11656_v25 = vpack.c.bf16 %v8649_v47, %v8648_v5  ;;  %v15346_v5 = vld [vmem:[#allocation3 + $0x64] sm:$0xff] }
 0x467   : > { %10747 = vmatmul.mubr.f32.gmra.mrb[28].mxu1 %v15129_v45  ;;  %v6253_v45 = vld [vmem:[#allocation3 + $0x5b] sm:$0xff] }
 0x468   : > { %10749 = vmatprep.mubr.f32.mxu1 %v15132_v26  ;;  %v8650_v26 = vld [vmem:[%s15649_s3 + $0x2e0] sm:$0xff] }
 0x46b   : > { %10750 = vmatmul.mubr.f32.gmra.mrb[30].mxu1 %v15135_v58  ;;  %v8651_v58 = vld [vmem:[%s15649_s3 + $0x2e8] sm:$0xff] }
 0x46c   : > { %10752 = vmatprep.mubr.f32.mxu1 %v15138_v44  ;;  %v6254_v44 = vld [vmem:[#allocation3 + $0x63] sm:$0xff] }
 0x46f   : > { %10753 = vmatmul.mubr.f32.gmra.mrb[32].mxu1 %v15141_v51  ;;  %v11660_v51 = vpack.c.bf16 %v8651_v58, %v8650_v26  ;;  %v15358_v26 = vld [vmem:[#allocation3 + $0x74] sm:$0xff] }
 0x470   : > { %10755 = vmatprep.mubr.f32.mxu1 %v5872_v48  ;;  %v6273_v48 = vld [vmem:[#allocation3 + $0xfb] sm:$0xff] }
 0x473   : > { %10756 = vmatmul.mubr.f32.gmra.mrb[34].mxu1 %v5873_v4  ;;  %v6274_v4 = vld [vmem:[#allocation3 + $0x103] sm:$0xff] }
 0x474   : > { %10790 = vmatprep.mubr.f32.mxu1 %v6244_v57  ;;  %v8656_v57 = vld [vmem:[%s15649_s3 + $0x310] sm:$0xff] }
 0x477   : > { %10791 = vmatmul.mubr.f32.vlgmr.msra.gmra.mrb[0].mxu1 %v6245_v63  ;;  %v8661_v63 = vld [vmem:[%s15649_s3 + $0x338] sm:$0xff] }
 0x478   : > { %10793 = vmatprep.mubr.f32.mxu1 %v6246_v39  ;;  %11639 = vmatpush3.bf16.msra.mxu1 %v11636_v35  ;;  %v6272_v35 = vld [vmem:[#allocation3 + $0xf3] sm:$0xff]  ;;  %v15313_v39 = vld [vmem:[#allocation3 + $0x3c] sm:$0xff] }
 0x479   : > { %11641 = vmatprep.subr.bf16.mxu1 %v11640_v32 }
 0x47b   : > { %10794 = vmatmul.mubr.f32.gmra.mrb[2].mxu1 %v6247_v19  ;;  %v8663_v19 = vld [vmem:[%s15649_s3 + $0x348] sm:$0xff] }
 0x47c   : > { %10796 = vmatprep.mubr.f32.mxu1 %v6248_v6  ;;  %11643 = vmatpush3.bf16.msra.mxu1 %v11640_v32  ;;  %v8657_v32 = vld [vmem:[%s15649_s3 + $0x318] sm:$0xff]  ;;  %v15325_v6 = vld [vmem:[#allocation3 + $0x4c] sm:$0xff] }
 0x47d   : > { %11645 = vmatprep.subr.bf16.mxu1 %v11644_v29  ;;  %v11672_v40 = vpack.c.bf16 %v8657_v32, %v8656_v57  ;;  %v8675_v57 = vld [vmem:[%s15649_s3 + $0x3a8] sm:$0xff] }
 0x47f   : > { %10797 = vmatmul.mubr.f32.gmra.mrb[4].mxu1 %v6249_v31  ;;  %v8665_v31 = vld [vmem:[%s15649_s3 + $0x358] sm:$0xff] }
 0x480   : > { %10799 = vmatprep.mubr.f32.mxu1 %v6250_v55  ;;  %11647 = vmatpush3.bf16.msra.mxu1 %v11644_v29  ;;  %v8662_v29 = vld [vmem:[%s15649_s3 + $0x340] sm:$0xff] }
 0x481   : > { %11649 = vmatprep.subr.bf16.mxu1 %v11648_v23  ;;  %v11684_v41 = vpack.c.bf16 %v8663_v19, %v8662_v29  ;;  %v15337_v55 = vld [vmem:[#allocation3 + $0x5c] sm:$0xff] }
 0x482   : > { %v8685_v29 = vld [vmem:[%s15649_s3 + $0x3f8] sm:$0xff] }
 0x483   : > { %10800 = vmatmul.mubr.f32.gmra.mrb[6].mxu1 %v6251_v0  ;;  %v8667_v0 = vld [vmem:[%s15649_s3 + $0x368] sm:$0xff] }
 0x484   : > { %10802 = vmatprep.mubr.f32.mxu1 %v6252_v61  ;;  %11651 = vmatpush3.bf16.msra.mxu1 %v11648_v23  ;;  %v8664_v23 = vld [vmem:[%s15649_s3 + $0x350] sm:$0xff] }
 0x485   : > { %11653 = vmatprep.subr.bf16.mxu1 %v11652_v20  ;;  %v11688_v24 = vpack.c.bf16 %v8665_v31, %v8664_v23  ;;  %v15349_v61 = vld [vmem:[#allocation3 + $0x6c] sm:$0xff]  ;;  %v7090_v23 = vld [vmem:[#allocation3 + $0x134] sm:$0xff]  ;;  %v7091_v31 = vld [vmem:[#allocation3 + $0x13c] sm:$0xff] }
 0x487   : > { %10803 = vmatmul.mubr.f32.gmra.mrb[8].mxu1 %v6253_v45  ;;  %v8669_v45 = vld [vmem:[%s15649_s3 + $0x378] sm:$0xff] }
 0x488   : > { %10805 = vmatprep.mubr.f32.mxu1 %v6254_v44  ;;  %11655 = vmatpush3.bf16.msra.mxu1 %v11652_v20  ;;  %v8666_v20 = vld [vmem:[%s15649_s3 + $0x360] sm:$0xff] }
 0x489   : > { %11657 = vmatprep.subr.bf16.mxu1 %v11656_v25  ;;  %v11692_v47 = vpack.c.bf16 %v8667_v0, %v8666_v20  ;;  %v15361_v44 = vld [vmem:[#allocation3 + $0x7c] sm:$0xff]  ;;  %v7463_v0 = vld [vmem:[#allocation3 + $0x2d] sm:$0xff] }
 0x48b   : > { %10806 = vmatmul.mubr.f32.gmra.mrb[10].mxu1 %v6255_v13  ;;  %v8671_v13 = vld [vmem:[%s15649_s3 + $0x388] sm:$0xff] }
 0x48c   : > { %10808 = vmatprep.mubr.f32.mxu1 %v6256_v7  ;;  %11659 = vmatpush3.bf16.msra.mxu1 %v11656_v25  ;;  %v8668_v25 = vld [vmem:[%s15649_s3 + $0x370] sm:$0xff] }
 0x48d   : > { %11661 = vmatprep.subr.bf16.mxu1 %v11660_v51  ;;  %v11696_v58 = vpack.c.bf16 %v8669_v45, %v8668_v25  ;;  %v15373_v7 = vld [vmem:[#allocation3 + $0x8c] sm:$0xff]  ;;  %v7465_v45 = vld [vmem:[#allocation3 + $0x3d] sm:$0xff] }
 0x48f   : > { %10809 = vmatmul.mubr.f32.gmra.mrb[12].mxu1 %v6257_v22  ;;  %v15379_v22 = vld [vmem:[#allocation3 + $0x9c] sm:$0xff] }
 0x490   : > { %10811 = vmatprep.mubr.f32.mxu1 %v6258_v30  ;;  %11663 = vmatpush3.bf16.msra.mxu1 %v11660_v51  ;;  %v8670_v51 = vld [vmem:[%s15649_s3 + $0x380] sm:$0xff]  ;;  %v15388_v30 = vld [vmem:[#allocation3 + $0xb4] sm:$0xff] }
 0x491   : > { %11665 = vmatprep.subr.bf16.mxu1 %v11664_v12  ;;  %v11700_v50 = vpack.c.bf16 %v8671_v13, %v8670_v51  ;;  %v7467_v13 = vld [vmem:[#allocation3 + $0x4d] sm:$0xff] }
 0x493   : > { %10812 = vmatmul.mubr.f32.gmra.mrb[14].mxu1 %v6259_v15  ;;  %v15394_v15 = vld [vmem:[#allocation3 + $0xc4] sm:$0xff] }
 0x494   : > { %10814 = vmatprep.mubr.f32.mxu1 %v6260_v27  ;;  %11667 = vmatpush3.bf16.msra.mxu1 %v11664_v12  ;;  %v15376_v12 = vld [vmem:[#allocation3 + $0x94] sm:$0xff]  ;;  %v15397_v27 = vld [vmem:[#allocation3 + $0xcc] sm:$0xff] }
 0x495   : > { %11669 = vmatprep.subr.bf16.mxu1 %v11668_v46 }
 0x497   : > { %10815 = vmatmul.mubr.f32.gmra.mrb[16].mxu1 %v6261_v53  ;;  %v15400_v53 = vld [vmem:[#allocation3 + $0xd4] sm:$0xff] }
 0x498   : > { %10817 = vmatprep.mubr.f32.mxu1 %v6262_v54  ;;  %v15403_v54 = vld [vmem:[#allocation3 + $0xdc] sm:$0xff] }
 0x49b   : > { %10818 = vmatmul.mubr.f32.gmra.mrb[18].mxu1 %v6263_v36  ;;  %v15406_v36 = vld [vmem:[#allocation3 + $0xe4] sm:$0xff] }
 0x49c   : > { %10820 = vmatprep.mubr.f32.mxu1 %v6264_v56  ;;  %v15409_v56 = vld [vmem:[#allocation3 + $0xec] sm:$0xff] }
 0x49f   : > { %10821 = vmatmul.mubr.f32.gmra.mrb[20].mxu1 %v6265_v21  ;;  %v15412_v21 = vld [vmem:[#allocation3 + $0xf4] sm:$0xff] }
 0x4a0   : > { %10823 = vmatprep.mubr.f32.mxu1 %v6266_v33  ;;  %v15415_v33 = vld [vmem:[#allocation3 + $0xfc] sm:$0xff] }
 0x4a3   : > { %10824 = vmatmul.mubr.f32.gmra.mrb[22].mxu1 %v6267_v59  ;;  %v15418_v59 = vld [vmem:[#allocation3 + $0x104] sm:$0xff] }
 0x4a4   : > { %10826 = vmatprep.mubr.f32.mxu1 %v6268_v14  ;;  %v15421_v14 = vld [vmem:[#allocation3 + $0x10c] sm:$0xff] }
 0x4a7   : > { %10827 = vmatmul.mubr.f32.gmra.mrb[24].mxu1 %v6269_v52  ;;  %v15424_v52 = vld [vmem:[#allocation3 + $0x114] sm:$0xff] }
 0x4a8   : > { %10829 = vmatprep.mubr.f32.mxu1 %v6270_v3  ;;  %v15427_v3 = vld [vmem:[#allocation3 + $0x11c] sm:$0xff] }
 0x4ab   : > { %10830 = vmatmul.mubr.f32.gmra.mrb[26].mxu1 %v6271_v43  ;;  %v15430_v43 = vld [vmem:[#allocation3 + $0x124] sm:$0xff] }
 0x4ac   : > { %10832 = vmatprep.mubr.f32.mxu1 %v6272_v35  ;;  %v15433_v35 = vld [vmem:[#allocation3 + $0x12c] sm:$0xff] }
 0x4af   : > { %10833 = vmatmul.mubr.f32.gmra.mrb[28].mxu1 %v6273_v48  ;;  %v8672_v48 = vld [vmem:[%s15649_s3 + $0x390] sm:$0xff] }
 0x4b0   : > { %10835 = vmatprep.mubr.f32.mxu1 %v6274_v4  ;;  %v8673_v4 = vld [vmem:[%s15649_s3 + $0x398] sm:$0xff] }
 0x4b3   : > { %10836 = vmatmul.mubr.f32.gmra.mrb[30].mxu1 %v6275_v1  ;;  %v11704_v1 = vpack.c.bf16 %v8673_v4, %v8672_v48  ;;  %v7479_v48 = vld [vmem:[#allocation3 + $0xad] sm:$0xff]  ;;  %v7480_v4 = vld [vmem:[#allocation3 + $0xb5] sm:$0xff] }
 0x4b4   : > { %12495 = vmatprep.mubr.msk.f32.mxu1 %vm14906_vm4, %v4530_v37  ;;  %v6651_v37 = vld [vmem:[#allocation3 + $0x1c] sm:$0xff] }
 0x4b7   : > { %10839 = vmatmul.mubr.f32.gmra.mrb[32].mxu1 %v6277_v18  ;;  %v8674_v18 = vld [vmem:[%s15649_s3 + $0x3a0] sm:$0xff] }
 0x4b8   : > { %12496 = vmatprep.mubr.msk.f32.mxu1 %vm14932_vm7, %v4532_v11  ;;  %v15298_v11 = vld [vmem:[#allocation3 + $0x24] sm:$0xff]  ;;  %v11708_v32 = vpack.c.bf16 %v8675_v57, %v8674_v18  ;;  %v7483_v57 = vld [vmem:[#allocation3 + $0xcd] sm:$0xff] }
 0x4b9   : > { %v7482_v18 = vld [vmem:[#allocation3 + $0xc5] sm:$0xff] }
 0x4bb   : > { %12497 = vmatmul.mubr.msk.f32.gmra.mrb[34].mxu1 %vm14924_vm2, %v4533_v38  ;;  %v8660_v38 = vld [vmem:[%s15649_s3 + $0x330] sm:$0xff] }
 0x4bc   : > { %10876 = vmatprep.mubr.f32.mxu1 %v6650_v42  ;;  %v11680_v17 = vpack.c.bf16 %v8661_v63, %v8660_v38  ;;  %v8676_v42 = vld [vmem:[%s15649_s3 + $0x3b0] sm:$0xff]  ;;  %v8682_v63 = vld [vmem:[%s15649_s3 + $0x3e0] sm:$0xff] }
 0x4bf   : > { %10877 = vmatmul.mubr.f32.vlgmr.msra.gmra.mrb[0].mxu1 %v6651_v37 }
 0x4c0   : > { %10879 = vmatprep.mubr.f32.mxu1 %v15298_v11  ;;  %11671 = vmatpush3.bf16.msra.mxu1 %v11668_v46  ;;  %v15391_v46 = vld [vmem:[#allocation3 + $0xbc] sm:$0xff] }
 0x4c1   : > { %11673 = vmatprep.subr.bf16.mxu1 %v11672_v40 }
 0x4c3   : > { %10880 = vmatmul.mubr.f32.gmra.mrb[2].mxu1 %v15301_v60 }
 0x4c4   : > { %10882 = vmatprep.mubr.f32.mxu1 %v15310_v2  ;;  %11675 = vmatpush3.bf16.msra.mxu1 %v11672_v40  ;;  %v8677_v40 = vld [vmem:[%s15649_s3 + $0x3b8] sm:$0xff] }
 0x4c5   : > { %11677 = vmatprep.subr.bf16.mxu1 %v11676_v49  ;;  %v11712_v37 = vpack.c.bf16 %v8677_v40, %v8676_v42  ;;  %v7485_v42 = vld [vmem:[#allocation3 + $0xdd] sm:$0xff]  ;;  %v7486_v40 = vld [vmem:[#allocation3 + $0xe5] sm:$0xff] }
 0x4c7   : > { %10883 = vmatmul.mubr.f32.gmra.mrb[4].mxu1 %v15313_v39 }
 0x4c8   : > { %10885 = vmatprep.mubr.f32.mxu1 %v15322_v28  ;;  %11679 = vmatpush3.bf16.msra.mxu1 %v11676_v49  ;;  %v8680_v49 = vld [vmem:[%s15649_s3 + $0x3d0] sm:$0xff] }
 0x4c9   : > { %11681 = vmatprep.subr.bf16.mxu1 %v11680_v17 }
 0x4cb   : > { %10886 = vmatmul.mubr.f32.gmra.mrb[6].mxu1 %v15325_v6 }
 0x4cc   : > { %10888 = vmatprep.mubr.f32.mxu1 %v15334_v8  ;;  %11683 = vmatpush3.bf16.msra.mxu1 %v11680_v17 }
 0x4cd   : > { %11685 = vmatprep.subr.bf16.mxu1 %v11684_v41 }
 0x4cf   : > { %10889 = vmatmul.mubr.f32.gmra.mrb[8].mxu1 %v15337_v55 }
 0x4d0   : > { %10891 = vmatprep.mubr.f32.mxu1 %v15346_v5  ;;  %11687 = vmatpush3.bf16.msra.mxu1 %v11684_v41  ;;  %v8687_v41 = vld [vmem:[%s15649_s3 + $0x408] sm:$0xff] }
 0x4d1   : > { %11689 = vmatprep.subr.bf16.mxu1 %v11688_v24 }
 0x4d3   : > { %10892 = vmatmul.mubr.f32.gmra.mrb[10].mxu1 %v15349_v61 }
 0x4d4   : > { %10894 = vmatprep.mubr.f32.mxu1 %v15358_v26  ;;  %11691 = vmatpush3.bf16.msra.mxu1 %v11688_v24  ;;  %v8689_v24 = vld [vmem:[%s15649_s3 + $0x418] sm:$0xff] }
 0x4d5   : > { %11693 = vmatprep.subr.bf16.mxu1 %v11692_v47 }
 0x4d7   : > { %10895 = vmatmul.mubr.f32.gmra.mrb[12].mxu1 %v15361_v44 }
 0x4d8   : > { %10897 = vmatprep.mubr.f32.mxu1 %v15370_v16  ;;  %11695 = vmatpush3.bf16.msra.mxu1 %v11692_v47  ;;  %v8691_v47 = vld [vmem:[%s15649_s3 + $0x428] sm:$0xff] }
 0x4d9   : > { %11697 = vmatprep.subr.bf16.mxu1 %v11696_v58 }
 0x4db   : > { %10898 = vmatmul.mubr.f32.gmra.mrb[14].mxu1 %v15373_v7 }
 0x4dc   : > { %10900 = vmatprep.mubr.f32.mxu1 %v15376_v12  ;;  %11699 = vmatpush3.bf16.msra.mxu1 %v11696_v58  ;;  %v8693_v58 = vld [vmem:[%s15649_s3 + $0x438] sm:$0xff] }
 0x4dd   : > { %11701 = vmatprep.subr.bf16.mxu1 %v11700_v50 }
 0x4df   : > { %10901 = vmatmul.mubr.f32.gmra.mrb[16].mxu1 %v15379_v22 }
 0x4e0   : > { %10903 = vmatprep.mubr.f32.mxu1 %v15382_v9 }
 0x4e3   : > { %10904 = vmatmul.mubr.f32.gmra.mrb[18].mxu1 %v15385_v10 }
 0x4e4   : > { %10906 = vmatprep.mubr.f32.mxu1 %v15388_v30 }
 0x4e7   : > { %10907 = vmatmul.mubr.f32.gmra.mrb[20].mxu1 %v15391_v46 }
 0x4e8   : > { %10909 = vmatprep.mubr.f32.mxu1 %v15394_v15 }
 0x4eb   : > { %10910 = vmatmul.mubr.f32.gmra.mrb[22].mxu1 %v15397_v27 }
 0x4ec   : > { %10912 = vmatprep.mubr.f32.mxu1 %v15400_v53 }
 0x4ef   : > { %10913 = vmatmul.mubr.f32.gmra.mrb[24].mxu1 %v15403_v54 }
 0x4f0   : > { %10915 = vmatprep.mubr.f32.mxu1 %v15406_v36 }
 0x4f3   : > { %10916 = vmatmul.mubr.f32.gmra.mrb[26].mxu1 %v15409_v56 }
 0x4f4   : > { %10918 = vmatprep.mubr.f32.mxu1 %v15412_v21 }
 0x4f7   : > { %10919 = vmatmul.mubr.f32.gmra.mrb[28].mxu1 %v15415_v33 }
 0x4f8   : > { %10921 = vmatprep.mubr.f32.mxu1 %v15418_v59 }
 0x4fb   : > { %10922 = vmatmul.mubr.f32.gmra.mrb[30].mxu1 %v15421_v14 }
 0x4fc   : > { %10924 = vmatprep.mubr.f32.mxu1 %v15424_v52 }
 0x4ff   : > { %10925 = vmatmul.mubr.f32.gmra.mrb[32].mxu1 %v15427_v3 }
 0x500   : > { %10927 = vmatprep.mubr.f32.mxu1 %v15430_v43 }
 0x503   : > { %10928 = vmatmul.mubr.f32.gmra.mrb[34].mxu1 %v15433_v35 }
 0x504   : > { %10962 = vmatprep.mubr.f32.mxu1 %v15298_v11  ;;  %v11716_v11 = vpack.c.bf16 %v8679_v34, %v8678_v62  ;;  %v7488_v62 = vld [vmem:[#allocation3 + $0xf5] sm:$0xff]  ;;  %v7489_v34 = vld [vmem:[#allocation3 + $0xfd] sm:$0xff] }
 0x507   : > { %10963 = vmatmul.mubr.f32.vlgmr.msra.gmra.mrb[0].mxu1 %v15301_v60  ;;  %v8681_v60 = vld [vmem:[%s15649_s3 + $0x3d8] sm:$0xff] }
 0x508   : > { %10965 = vmatprep.mubr.f32.mxu1 %v15310_v2  ;;  %11703 = vmatpush3.bf16.msra.mxu1 %v11700_v50  ;;  %v11720_v38 = vpack.c.bf16 %v8681_v60, %v8680_v49  ;;  %v8683_v2 = vld [vmem:[%s15649_s3 + $0x3e8] sm:$0xff]  ;;  %v7492_v60 = vld [vmem:[#allocation3 + $0x115] sm:$0xff] }
 0x509   : > { %11705 = vmatprep.subr.bf16.mxu1 %v11704_v1  ;;  %v11724_v17 = vpack.c.bf16 %v8683_v2, %v8682_v63  ;;  %v8695_v50 = vld [vmem:[%s15649_s3 + $0x448] sm:$0xff]  ;;  %v7496_v2 = vld [vmem:[#allocation3 + $0x135] sm:$0xff] }
 0x50a   : > { %v7491_v49 = vld [vmem:[#allocation3 + $0x10d] sm:$0xff]  ;;  %v7494_v63 = vld [vmem:[#allocation3 + $0x125] sm:$0xff] }
 0x50b   : > { %10966 = vmatmul.mubr.f32.gmra.mrb[2].mxu1 %v15313_v39  ;;  %v8684_v39 = vld [vmem:[%s15649_s3 + $0x3f0] sm:$0xff] }
 0x50c   : > { %10968 = vmatprep.mubr.f32.mxu1 %v15322_v28  ;;  %11707 = vmatpush3.bf16.msra.mxu1 %v11704_v1  ;;  %v11728_v19 = vpack.c.bf16 %v8685_v29, %v8684_v39  ;;  %v8686_v28 = vld [vmem:[%s15649_s3 + $0x400] sm:$0xff] }
 0x50d   : > { %11709 = vmatprep.subr.bf16.mxu1 %v11708_v32  ;;  %v7481_v1 = vld [vmem:[#allocation3 + $0xbd] sm:$0xff]  ;;  %v7868_v29 = vld [vmem:[#allocation3 + $0x26] sm:$0xff] }
 0x50e   : > { %v7497_v39 = vld [vmem:[#allocation3 + $0x13d] sm:$0xff] }
 0x50f   : > { %10969 = vmatmul.mubr.f32.gmra.mrb[4].mxu1 %v15325_v6  ;;  %v11732_v6 = vpack.c.bf16 %v8687_v41, %v8686_v28  ;;  %v7870_v28 = vld [vmem:[#allocation3 + $0x36] sm:$0xff]  ;;  %v7871_v41 = vld [vmem:[#allocation3 + $0x3e] sm:$0xff] }
 0x510   : > { %10971 = vmatprep.mubr.f32.mxu1 %v15334_v8  ;;  %11711 = vmatpush3.bf16.msra.mxu1 %v11708_v32  ;;  %v8688_v8 = vld [vmem:[%s15649_s3 + $0x410] sm:$0xff] }
 0x511   : > { %11713 = vmatprep.subr.bf16.mxu1 %v11712_v37  ;;  %v11736_v20 = vpack.c.bf16 %v8689_v24, %v8688_v8  ;;  %v7484_v32 = vld [vmem:[#allocation3 + $0xd5] sm:$0xff]  ;;  %v7875_v8 = vld [vmem:[#allocation3 + $0x5e] sm:$0xff]  ;;  %v7876_v24 = vld [vmem:[#allocation3 + $0x66] sm:$0xff] }
 0x513   : > { %10972 = vmatmul.mubr.f32.gmra.mrb[6].mxu1 %v15337_v55  ;;  %v7462_v55 = vld [vmem:[#allocation3 + $0x25] sm:$0xff] }
 0x514   : > { %10974 = vmatprep.mubr.f32.mxu1 %v15346_v5  ;;  %11715 = vmatpush3.bf16.msra.mxu1 %v11712_v37  ;;  %v8690_v5 = vld [vmem:[%s15649_s3 + $0x420] sm:$0xff]  ;;  %v7487_v37 = vld [vmem:[#allocation3 + $0xed] sm:$0xff] }
 0x515   : > { %11717 = vmatprep.subr.bf16.mxu1 %v11716_v11  ;;  %v11740_v25 = vpack.c.bf16 %v8691_v47, %v8690_v5  ;;  %v7880_v5 = vld [vmem:[#allocation3 + $0x86] sm:$0xff]  ;;  %v7881_v47 = vld [vmem:[#allocation3 + $0x8e] sm:$0xff] }
 0x517   : > { %10975 = vmatmul.mubr.f32.gmra.mrb[8].mxu1 %v15349_v61  ;;  %v7464_v61 = vld [vmem:[#allocation3 + $0x35] sm:$0xff] }
 0x518   : > { %10977 = vmatprep.mubr.f32.mxu1 %v15358_v26  ;;  %11719 = vmatpush3.bf16.msra.mxu1 %v11716_v11  ;;  %v8692_v26 = vld [vmem:[%s15649_s3 + $0x430] sm:$0xff]  ;;  %v7490_v11 = vld [vmem:[#allocation3 + $0x105] sm:$0xff] }
 0x519   : > { %11721 = vmatprep.subr.bf16.mxu1 %v11720_v38  ;;  %v11744_v51 = vpack.c.bf16 %v8693_v58, %v8692_v26  ;;  %v7885_v26 = vld [vmem:[#allocation3 + $0xae] sm:$0xff]  ;;  %v7886_v58 = vld [vmem:[#allocation3 + $0xb6] sm:$0xff] }
 0x51b   : > { %10978 = vmatmul.mubr.f32.gmra.mrb[10].mxu1 %v15361_v44  ;;  %v7466_v44 = vld [vmem:[#allocation3 + $0x45] sm:$0xff] }
 0x51c   : > { %10980 = vmatprep.mubr.f32.mxu1 %v15370_v16  ;;  %11723 = vmatpush3.bf16.msra.mxu1 %v11720_v38  ;;  %v8694_v16 = vld [vmem:[%s15649_s3 + $0x440] sm:$0xff] }
 0x51d   : > { %11725 = vmatprep.subr.bf16.mxu1 %v11724_v17  ;;  %v7493_v38 = vld [vmem:[#allocation3 + $0x11d] sm:$0xff] }
 0x51f   : > { %10981 = vmatmul.mubr.f32.gmra.mrb[12].mxu1 %v15373_v7  ;;  %v7468_v7 = vld [vmem:[#allocation3 + $0x55] sm:$0xff] }
 0x520   : > { %10983 = vmatprep.mubr.f32.mxu1 %v15376_v12  ;;  %11727 = vmatpush3.bf16.msra.mxu1 %v11724_v17  ;;  %v11748_v12 = vpack.c.bf16 %v8695_v50, %v8694_v16  ;;  %v7495_v17 = vld [vmem:[#allocation3 + $0x12d] sm:$0xff]  ;;  %v7890_v16 = vld [vmem:[#allocation3 + $0xd6] sm:$0xff]  ;;  %v7891_v50 = vld [vmem:[#allocation3 + $0xde] sm:$0xff] }
 0x521   : > { %11729 = vmatprep.subr.bf16.mxu1 %v11728_v19 }
 0x523   : > { %10984 = vmatmul.mubr.f32.gmra.mrb[14].mxu1 %v15379_v22  ;;  %v7469_v22 = vld [vmem:[#allocation3 + $0x5d] sm:$0xff] }
 0x524   : > { %10986 = vmatprep.mubr.f32.mxu1 %v15382_v9  ;;  %11731 = vmatpush3.bf16.msra.mxu1 %v11728_v19  ;;  %v8696_v9 = vld [vmem:[%s15649_s3 + $0x450] sm:$0xff] }
 0x525   : > { %11733 = vmatprep.subr.bf16.mxu1 %v11732_v6  ;;  %v7869_v19 = vld [vmem:[#allocation3 + $0x2e] sm:$0xff] }
 0x527   : > { %10987 = vmatmul.mubr.f32.gmra.mrb[16].mxu1 %v15385_v10  ;;  %v8697_v10 = vld [vmem:[%s15649_s3 + $0x458] sm:$0xff] }
 0x528   : > { %10989 = vmatprep.mubr.f32.mxu1 %v15388_v30  ;;  %v7470_v30 = vld [vmem:[#allocation3 + $0x65] sm:$0xff] }
 0x52b   : > { %10990 = vmatmul.mubr.f32.gmra.mrb[18].mxu1 %v15391_v46  ;;  %v11752_v46 = vpack.c.bf16 %v8697_v10, %v8696_v9  ;;  %v7895_v9 = vld [vmem:[#allocation3 + $0xfe] sm:$0xff]  ;;  %v7896_v10 = vld [vmem:[#allocation3 + $0x106] sm:$0xff] }
 0x52c   : > { %10992 = vmatprep.mubr.f32.mxu1 %v15394_v15  ;;  %v7471_v15 = vld [vmem:[#allocation3 + $0x6d] sm:$0xff] }
 0x52f   : > { %10993 = vmatmul.mubr.f32.gmra.mrb[20].mxu1 %v15397_v27  ;;  %v8698_v27 = vld [vmem:[%s15649_s3 + $0x460] sm:$0xff] }
 0x530   : > { %10995 = vmatprep.mubr.f32.mxu1 %v15400_v53  ;;  %v8699_v53 = vld [vmem:[%s15649_s3 + $0x468] sm:$0xff] }
 0x533   : > { %10996 = vmatmul.mubr.f32.gmra.mrb[22].mxu1 %v15403_v54  ;;  %v7472_v54 = vld [vmem:[#allocation3 + $0x75] sm:$0xff] }
 0x534   : > { %10998 = vmatprep.mubr.f32.mxu1 %v15406_v36  ;;  %v11756_v36 = vpack.c.bf16 %v8699_v53, %v8698_v27  ;;  %v7900_v27 = vld [vmem:[#allocation3 + $0x126] sm:$0xff]  ;;  %v7902_v53 = vld [vmem:[#allocation3 + $0x136] sm:$0xff] }
 0x537   : > { %10999 = vmatmul.mubr.f32.gmra.mrb[24].mxu1 %v15409_v56  ;;  %v7473_v56 = vld [vmem:[#allocation3 + $0x7d] sm:$0xff] }
 0x538   : > { %11001 = vmatprep.mubr.f32.mxu1 %v15412_v21  ;;  %v8700_v21 = vld [vmem:[%s15649_s3 + $0x470] sm:$0xff] }
 0x53b   : > { %11002 = vmatmul.mubr.f32.gmra.mrb[26].mxu1 %v15415_v33  ;;  %v8701_v33 = vld [vmem:[%s15649_s3 + $0x478] sm:$0xff] }
 0x53c   : > { %11004 = vmatprep.mubr.f32.mxu1 %v15418_v59  ;;  %v7474_v59 = vld [vmem:[#allocation3 + $0x85] sm:$0xff] }
 0x53f   : > { %11005 = vmatmul.mubr.f32.gmra.mrb[28].mxu1 %v15421_v14  ;;  %v11760_v14 = vpack.c.bf16 %v8701_v33, %v8700_v21 }
 0x540   : > { %11007 = vmatprep.mubr.f32.mxu1 %v15424_v52  ;;  %v7475_v52 = vld [vmem:[#allocation3 + $0x8d] sm:$0xff] }
 0x543   : > { %11008 = vmatmul.mubr.f32.gmra.mrb[30].mxu1 %v15427_v3  ;;  %v7476_v3 = vld [vmem:[#allocation3 + $0x95] sm:$0xff] }
 0x544   : > { %11010 = vmatprep.mubr.f32.mxu1 %v15430_v43  ;;  %v7477_v43 = vld [vmem:[#allocation3 + $0x9d] sm:$0xff] }
 0x547   : > { %11011 = vmatmul.mubr.f32.gmra.mrb[32].mxu1 %v15433_v35  ;;  %v7478_v35 = vld [vmem:[#allocation3 + $0xa5] sm:$0xff] }
 0x548   : > { %11013 = vmatprep.mubr.f32.mxu1 %v7090_v23  ;;  %v7873_v23 = vld [vmem:[#allocation3 + $0x4e] sm:$0xff] }
 0x54b   : > { %11014 = vmatmul.mubr.f32.gmra.mrb[34].mxu1 %v7091_v31  ;;  %v7874_v31 = vld [vmem:[#allocation3 + $0x56] sm:$0xff] }
 0x54c   : > { %11048 = vmatprep.mubr.f32.mxu1 %v7462_v55  ;;  %v7877_v55 = vld [vmem:[#allocation3 + $0x6e] sm:$0xff] }
 0x54f   : > { %11049 = vmatmul.mubr.f32.vlgmr.msra.gmra.mrb[0].mxu1 %v7463_v0  ;;  %v7879_v0 = vld [vmem:[#allocation3 + $0x7e] sm:$0xff] }
 0x550   : > { %11051 = vmatprep.mubr.f32.mxu1 %v7464_v61  ;;  %11735 = vmatpush3.bf16.msra.mxu1 %v11732_v6  ;;  %v7872_v6 = vld [vmem:[#allocation3 + $0x46] sm:$0xff]  ;;  %v7882_v61 = vld [vmem:[#allocation3 + $0x96] sm:$0xff] }
 0x551   : > { %11737 = vmatprep.subr.bf16.mxu1 %v11736_v20 }
 0x553   : > { %11052 = vmatmul.mubr.f32.gmra.mrb[2].mxu1 %v7465_v45  ;;  %v7884_v45 = vld [vmem:[#allocation3 + $0xa6] sm:$0xff] }
 0x554   : > { %11054 = vmatprep.mubr.f32.mxu1 %v7466_v44  ;;  %11739 = vmatpush3.bf16.msra.mxu1 %v11736_v20  ;;  %v7878_v20 = vld [vmem:[#allocation3 + $0x76] sm:$0xff]  ;;  %v7887_v44 = vld [vmem:[#allocation3 + $0xbe] sm:$0xff] }
 0x555   : > { %11741 = vmatprep.subr.bf16.mxu1 %v11740_v25 }
 0x557   : > { %11055 = vmatmul.mubr.f32.gmra.mrb[4].mxu1 %v7467_v13  ;;  %v7889_v13 = vld [vmem:[#allocation3 + $0xce] sm:$0xff] }
 0x558   : > { %11057 = vmatprep.mubr.f32.mxu1 %v7468_v7  ;;  %11743 = vmatpush3.bf16.msra.mxu1 %v11740_v25  ;;  %v7883_v25 = vld [vmem:[#allocation3 + $0x9e] sm:$0xff]  ;;  %v7892_v7 = vld [vmem:[#allocation3 + $0xe6] sm:$0xff] }
 0x559   : > { %11745 = vmatprep.subr.bf16.mxu1 %v11744_v51 }
 0x55b   : > { %11058 = vmatmul.mubr.f32.gmra.mrb[6].mxu1 %v7469_v22  ;;  %v7894_v22 = vld [vmem:[#allocation3 + $0xf6] sm:$0xff] }
 0x55c   : > { %11060 = vmatprep.mubr.f32.mxu1 %v7470_v30  ;;  %11747 = vmatpush3.bf16.msra.mxu1 %v11744_v51  ;;  %v7888_v51 = vld [vmem:[#allocation3 + $0xc6] sm:$0xff]  ;;  %v7897_v30 = vld [vmem:[#allocation3 + $0x10e] sm:$0xff] }
 0x55d   : > { %11749 = vmatprep.subr.bf16.mxu1 %v11748_v12 }
 0x55f   : > { %11061 = vmatmul.mubr.f32.gmra.mrb[8].mxu1 %v7471_v15  ;;  %v7899_v15 = vld [vmem:[#allocation3 + $0x11e] sm:$0xff] }
 0x560   : > { %11063 = vmatprep.mubr.f32.mxu1 %v7472_v54  ;;  %11751 = vmatpush3.bf16.msra.mxu1 %v11748_v12  ;;  %v7893_v12 = vld [vmem:[#allocation3 + $0xee] sm:$0xff] }
 0x561   : > { %11753 = vmatprep.subr.bf16.mxu1 %v11752_v46  ;;  %v7901_v54 = vld [vmem:[#allocation3 + $0x12e] sm:$0xff] }
 0x563   : > { %11064 = vmatmul.mubr.f32.gmra.mrb[10].mxu1 %v7473_v56  ;;  %v15564_v56 = vld [vmem:[%s15650_s4] ss:$0 sm:$0xff] }
 0x564   : > { %11066 = vmatprep.mubr.f32.mxu1 %v7474_v59  ;;  %11755 = vmatpush3.bf16.msra.mxu1 %v11752_v46  ;;  %v7898_v46 = vld [vmem:[#allocation3 + $0x116] sm:$0xff] }
 0x565   : > { %11757 = vmatprep.subr.bf16.mxu1 %v11756_v36 }
 0x567   : > { %11067 = vmatmul.mubr.f32.gmra.mrb[12].mxu1 %v7475_v52 }
 0x568   : > { %11069 = vmatprep.mubr.f32.mxu1 %v7476_v3  ;;  %11759 = vmatpush3.bf16.msra.mxu1 %v11756_v36  ;;  %v7903_v36 = vld [vmem:[#allocation3 + $0x13e] sm:$0xff] }
 0x569   : > { %11761 = vmatprep.subr.bf16.mxu1 %v11760_v14 }
 0x56b   : > { %11070 = vmatmul.mubr.f32.gmra.mrb[14].mxu1 %v7477_v43 }
 0x56c   : > { %11072 = vmatprep.mubr.f32.mxu1 %v7478_v35  ;;  %11763 = vmatpush3.bf16.msra.mxu1 %v11760_v14 }
 0x56f   : > { %11073 = vmatmul.mubr.f32.gmra.mrb[16].mxu1 %v7479_v48 }
 0x570   : > { %11075 = vmatprep.mubr.f32.mxu1 %v7480_v4 }
 0x573   : > { %11076 = vmatmul.mubr.f32.gmra.mrb[18].mxu1 %v7481_v1 }
 0x574   : > { %11078 = vmatprep.mubr.f32.mxu1 %v7482_v18 }
 0x577   : > { %11079 = vmatmul.mubr.f32.gmra.mrb[20].mxu1 %v7483_v57 }
 0x578   : > { %11081 = vmatprep.mubr.f32.mxu1 %v7484_v32 }
 0x57b   : > { %11082 = vmatmul.mubr.f32.gmra.mrb[22].mxu1 %v7485_v42 }
 0x57c   : > { %11084 = vmatprep.mubr.f32.mxu1 %v7486_v40 }
 0x57f   : > { %11085 = vmatmul.mubr.f32.gmra.mrb[24].mxu1 %v7487_v37 }
 0x580   : > { %11087 = vmatprep.mubr.f32.mxu1 %v7488_v62 }
 0x583   : > { %11088 = vmatmul.mubr.f32.gmra.mrb[26].mxu1 %v7489_v34 }
 0x584   : > { %11090 = vmatprep.mubr.f32.mxu1 %v7490_v11 }
 0x587   : > { %11091 = vmatmul.mubr.f32.gmra.mrb[28].mxu1 %v7491_v49 }
 0x588   : > { %11093 = vmatprep.mubr.f32.mxu1 %v7492_v60 }
 0x58b   : > { %11094 = vmatmul.mubr.f32.gmra.mrb[30].mxu1 %v7493_v38 }
 0x58c   : > { %11096 = vmatprep.mubr.f32.mxu1 %v7494_v63 }
 0x58f   : > { %11097 = vmatmul.mubr.f32.gmra.mrb[32].mxu1 %v7495_v17 }
 0x590   : > { %11099 = vmatprep.mubr.f32.mxu1 %v7496_v2 }
 0x593   : > { %11100 = vmatmul.mubr.f32.gmra.mrb[34].mxu1 %v7497_v39 }
 0x594   : > { %11134 = vmatprep.mubr.f32.mxu1 %v7868_v29 }
 0x597   : > { %11135 = vmatmul.mubr.f32.vlgmr.msra.gmra.mrb[0].mxu1 %v7869_v19 }
 0x598   : > { %11137 = vmatprep.mubr.f32.mxu1 %v7870_v28 }
 0x59b   : > { %11138 = vmatmul.mubr.f32.gmra.mrb[2].mxu1 %v7871_v41 }
 0x59c   : > { %11140 = vmatprep.mubr.f32.mxu1 %v7872_v6 }
 0x59f   : > { %11141 = vmatmul.mubr.f32.gmra.mrb[4].mxu1 %v7873_v23 }
 0x5a0   : > { %11143 = vmatprep.mubr.f32.mxu1 %v7874_v31 }
 0x5a3   : > { %11144 = vmatmul.mubr.f32.gmra.mrb[6].mxu1 %v7875_v8 }
 0x5a4   : > { %11146 = vmatprep.mubr.f32.mxu1 %v7876_v24 }
 0x5a7   : > { %11147 = vmatmul.mubr.f32.gmra.mrb[8].mxu1 %v7877_v55 }
 0x5a8   : > { %11149 = vmatprep.mubr.f32.mxu1 %v7878_v20 }
 0x5ab   : > { %11150 = vmatmul.mubr.f32.gmra.mrb[10].mxu1 %v7879_v0 }
 0x5ac   : > { %11152 = vmatprep.mubr.f32.mxu1 %v7880_v5 }
 0x5af   : > { %11153 = vmatmul.mubr.f32.gmra.mrb[12].mxu1 %v7881_v47 }
 0x5b0   : > { %11155 = vmatprep.mubr.f32.mxu1 %v7882_v61 }
 0x5b3   : > { %11156 = vmatmul.mubr.f32.gmra.mrb[14].mxu1 %v7883_v25 }
 0x5b4   : > { %11158 = vmatprep.mubr.f32.mxu1 %v7884_v45 }
 0x5b7   : > { %11159 = vmatmul.mubr.f32.gmra.mrb[16].mxu1 %v7885_v26 }
 0x5b8   : > { %11161 = vmatprep.mubr.f32.mxu1 %v7886_v58 }
 0x5bb   : > { %11162 = vmatmul.mubr.f32.gmra.mrb[18].mxu1 %v7887_v44 }
 0x5bc   : > { %11164 = vmatprep.mubr.f32.mxu1 %v7888_v51 }
 0x5bf   : > { %11165 = vmatmul.mubr.f32.gmra.mrb[20].mxu1 %v7889_v13 }
 0x5c0   : > { %11167 = vmatprep.mubr.f32.mxu1 %v7890_v16 }
 0x5c3   : > { %11168 = vmatmul.mubr.f32.gmra.mrb[22].mxu1 %v7891_v50 }
 0x5c4   : > { %11170 = vmatprep.mubr.f32.mxu1 %v7892_v7 }
 0x5c7   : > { %11171 = vmatmul.mubr.f32.gmra.mrb[24].mxu1 %v7893_v12 }
 0x5c8   : > { %11173 = vmatprep.mubr.f32.mxu1 %v7894_v22 }
 0x5cb   : > { %11174 = vmatmul.mubr.f32.gmra.mrb[26].mxu1 %v7895_v9 }
 0x5cc   : > { %11176 = vmatprep.mubr.f32.mxu1 %v7896_v10 }
 0x5cf   : > { %11177 = vmatmul.mubr.f32.gmra.mrb[28].mxu1 %v7897_v30 }
 0x5d0   : > { %11179 = vmatprep.mubr.f32.mxu1 %v7898_v46 }
 0x5d3   : > { %11180 = vmatmul.mubr.f32.gmra.mrb[30].mxu1 %v7899_v15 }
 0x5d4   : > { %11182 = vmatprep.mubr.f32.mxu1 %v7900_v27 }
 0x5d7   : > { %11183 = vmatmul.mubr.f32.gmra.mrb[32].mxu1 %v7901_v54 }
 0x5d8   : > { %11185 = vmatprep.mubr.f32.mxu1 %v7902_v53 }
 0x5db   : > { %11186 = vmatmul.mubr.f32.gmra.mrb[34].mxu1 %v7903_v36 }
 0x66a   : > { %v11136_v21 = vpop.f32.mrb[0].mxu1 }
 0x66b   : > { %v11800_v33 = vadd.f32 %v11136_v21, %v15564_v56  ;;  %v7987_v59 = vpop.f32.mrb[1].mxu1 }
 0x66c   : > { %v11801_v14 = vadd.f32 %v15564_v56, %v7987_v59 }
 0x66d   : > { %v8311_v52 = vmax.f32 %v11800_v33, 0.0 }
 0x66e   : > { %v8310_v3 = vmax.f32 %v11801_v14, 0.0  ;;  %v11139_v43 = vpop.f32.mrb[2].mxu1 }
 0x66f   : > { %8347 = vst [vmem:[%s15570_s22 + $0x8] sm:$0xff] %v8311_v52  ;;  %v11802_v35 = vadd.f32 %v11139_v43, %v15564_v56  ;;  %v7997_v48 = vpop.f32.mrb[3].mxu1 }
 0x670   : > { %8346 = vst [vmem:[%s15570_s22] sm:$0xff] %v8310_v3  ;;  %v11803_v4 = vadd.f32 %v15564_v56, %v7997_v48 }
 0x671   : > { %v8313_v1 = vmax.f32 %v11802_v35, 0.0 }
 0x672   : > { %v8312_v18 = vmax.f32 %v11803_v4, 0.0  ;;  %v11142_v57 = vpop.f32.mrb[4].mxu1 }
 0x673   : > { %8349 = vst [vmem:[%s15570_s22 + $0x18] sm:$0xff] %v8313_v1  ;;  %v11804_v32 = vadd.f32 %v11142_v57, %v15564_v56  ;;  %v8007_v42 = vpop.f32.mrb[5].mxu1 }
 0x674   : > { %8348 = vst [vmem:[%s15570_s22 + $0x10] sm:$0xff] %v8312_v18  ;;  %v11805_v40 = vadd.f32 %v15564_v56, %v8007_v42 }
 0x675   : > { %v8315_v37 = vmax.f32 %v11804_v32, 0.0 }
 0x676   : > { %v8314_v62 = vmax.f32 %v11805_v40, 0.0  ;;  %v11145_v34 = vpop.f32.mrb[6].mxu1 }
 0x677   : > { %8351 = vst [vmem:[%s15570_s22 + $0x28] sm:$0xff] %v8315_v37  ;;  %v11806_v11 = vadd.f32 %v11145_v34, %v15564_v56  ;;  %v8017_v49 = vpop.f32.mrb[7].mxu1 }
 0x678   : > { %8350 = vst [vmem:[%s15570_s22 + $0x20] sm:$0xff] %v8314_v62  ;;  %v11807_v60 = vadd.f32 %v15564_v56, %v8017_v49 }
 0x679   : > { %v8317_v38 = vmax.f32 %v11806_v11, 0.0 }
 0x67a   : > { %v8316_v63 = vmax.f32 %v11807_v60, 0.0  ;;  %v11148_v2 = vpop.f32.mrb[8].mxu1 }
 0x67b   : > { %8353 = vst [vmem:[%s15570_s22 + $0x38] sm:$0xff] %v8317_v38  ;;  %v11808_v17 = vadd.f32 %v11148_v2, %v15564_v56  ;;  %v8027_v39 = vpop.f32.mrb[9].mxu1 }
 0x67c   : > { %8352 = vst [vmem:[%s15570_s22 + $0x30] sm:$0xff] %v8316_v63  ;;  %v11809_v29 = vadd.f32 %v15564_v56, %v8027_v39 }
 0x67d   : > { %v8319_v19 = vmax.f32 %v11808_v17, 0.0 }
 0x67e   : > { %v8318_v28 = vmax.f32 %v11809_v29, 0.0  ;;  %v11151_v41 = vpop.f32.mrb[10].mxu1 }
 0x67f   : > { %8355 = vst [vmem:[%s15570_s22 + $0x48] sm:$0xff] %v8319_v19  ;;  %v11810_v6 = vadd.f32 %v11151_v41, %v15564_v56  ;;  %v8037_v23 = vpop.f32.mrb[11].mxu1 }
 0x680   : > { %8354 = vst [vmem:[%s15570_s22 + $0x40] sm:$0xff] %v8318_v28  ;;  %v11811_v31 = vadd.f32 %v15564_v56, %v8037_v23 }
 0x681   : > { %v8321_v8 = vmax.f32 %v11810_v6, 0.0 }
 0x682   : > { %v8320_v24 = vmax.f32 %v11811_v31, 0.0  ;;  %v11154_v55 = vpop.f32.mrb[12].mxu1 }
 0x683   : > { %8357 = vst [vmem:[%s15570_s22 + $0x58] sm:$0xff] %v8321_v8  ;;  %v11812_v20 = vadd.f32 %v11154_v55, %v15564_v56  ;;  %v8047_v0 = vpop.f32.mrb[13].mxu1 }
 0x684   : > { %8356 = vst [vmem:[%s15570_s22 + $0x50] sm:$0xff] %v8320_v24  ;;  %v11813_v5 = vadd.f32 %v15564_v56, %v8047_v0 }
 0x685   : > { %v8323_v47 = vmax.f32 %v11812_v20, 0.0 }
 0x686   : > { %v8322_v61 = vmax.f32 %v11813_v5, 0.0  ;;  %v11157_v25 = vpop.f32.mrb[14].mxu1 }
 0x687   : > { %8359 = vst [vmem:[%s15570_s22 + $0x68] sm:$0xff] %v8323_v47  ;;  %v11814_v45 = vadd.f32 %v11157_v25, %v15564_v56  ;;  %v8057_v26 = vpop.f32.mrb[15].mxu1 }
 0x688   : > { %8358 = vst [vmem:[%s15570_s22 + $0x60] sm:$0xff] %v8322_v61  ;;  %v11815_v58 = vadd.f32 %v15564_v56, %v8057_v26 }
 0x689   : > { %v8325_v44 = vmax.f32 %v11814_v45, 0.0 }
 0x68a   : > { %v8324_v51 = vmax.f32 %v11815_v58, 0.0  ;;  %v11160_v13 = vpop.f32.mrb[16].mxu1 }
 0x68b   : > { %8361 = vst [vmem:[%s15570_s22 + $0x78] sm:$0xff] %v8325_v44  ;;  %v11816_v16 = vadd.f32 %v11160_v13, %v15564_v56  ;;  %v8067_v50 = vpop.f32.mrb[17].mxu1 }
 0x68c   : > { %8360 = vst [vmem:[%s15570_s22 + $0x70] sm:$0xff] %v8324_v51  ;;  %v11817_v7 = vadd.f32 %v15564_v56, %v8067_v50 }
 0x68d   : > { %v8327_v12 = vmax.f32 %v11816_v16, 0.0 }
 0x68e   : > { %v8326_v22 = vmax.f32 %v11817_v7, 0.0  ;;  %v11163_v9 = vpop.f32.mrb[18].mxu1 }
 0x68f   : > { %8363 = vst [vmem:[%s15570_s22 + $0x88] sm:$0xff] %v8327_v12  ;;  %v11818_v10 = vadd.f32 %v11163_v9, %v15564_v56  ;;  %v8077_v30 = vpop.f32.mrb[19].mxu1 }
 0x690   : > { %8362 = vst [vmem:[%s15570_s22 + $0x80] sm:$0xff] %v8326_v22  ;;  %v11819_v46 = vadd.f32 %v15564_v56, %v8077_v30 }
 0x691   : > { %v8329_v15 = vmax.f32 %v11818_v10, 0.0 }
 0x692   : > { %v8328_v27 = vmax.f32 %v11819_v46, 0.0  ;;  %v11166_v53 = vpop.f32.mrb[20].mxu1 }
 0x693   : > { %8365 = vst [vmem:[%s15570_s22 + $0x98] sm:$0xff] %v8329_v15  ;;  %v11820_v54 = vadd.f32 %v11166_v53, %v15564_v56  ;;  %v8087_v36 = vpop.f32.mrb[21].mxu1 }
 0x694   : > { %8364 = vst [vmem:[%s15570_s22 + $0x90] sm:$0xff] %v8328_v27  ;;  %v11821_v21 = vadd.f32 %v15564_v56, %v8087_v36 }
 0x695   : > { %v8331_v33 = vmax.f32 %v11820_v54, 0.0 }
 0x696   : > { %v8330_v59 = vmax.f32 %v11821_v21, 0.0  ;;  %v11169_v14 = vpop.f32.mrb[22].mxu1 }
 0x697   : > { %8367 = vst [vmem:[%s15570_s22 + $0xa8] sm:$0xff] %v8331_v33  ;;  %v11822_v52 = vadd.f32 %v11169_v14, %v15564_v56  ;;  %v8097_v3 = vpop.f32.mrb[23].mxu1 }
 0x698   : > { %8366 = vst [vmem:[%s15570_s22 + $0xa0] sm:$0xff] %v8330_v59  ;;  %v11823_v43 = vadd.f32 %v15564_v56, %v8097_v3 }
 0x699   : > { %v8333_v35 = vmax.f32 %v11822_v52, 0.0 }
 0x69a   : > { %v8332_v48 = vmax.f32 %v11823_v43, 0.0  ;;  %v11172_v4 = vpop.f32.mrb[24].mxu1 }
 0x69b   : > { %8369 = vst [vmem:[%s15570_s22 + $0xb8] sm:$0xff] %v8333_v35  ;;  %v11824_v1 = vadd.f32 %v11172_v4, %v15564_v56  ;;  %v8107_v18 = vpop.f32.mrb[25].mxu1 }
 0x69c   : > { %8368 = vst [vmem:[%s15570_s22 + $0xb0] sm:$0xff] %v8332_v48  ;;  %v11825_v57 = vadd.f32 %v15564_v56, %v8107_v18 }
 0x69d   : > { %v8335_v32 = vmax.f32 %v11824_v1, 0.0 }
 0x69e   : > { %v8334_v42 = vmax.f32 %v11825_v57, 0.0  ;;  %v11175_v40 = vpop.f32.mrb[26].mxu1 }
 0x69f   : > { %8371 = vst [vmem:[%s15570_s22 + $0xc8] sm:$0xff] %v8335_v32  ;;  %v11826_v37 = vadd.f32 %v11175_v40, %v15564_v56  ;;  %v8117_v62 = vpop.f32.mrb[27].mxu1 }
 0x6a0   : > { %8370 = vst [vmem:[%s15570_s22 + $0xc0] sm:$0xff] %v8334_v42  ;;  %v11827_v34 = vadd.f32 %v15564_v56, %v8117_v62 }
 0x6a1   : > { %v8337_v11 = vmax.f32 %v11826_v37, 0.0 }
 0x6a2   : > { %v8336_v49 = vmax.f32 %v11827_v34, 0.0  ;;  %v11178_v60 = vpop.f32.mrb[28].mxu1 }
 0x6a3   : > { %8373 = vst [vmem:[%s15570_s22 + $0xd8] sm:$0xff] %v8337_v11  ;;  %v11828_v38 = vadd.f32 %v11178_v60, %v15564_v56  ;;  %v8127_v63 = vpop.f32.mrb[29].mxu1 }
 0x6a4   : > { %8372 = vst [vmem:[%s15570_s22 + $0xd0] sm:$0xff] %v8336_v49  ;;  %v11829_v2 = vadd.f32 %v15564_v56, %v8127_v63 }
 0x6a5   : > { %v8339_v17 = vmax.f32 %v11828_v38, 0.0 }
 0x6a6   : > { %v8338_v39 = vmax.f32 %v11829_v2, 0.0  ;;  %v11181_v29 = vpop.f32.mrb[30].mxu1 }
 0x6a7   : > { %8375 = vst [vmem:[%s15570_s22 + $0xe8] sm:$0xff] %v8339_v17  ;;  %v11830_v19 = vadd.f32 %v11181_v29, %v15564_v56  ;;  %v8137_v28 = vpop.f32.mrb[31].mxu1 }
 0x6a8   : > { %8374 = vst [vmem:[%s15570_s22 + $0xe0] sm:$0xff] %v8338_v39  ;;  %v11831_v41 = vadd.f32 %v15564_v56, %v8137_v28 }
 0x6a9   : > { %v8341_v6 = vmax.f32 %v11830_v19, 0.0 }
 0x6aa   : > { %v8340_v23 = vmax.f32 %v11831_v41, 0.0  ;;  %v11184_v31 = vpop.f32.mrb[32].mxu1 }
 0x6ab   : > { %8377 = vst [vmem:[%s15570_s22 + $0xf8] sm:$0xff] %v8341_v6  ;;  %v11832_v8 = vadd.f32 %v11184_v31, %v15564_v56  ;;  %v8147_v24 = vpop.f32.mrb[33].mxu1 }
 0x6ac   : > { %8376 = vst [vmem:[%s15570_s22 + $0xf0] sm:$0xff] %v8340_v23  ;;  %v11833_v55 = vadd.f32 %v15564_v56, %v8147_v24 }
 0x6ad   : > { %v8343_v20 = vmax.f32 %v11832_v8, 0.0 }
 0x6ae   : > { %v8342_v0 = vmax.f32 %v11833_v55, 0.0  ;;  %v11187_v5 = vpop.f32.mrb[34].mxu1 }
 0x6af   : > { %8379 = vst [vmem:[%s15570_s22 + $0x108] sm:$0xff] %v8343_v20  ;;  %v11834_v47 = vadd.f32 %v11187_v5, %v15564_v56  ;;  %v8157_v61 = vpop.f32.mrb[35].mxu1 }
 0x6b0   : > { %8378 = vst [vmem:[%s15570_s22 + $0x100] sm:$0xff] %v8342_v0  ;;  %v11835_v25 = vadd.f32 %v15564_v56, %v8157_v61 }
 0x6b1   : > { %v8345_v45 = vmax.f32 %v11834_v47, 0.0 }
 0x6b2   : > { %v8344_v26 = vmax.f32 %v11835_v25, 0.0 }
 0x6b3   : > { %8381 = vst [vmem:[%s15570_s22 + $0x118] sm:$0xff] %v8345_v45 }
 0x6b4   : > { %8380 = vst [vmem:[%s15570_s22 + $0x110] sm:$0xff] %v8344_v26 }
 0x6b5 PF: > { %s15_s18 = sadd.s32 1, %s12504_s18  }
 0x6b6   : > { %p12_p4 = scmp.ge.s32.totalorder %s15_s18, 4  }
 0x6b8   :  { %14 = sbr.rel (!%p12_p4) target bundleno = 1 (0x1), region = 86 }

</bundles_post_ra>
